<compile_context>
chip_gen: v5e
topology: v5e:2x2
jax: 0.10.0
libtpu: 0.0.40
codegen_flags: <defaults>
</compile_context>

<pallas_src>
import functools

import jax
import jax.numpy as jnp
import numpy as np
from jax import lax
from jax.experimental import pallas as pl
from jax.experimental.pallas import tpu as pltpu

BN_EPS = 1e-5
LANE = 128


def _round_up(x, m):
    return (x + m - 1) // m * m


# ---------------------------------------------------------------------------
# Fused kernel: one grid step == NB images, everything VMEM/vreg resident.
# ---------------------------------------------------------------------------
def _fused_bottleneck_kernel(x_ref, mask_ref, w1_ref, b1_ref, w2_ref, b2_ref,
                             w3_ref, wsc_ref, b3_ref, o_ref,
                             *, H, W, NB, Cm, PAD):
    """x_ref: (M, Cin) bf16 with M = NB*H*W (image-major, then y, then x).

    mask_ref: (M, 9) f32 0/1 per-tap boundary-validity masks.
    w*_ref  : bf16 matmul weights with eval-mode BN scales folded in.
    b*_ref  : (1, C) f32 folded BN biases (b3_ref = b3 + b_shortcut merged).
    o_ref   : (M, Cep) f32.
    """
    M = NB * H * W
    x2d = x_ref[...]                                          # (M, Cin) bf16

    # ---- stage 1: 1x1 conv (BN scale folded) + bias + ReLU ----------------
    h1 = jnp.dot(x2d, w1_ref[...], preferred_element_type=jnp.float32)
    h1 = jnp.maximum(h1 + b1_ref[...], 0.0)                   # (M, Cm) f32

    # ---- stage 2: grouped 3x3 conv (pad=1) as 9 accumulated per-tap dots --
    # h1 stays flat; each tap is a statically shifted row-view of a sublane-
    # aligned zero-extended copy (PAD is a multiple of 8, so the concatenate
    # is tile-aligned and the wrap values that would leak across image
    # boundaries are killed by the precomputed masks).  No padded scratch, no
    # im2col patch, no h1 round-trip through VMEM scratch.
    zpad = jnp.zeros((PAD, Cm), jnp.float32)
    h1x = jnp.concatenate([zpad, h1, zpad], axis=0)           # (M + 2*PAD, Cm)
    acc = jnp.zeros((M, Cm), jnp.float32)
    for t in range(9):                                        # t = ky*3 + kx
        dy, dx = t // 3 - 1, t % 3 - 1
        d = dy * W + dx
        tap = h1x[PAD + d:PAD + d + M, :]                     # rows shifted by d
        if (dy, dx) != (0, 0):
            tap = tap * mask_ref[:, t:t + 1]                  # zero outside image
        acc = acc + jnp.dot(tap.astype(jnp.bfloat16), w2_ref[t],
                            preferred_element_type=jnp.float32)
    h2 = jnp.maximum(acc + b2_ref[...], 0.0)                  # (M, Cm) f32

    # ---- shortcut: 1x1 conv (BN scale folded; bias merged into b3_ref) ----
    sc = jnp.dot(x2d, wsc_ref[...], preferred_element_type=jnp.float32)

    # ---- stage 3: 1x1 expansion conv + merged bias + residual add + ReLU --
    y = jnp.dot(h2.astype(jnp.bfloat16), w3_ref[...],
                preferred_element_type=jnp.float32)
    o_ref[...] = jnp.maximum(y + sc + b3_ref[...], 0.0)


# ---------------------------------------------------------------------------
# Wrapper: single pallas_call for the whole block.
# ---------------------------------------------------------------------------
def identity_layers_c_pallas(x_nchw, params):
    N, Cin, H, W = x_nchw.shape
    Cm = params["b1"].shape[1]        # padded mid channels (lane multiple)
    Cep = params["b3sc"].shape[1]     # padded expansion channels
    Cexp = params["c_exp"]            # true expansion channels
    HW = H * W

    # Batch NB images per grid step so the matmul M-dim is >= 256 rows (fills
    # a 256-row MXU pass on v6e/v7x, >=128 on v5e), while keeping >= 2 grid
    # steps when N allows so both v7x TensorCores get work.
    NB = min(max(1, pl.cdiv(256, HW)), max(1, pl.cdiv(N, 2)))
    G = pl.cdiv(N, NB)
    Npad = G * NB
    M = NB * HW
    PAD = _round_up(W + 1, 8)   # sublane-aligned zero extension for tap shifts

    # NCHW -> (N*H*W, Cin) rows; bf16 for the MXU.
    x2d = jnp.transpose(x_nchw, (0, 2, 3, 1)).reshape(N * HW, Cin)
    if Npad != N:
        x2d = jnp.pad(x2d, ((0, (Npad - N) * HW), (0, 0)))
    x2d = x2d.astype(jnp.bfloat16)

    # Precomputed 0/1 boundary masks per tap (valid iff the tap's source pixel
    # lies inside the same image).  Tiny, constant index_map -> VMEM resident.
    yy, xx = np.arange(HW) // W, np.arange(HW) % W
    mk = np.ones((HW, 9), np.float32)
    for t in range(9):
        dy, dx = t // 3 - 1, t % 3 - 1
        v = np.ones(HW, bool)
        if dy == -1:
            v &= yy >= 1
        elif dy == 1:
            v &= yy <= H - 2
        if dx == -1:
            v &= xx >= 1
        elif dx == 1:
            v &= xx <= W - 2
        mk[:, t] = v
    mask = jnp.asarray(np.tile(mk, (NB, 1)))                  # (M, 9)

    kernel = functools.partial(_fused_bottleneck_kernel,
                               H=H, W=W, NB=NB, Cm=Cm, PAD=PAD)

    # Weights/biases/masks use constant index_maps so they are DMA'd once and
    # stay VMEM resident across grid steps.
    out = pl.pallas_call(
        kernel,
        # NOTE: could emit bf16 here (halves output writeback) if the consumer
        # of this block accepts bf16; kept f32 to match the f32 reference.
        out_shape=jax.ShapeDtypeStruct((Npad * HW, Cep), jnp.float32),
        grid=(G,),
        in_specs=[
            pl.BlockSpec((M, Cin), lambda n: (n, 0)),        # x (NB images)
            pl.BlockSpec((M, 9), lambda n: (0, 0)),          # boundary masks
            pl.BlockSpec((Cin, Cm), lambda n: (0, 0)),       # w1 (BN folded)
            pl.BlockSpec((1, Cm), lambda n: (0, 0)),         # b1
            pl.BlockSpec((9, Cm, Cm), lambda n: (0, 0, 0)),  # w2 per-tap weights
            pl.BlockSpec((1, Cm), lambda n: (0, 0)),         # b2
            pl.BlockSpec((Cm, Cep), lambda n: (0, 0)),       # w3 (BN folded)
            pl.BlockSpec((Cin, Cep), lambda n: (0, 0)),      # wsc (BN folded)
            pl.BlockSpec((1, Cep), lambda n: (0, 0)),        # b3 + b_shortcut
        ],
        out_specs=pl.BlockSpec((M, Cep), lambda n: (n, 0)),
        compiler_params=pltpu.CompilerParams(
            dimension_semantics=("parallel",)),   # 2 TCs on v7x; no-op v5e/v6e
    )(x2d, mask, params["w1"], params["b1"], params["w2"], params["b2"],
      params["w3"], params["wsc"], params["b3sc"])

    out = out[:N * HW, :Cexp].reshape(N, H, W, Cexp)
    return jnp.transpose(out, (0, 3, 1, 2))                   # back to NCHW


# ---------------------------------------------------------------------------
# Parameter construction: eval-mode BN folded into bf16 weight columns,
# lane-dense channel padding, per-tap block-diagonal grouped-conv weights.
# ---------------------------------------------------------------------------
def make_bn(key, c):
    k1, k2, k3, k4 = jax.random.split(key, 4)
    gamma = 1.0 + 0.1 * jax.random.normal(k1, (c,), jnp.float32)
    beta = 0.1 * jax.random.normal(k2, (c,), jnp.float32)
    mean = 0.1 * jax.random.normal(k3, (c,), jnp.float32)
    var = 0.5 + 0.1 * jnp.abs(jax.random.normal(k4, (c,), jnp.float32))
    scale = gamma / jnp.sqrt(var + BN_EPS)
    bias = beta - mean * scale
    return (gamma, beta, mean, var), scale, bias


def make_params(key, in_ch, out_ch, expansion, groups):
    assert out_ch % groups == 0
    exp_ch = out_ch * expansion
    cg = out_ch // groups
    Cm = _round_up(out_ch, LANE)     # lane-dense mid channels
    Cep = _round_up(exp_ch, LANE)    # lane-dense expansion channels
    ks = jax.random.split(key, 8)

    def wgt(k, shape):
        # Module weights, defined as bf16-representable f32 values.
        return (0.1 * jax.random.normal(k, shape, jnp.float32)
                ).astype(jnp.bfloat16).astype(jnp.float32)

    w1 = wgt(ks[0], (out_ch, in_ch, 1, 1))
    w2 = wgt(ks[1], (out_ch, cg, 3, 3))
    w3 = wgt(ks[2], (exp_ch, out_ch, 1, 1))
    wsc = wgt(ks[3], (exp_ch, in_ch, 1, 1))
    bn1_raw, s1, b1 = make_bn(ks[4], out_ch)
    bn2_raw, s2, b2 = make_bn(ks[5], out_ch)
    bn3_raw, s3, b3 = make_bn(ks[6], exp_ch)
    bnsc_raw, ssc, bsc = make_bn(ks[7], exp_ch)

    # 1x1 conv -> (Cin, Cout_pad) matmul weight; fold BN scale into columns,
    # zero-pad padded channels, round once to bf16.
    def pw(w4, scale, cout_pad):
        m = jnp.transpose(w4[:, :, 0, 0], (1, 0)) * scale[None, :]
        return jnp.pad(m, ((0, 0), (0, cout_pad - m.shape[1]))).astype(jnp.bfloat16)

    w1_mm = pw(w1, s1, Cm)                                           # (in_ch, Cm)
    wsc_mm = pw(wsc, ssc, Cep)                                       # (in_ch, Cep)
    w3_mm = jnp.pad(jnp.transpose(w3[:, :, 0, 0], (1, 0)) * s3[None, :],
                    ((0, Cm - out_ch), (0, Cep - exp_ch))).astype(jnp.bfloat16)

    # Grouped 3x3 -> 9 dense block-diagonal per-tap weights (tap, ic, oc):
    #   w2_tap[t, g*cg + ic, g*cg + oc] = w2[g*cg + oc, ic, ky, kx], t = ky*3+kx
    w2_np = np.asarray(w2)                                           # (out_ch, cg, 3, 3)
    w2_tap = np.zeros((9, Cm, Cm), np.float32)
    for g in range(groups):
        sl = slice(g * cg, (g + 1) * cg)
        blk = np.transpose(w2_np[sl], (2, 3, 1, 0)).reshape(9, cg, cg)  # (t, ic, oc)
        w2_tap[:, sl, sl] = blk
    w2_tap[:, :, :out_ch] *= np.asarray(s2)[None, None, :]           # fold BN scale
    w2_tap = jnp.asarray(w2_tap).astype(jnp.bfloat16)

    def pad_row(v, c):
        return jnp.pad(v, (0, c - v.shape[0])).reshape(1, c)

    params = dict(
        w1=w1_mm, b1=pad_row(b1, Cm),
        w2=w2_tap, b2=pad_row(b2, Cm),
        w3=w3_mm, wsc=wsc_mm,
        b3sc=pad_row(b3, Cep) + pad_row(bsc, Cep),   # merged epilogue bias
        c_exp=exp_ch,
    )
    raw = dict(w1=w1, w2=w2, w3=w3, wsc=wsc,
               bn1=bn1_raw, bn2=bn2_raw, bn3=bn3_raw, bnsc=bnsc_raw)
    return params, raw


# ---------------------------------------------------------------------------
# Pure-JAX reference (eval-mode conv + BN in f32 on the same module weights).
# ---------------------------------------------------------------------------
def _bn_nchw(y, bn_raw):
    gamma, beta, mean, var = bn_raw
    r = lambda a: a.reshape(1, -1, 1, 1)
    return (y - r(mean)) / jnp.sqrt(r(var) + BN_EPS) * r(gamma) + r(beta)


def identity_layers_c_ref(x_nchw, raw, groups):
    dn = ("NCHW", "OIHW", "NCHW")
    prec = lax.Precision.HIGHEST
    y = lax.conv_general_dilated(x_nchw, raw["w1"], (1, 1), "VALID",
                                 dimension_numbers=dn, precision=prec)
    y = jnp.maximum(_bn_nchw(y, raw["bn1"]), 0.0)
    y = lax.conv_general_dilated(y, raw["w2"], (1, 1), ((1, 1), (1, 1)),
                                 dimension_numbers=dn,
                                 feature_group_count=groups, precision=prec)
    y = jnp.maximum(_bn_nchw(y, raw["bn2"]), 0.0)
    y = lax.conv_general_dilated(y, raw["w3"], (1, 1), "VALID",
                                 dimension_numbers=dn, precision=prec)
    y = _bn_nchw(y, raw["bn3"])
    sc = lax.conv_general_dilated(x_nchw, raw["wsc"], (1, 1), "VALID",
                                  dimension_numbers=dn, precision=prec)
    sc = _bn_nchw(sc, raw["bnsc"])
    return jnp.maximum(y + sc, 0.0)


# ---------------------------------------------------------------------------
if __name__ == "__main__":
    # Small ResNeXt-style config: in=64, out=64, expansion=2, cardinality=8,
    # stride=1 (shortcut 1x1 conv+BN active since in_ch != out_ch*expansion).
    N, IN_CH, H, W = 4, 64, 8, 8
    OUT_CH, EXPANSION, CARDINALITY = 64, 2, 8

    key = jax.random.PRNGKey(0)
    kx, kp = jax.random.split(key)
    x = jax.random.normal(kx, (N, IN_CH, H, W), jnp.float32)

    params, raw = make_params(kp, IN_CH, OUT_CH, EXPANSION, CARDINALITY)

    out = jax.block_until_ready(identity_layers_c_pallas(x, params))

    # Reference: f32 conv+BN on the same bf16-rounded input and bf16-
    # representable module weights; tolerance covers the kernel's bf16
    # activations and the single bf16 rounding of the folded (w * bn_scale).
    x_ref_in = x.astype(jnp.bfloat16).astype(jnp.float32)
    ref = jax.block_until_ready(identity_layers_c_ref(x_ref_in, raw, CARDINALITY))

    assert out.shape == (N, OUT_CH * EXPANSION, H, W)
    np.testing.assert_allclose(np.asarray(out), np.asarray(ref),
                               rtol=3e-2, atol=3e-2)

    print("KERNEL_OK")
</pallas_src>

<mosaic_0001>
module attributes {stable_mosaic.version = 11 : i64} {
  func.func @_fused_bottleneck_kernel(%arg0: i32, %arg1: memref<128x64xbf16, #tpu.memory_space<vmem>>, %arg2: memref<128x9xf32, #tpu.memory_space<vmem>>, %arg3: memref<64x128xbf16, #tpu.memory_space<vmem>>, %arg4: memref<1x128xf32, #tpu.memory_space<vmem>>, %arg5: memref<9x128x128xbf16, #tpu.memory_space<vmem>>, %arg6: memref<1x128xf32, #tpu.memory_space<vmem>>, %arg7: memref<128x128xbf16, #tpu.memory_space<vmem>>, %arg8: memref<64x128xbf16, #tpu.memory_space<vmem>>, %arg9: memref<1x128xf32, #tpu.memory_space<vmem>>, %arg10: memref<128x128xf32, #tpu.memory_space<vmem>>) attributes {dimension_semantics = [#tpu.dimension_semantics<parallel>], iteration_bounds = array<i64: 2>, scalar_prefetch = 0 : i64, scratch_operands = 0 : i64, tpu.core_type = #tpu.core_type<tc>, window_params = [{transform_indices = @transform_0, window_bounds = array<i64: 128, 64>}, {pipeline_mode = #tpu.pipeline_mode<synchronous>, transform_indices = @transform_1, window_bounds = array<i64: 128, 9>}, {pipeline_mode = #tpu.pipeline_mode<synchronous>, transform_indices = @transform_2, window_bounds = array<i64: 64, 128>}, {pipeline_mode = #tpu.pipeline_mode<synchronous>, transform_indices = @transform_3, window_bounds = array<i64: 1, 128>}, {pipeline_mode = #tpu.pipeline_mode<synchronous>, transform_indices = @transform_4, window_bounds = array<i64: 9, 128, 128>}, {pipeline_mode = #tpu.pipeline_mode<synchronous>, transform_indices = @transform_5, window_bounds = array<i64: 1, 128>}, {pipeline_mode = #tpu.pipeline_mode<synchronous>, transform_indices = @transform_6, window_bounds = array<i64: 128, 128>}, {pipeline_mode = #tpu.pipeline_mode<synchronous>, transform_indices = @transform_7, window_bounds = array<i64: 64, 128>}, {pipeline_mode = #tpu.pipeline_mode<synchronous>, transform_indices = @transform_8, window_bounds = array<i64: 1, 128>}, {transform_indices = @transform_9, window_bounds = array<i64: 128, 128>}]} {
    %c0 = arith.constant 0 : index
    %c0_0 = arith.constant 0 : index
    %0 = vector.load %arg1[%c0, %c0_0] : memref<128x64xbf16, #tpu.memory_space<vmem>>, vector<128x64xbf16>
    %c0_1 = arith.constant 0 : index
    %c0_2 = arith.constant 0 : index
    %1 = vector.load %arg3[%c0_1, %c0_2] : memref<64x128xbf16, #tpu.memory_space<vmem>>, vector<64x128xbf16>
    %cst = arith.constant dense<0.000000e+00> : vector<128x128xf32>
    %2 = tpu.matmul %0, %1, %cst {dimension_numbers = #tpu.dot_dimension_numbers<[1], [0], [0], [1], [0, 0, 1, 1], [], []>} : vector<128x64xbf16>, vector<64x128xbf16>, vector<128x128xf32> -> vector<128x128xf32>
    %c0_3 = arith.constant 0 : index
    %c0_4 = arith.constant 0 : index
    %3 = vector.load %arg4[%c0_3, %c0_4] : memref<1x128xf32, #tpu.memory_space<vmem>>, vector<1x128xf32>
    %4 = vector.broadcast %3 : vector<1x128xf32> to vector<128x128xf32>
    %5 = arith.addf %2, %4 : vector<128x128xf32>
    %cst_5 = arith.constant 0.000000e+00 : f32
    %6 = vector.broadcast %cst_5 : f32 to vector<128x128xf32>
    %7 = arith.maximumf %5, %6 : vector<128x128xf32>
    %cst_6 = arith.constant 0.000000e+00 : f32
    %8 = vector.broadcast %cst_6 : f32 to vector<16x128xf32>
    %9 = tpu.concatenate %8, %7, %8 in 0 : vector<16x128xf32>, vector<128x128xf32>, vector<16x128xf32> -> vector<160x128xf32>
    %cst_7 = arith.constant 0.000000e+00 : f32
    %10 = vector.broadcast %cst_7 : f32 to vector<128x128xf32>
    %11 = vector.extract_strided_slice %9 {offsets = [7, 0], sizes = [128, 128], strides = [1, 1]} : vector<160x128xf32> to vector<128x128xf32>
    %c0_8 = arith.constant 0 : index
    %c0_9 = arith.constant 0 : index
    %12 = vector.load %arg2[%c0_8, %c0_9] : memref<128x9xf32, #tpu.memory_space<vmem>>, vector<128x1xf32>
    %13 = vector.broadcast %12 : vector<128x1xf32> to vector<128x128xf32>
    %14 = arith.mulf %11, %13 : vector<128x128xf32>
    %15 = arith.truncf %14 : vector<128x128xf32> to vector<128x128xbf16>
    %c0_10 = arith.constant 0 : index
    %c0_11 = arith.constant 0 : index
    %c0_12 = arith.constant 0 : index
    %16 = vector.load %arg5[%c0_10, %c0_11, %c0_12] : memref<9x128x128xbf16, #tpu.memory_space<vmem>>, vector<1x128x128xbf16>
    %17 = vector.shape_cast %16 : vector<1x128x128xbf16> to vector<128x128xbf16>
    %cst_13 = arith.constant dense<0.000000e+00> : vector<128x128xf32>
    %18 = tpu.matmul %15, %17, %cst_13 {dimension_numbers = #tpu.dot_dimension_numbers<[1], [0], [0], [1], [0, 0, 1, 1], [], []>} : vector<128x128xbf16>, vector<128x128xbf16>, vector<128x128xf32> -> vector<128x128xf32>
    %19 = arith.addf %10, %18 : vector<128x128xf32>
    %20 = vector.extract_strided_slice %9 {offsets = [8, 0], sizes = [128, 128], strides = [1, 1]} : vector<160x128xf32> to vector<128x128xf32>
    %c0_14 = arith.constant 0 : index
    %c1 = arith.constant 1 : index
    %21 = vector.load %arg2[%c0_14, %c1] : memref<128x9xf32, #tpu.memory_space<vmem>>, vector<128x1xf32>
    %22 = vector.broadcast %21 : vector<128x1xf32> to vector<128x128xf32>
    %23 = arith.mulf %20, %22 : vector<128x128xf32>
    %24 = arith.truncf %23 : vector<128x128xf32> to vector<128x128xbf16>
    %c1_15 = arith.constant 1 : index
    %c0_16 = arith.constant 0 : index
    %c0_17 = arith.constant 0 : index
    %25 = vector.load %arg5[%c1_15, %c0_16, %c0_17] : memref<9x128x128xbf16, #tpu.memory_space<vmem>>, vector<1x128x128xbf16>
    %26 = vector.shape_cast %25 : vector<1x128x128xbf16> to vector<128x128xbf16>
    %cst_18 = arith.constant dense<0.000000e+00> : vector<128x128xf32>
    %27 = tpu.matmul %24, %26, %cst_18 {dimension_numbers = #tpu.dot_dimension_numbers<[1], [0], [0], [1], [0, 0, 1, 1], [], []>} : vector<128x128xbf16>, vector<128x128xbf16>, vector<128x128xf32> -> vector<128x128xf32>
    %28 = arith.addf %19, %27 : vector<128x128xf32>
    %29 = vector.extract_strided_slice %9 {offsets = [9, 0], sizes = [128, 128], strides = [1, 1]} : vector<160x128xf32> to vector<128x128xf32>
    %c0_19 = arith.constant 0 : index
    %c2 = arith.constant 2 : index
    %30 = vector.load %arg2[%c0_19, %c2] : memref<128x9xf32, #tpu.memory_space<vmem>>, vector<128x1xf32>
    %31 = vector.broadcast %30 : vector<128x1xf32> to vector<128x128xf32>
    %32 = arith.mulf %29, %31 : vector<128x128xf32>
    %33 = arith.truncf %32 : vector<128x128xf32> to vector<128x128xbf16>
    %c2_20 = arith.constant 2 : index
    %c0_21 = arith.constant 0 : index
    %c0_22 = arith.constant 0 : index
    %34 = vector.load %arg5[%c2_20, %c0_21, %c0_22] : memref<9x128x128xbf16, #tpu.memory_space<vmem>>, vector<1x128x128xbf16>
    %35 = vector.shape_cast %34 : vector<1x128x128xbf16> to vector<128x128xbf16>
    %cst_23 = arith.constant dense<0.000000e+00> : vector<128x128xf32>
    %36 = tpu.matmul %33, %35, %cst_23 {dimension_numbers = #tpu.dot_dimension_numbers<[1], [0], [0], [1], [0, 0, 1, 1], [], []>} : vector<128x128xbf16>, vector<128x128xbf16>, vector<128x128xf32> -> vector<128x128xf32>
    %37 = arith.addf %28, %36 : vector<128x128xf32>
    %38 = vector.extract_strided_slice %9 {offsets = [15, 0], sizes = [128, 128], strides = [1, 1]} : vector<160x128xf32> to vector<128x128xf32>
    %c0_24 = arith.constant 0 : index
    %c3 = arith.constant 3 : index
    %39 = vector.load %arg2[%c0_24, %c3] : memref<128x9xf32, #tpu.memory_space<vmem>>, vector<128x1xf32>
    %40 = vector.broadcast %39 : vector<128x1xf32> to vector<128x128xf32>
    %41 = arith.mulf %38, %40 : vector<128x128xf32>
    %42 = arith.truncf %41 : vector<128x128xf32> to vector<128x128xbf16>
    %c3_25 = arith.constant 3 : index
    %c0_26 = arith.constant 0 : index
    %c0_27 = arith.constant 0 : index
    %43 = vector.load %arg5[%c3_25, %c0_26, %c0_27] : memref<9x128x128xbf16, #tpu.memory_space<vmem>>, vector<1x128x128xbf16>
    %44 = vector.shape_cast %43 : vector<1x128x128xbf16> to vector<128x128xbf16>
    %cst_28 = arith.constant dense<0.000000e+00> : vector<128x128xf32>
    %45 = tpu.matmul %42, %44, %cst_28 {dimension_numbers = #tpu.dot_dimension_numbers<[1], [0], [0], [1], [0, 0, 1, 1], [], []>} : vector<128x128xbf16>, vector<128x128xbf16>, vector<128x128xf32> -> vector<128x128xf32>
    %46 = arith.addf %37, %45 : vector<128x128xf32>
    %47 = vector.extract_strided_slice %9 {offsets = [16, 0], sizes = [128, 128], strides = [1, 1]} : vector<160x128xf32> to vector<128x128xf32>
    %48 = arith.truncf %47 : vector<128x128xf32> to vector<128x128xbf16>
    %c4 = arith.constant 4 : index
    %c0_29 = arith.constant 0 : index
    %c0_30 = arith.constant 0 : index
    %49 = vector.load %arg5[%c4, %c0_29, %c0_30] : memref<9x128x128xbf16, #tpu.memory_space<vmem>>, vector<1x128x128xbf16>
    %50 = vector.shape_cast %49 : vector<1x128x128xbf16> to vector<128x128xbf16>
    %cst_31 = arith.constant dense<0.000000e+00> : vector<128x128xf32>
    %51 = tpu.matmul %48, %50, %cst_31 {dimension_numbers = #tpu.dot_dimension_numbers<[1], [0], [0], [1], [0, 0, 1, 1], [], []>} : vector<128x128xbf16>, vector<128x128xbf16>, vector<128x128xf32> -> vector<128x128xf32>
    %52 = arith.addf %46, %51 : vector<128x128xf32>
    %53 = vector.extract_strided_slice %9 {offsets = [17, 0], sizes = [128, 128], strides = [1, 1]} : vector<160x128xf32> to vector<128x128xf32>
    %c0_32 = arith.constant 0 : index
    %c5 = arith.constant 5 : index
    %54 = vector.load %arg2[%c0_32, %c5] : memref<128x9xf32, #tpu.memory_space<vmem>>, vector<128x1xf32>
    %55 = vector.broadcast %54 : vector<128x1xf32> to vector<128x128xf32>
    %56 = arith.mulf %53, %55 : vector<128x128xf32>
    %57 = arith.truncf %56 : vector<128x128xf32> to vector<128x128xbf16>
    %c5_33 = arith.constant 5 : index
    %c0_34 = arith.constant 0 : index
    %c0_35 = arith.constant 0 : index
    %58 = vector.load %arg5[%c5_33, %c0_34, %c0_35] : memref<9x128x128xbf16, #tpu.memory_space<vmem>>, vector<1x128x128xbf16>
    %59 = vector.shape_cast %58 : vector<1x128x128xbf16> to vector<128x128xbf16>
    %cst_36 = arith.constant dense<0.000000e+00> : vector<128x128xf32>
    %60 = tpu.matmul %57, %59, %cst_36 {dimension_numbers = #tpu.dot_dimension_numbers<[1], [0], [0], [1], [0, 0, 1, 1], [], []>} : vector<128x128xbf16>, vector<128x128xbf16>, vector<128x128xf32> -> vector<128x128xf32>
    %61 = arith.addf %52, %60 : vector<128x128xf32>
    %62 = vector.extract_strided_slice %9 {offsets = [23, 0], sizes = [128, 128], strides = [1, 1]} : vector<160x128xf32> to vector<128x128xf32>
    %c0_37 = arith.constant 0 : index
    %c6 = arith.constant 6 : index
    %63 = vector.load %arg2[%c0_37, %c6] : memref<128x9xf32, #tpu.memory_space<vmem>>, vector<128x1xf32>
    %64 = vector.broadcast %63 : vector<128x1xf32> to vector<128x128xf32>
    %65 = arith.mulf %62, %64 : vector<128x128xf32>
    %66 = arith.truncf %65 : vector<128x128xf32> to vector<128x128xbf16>
    %c6_38 = arith.constant 6 : index
    %c0_39 = arith.constant 0 : index
    %c0_40 = arith.constant 0 : index
    %67 = vector.load %arg5[%c6_38, %c0_39, %c0_40] : memref<9x128x128xbf16, #tpu.memory_space<vmem>>, vector<1x128x128xbf16>
    %68 = vector.shape_cast %67 : vector<1x128x128xbf16> to vector<128x128xbf16>
    %cst_41 = arith.constant dense<0.000000e+00> : vector<128x128xf32>
    %69 = tpu.matmul %66, %68, %cst_41 {dimension_numbers = #tpu.dot_dimension_numbers<[1], [0], [0], [1], [0, 0, 1, 1], [], []>} : vector<128x128xbf16>, vector<128x128xbf16>, vector<128x128xf32> -> vector<128x128xf32>
    %70 = arith.addf %61, %69 : vector<128x128xf32>
    %71 = vector.extract_strided_slice %9 {offsets = [24, 0], sizes = [128, 128], strides = [1, 1]} : vector<160x128xf32> to vector<128x128xf32>
    %c0_42 = arith.constant 0 : index
    %c7 = arith.constant 7 : index
    %72 = vector.load %arg2[%c0_42, %c7] : memref<128x9xf32, #tpu.memory_space<vmem>>, vector<128x1xf32>
    %73 = vector.broadcast %72 : vector<128x1xf32> to vector<128x128xf32>
    %74 = arith.mulf %71, %73 : vector<128x128xf32>
    %75 = arith.truncf %74 : vector<128x128xf32> to vector<128x128xbf16>
    %c7_43 = arith.constant 7 : index
    %c0_44 = arith.constant 0 : index
    %c0_45 = arith.constant 0 : index
    %76 = vector.load %arg5[%c7_43, %c0_44, %c0_45] : memref<9x128x128xbf16, #tpu.memory_space<vmem>>, vector<1x128x128xbf16>
    %77 = vector.shape_cast %76 : vector<1x128x128xbf16> to vector<128x128xbf16>
    %cst_46 = arith.constant dense<0.000000e+00> : vector<128x128xf32>
    %78 = tpu.matmul %75, %77, %cst_46 {dimension_numbers = #tpu.dot_dimension_numbers<[1], [0], [0], [1], [0, 0, 1, 1], [], []>} : vector<128x128xbf16>, vector<128x128xbf16>, vector<128x128xf32> -> vector<128x128xf32>
    %79 = arith.addf %70, %78 : vector<128x128xf32>
    %80 = vector.extract_strided_slice %9 {offsets = [25, 0], sizes = [128, 128], strides = [1, 1]} : vector<160x128xf32> to vector<128x128xf32>
    %c0_47 = arith.constant 0 : index
    %c8 = arith.constant 8 : index
    %81 = vector.load %arg2[%c0_47, %c8] : memref<128x9xf32, #tpu.memory_space<vmem>>, vector<128x1xf32>
    %82 = vector.broadcast %81 : vector<128x1xf32> to vector<128x128xf32>
    %83 = arith.mulf %80, %82 : vector<128x128xf32>
    %84 = arith.truncf %83 : vector<128x128xf32> to vector<128x128xbf16>
    %c8_48 = arith.constant 8 : index
    %c0_49 = arith.constant 0 : index
    %c0_50 = arith.constant 0 : index
    %85 = vector.load %arg5[%c8_48, %c0_49, %c0_50] : memref<9x128x128xbf16, #tpu.memory_space<vmem>>, vector<1x128x128xbf16>
    %86 = vector.shape_cast %85 : vector<1x128x128xbf16> to vector<128x128xbf16>
    %cst_51 = arith.constant dense<0.000000e+00> : vector<128x128xf32>
    %87 = tpu.matmul %84, %86, %cst_51 {dimension_numbers = #tpu.dot_dimension_numbers<[1], [0], [0], [1], [0, 0, 1, 1], [], []>} : vector<128x128xbf16>, vector<128x128xbf16>, vector<128x128xf32> -> vector<128x128xf32>
    %88 = arith.addf %79, %87 : vector<128x128xf32>
    %c0_52 = arith.constant 0 : index
    %c0_53 = arith.constant 0 : index
    %89 = vector.load %arg6[%c0_52, %c0_53] : memref<1x128xf32, #tpu.memory_space<vmem>>, vector<1x128xf32>
    %90 = vector.broadcast %89 : vector<1x128xf32> to vector<128x128xf32>
    %91 = arith.addf %88, %90 : vector<128x128xf32>
    %cst_54 = arith.constant 0.000000e+00 : f32
    %92 = vector.broadcast %cst_54 : f32 to vector<128x128xf32>
    %93 = arith.maximumf %91, %92 : vector<128x128xf32>
    %c0_55 = arith.constant 0 : index
    %c0_56 = arith.constant 0 : index
    %94 = vector.load %arg8[%c0_55, %c0_56] : memref<64x128xbf16, #tpu.memory_space<vmem>>, vector<64x128xbf16>
    %cst_57 = arith.constant dense<0.000000e+00> : vector<128x128xf32>
    %95 = tpu.matmul %0, %94, %cst_57 {dimension_numbers = #tpu.dot_dimension_numbers<[1], [0], [0], [1], [0, 0, 1, 1], [], []>} : vector<128x64xbf16>, vector<64x128xbf16>, vector<128x128xf32> -> vector<128x128xf32>
    %96 = arith.truncf %93 : vector<128x128xf32> to vector<128x128xbf16>
    %c0_58 = arith.constant 0 : index
    %c0_59 = arith.constant 0 : index
    %97 = vector.load %arg7[%c0_58, %c0_59] : memref<128x128xbf16, #tpu.memory_space<vmem>>, vector<128x128xbf16>
    %cst_60 = arith.constant dense<0.000000e+00> : vector<128x128xf32>
    %98 = tpu.matmul %96, %97, %cst_60 {dimension_numbers = #tpu.dot_dimension_numbers<[1], [0], [0], [1], [0, 0, 1, 1], [], []>} : vector<128x128xbf16>, vector<128x128xbf16>, vector<128x128xf32> -> vector<128x128xf32>
    %99 = arith.addf %98, %95 : vector<128x128xf32>
    %c0_61 = arith.constant 0 : index
    %c0_62 = arith.constant 0 : index
    %100 = vector.load %arg9[%c0_61, %c0_62] : memref<1x128xf32, #tpu.memory_space<vmem>>, vector<1x128xf32>
    %101 = vector.broadcast %100 : vector<1x128xf32> to vector<128x128xf32>
    %102 = arith.addf %99, %101 : vector<128x128xf32>
    %cst_63 = arith.constant 0.000000e+00 : f32
    %103 = vector.broadcast %cst_63 : f32 to vector<128x128xf32>
    %104 = arith.maximumf %102, %103 : vector<128x128xf32>
    %c0_64 = arith.constant 0 : index
    %c0_65 = arith.constant 0 : index
    %105 = vector.load %arg10[%c0_64, %c0_65] : memref<128x128xf32, #tpu.memory_space<vmem>>, vector<128x128xf32>
    tpu.vector_store %arg10[%c0_64, %c0_65], %104 {strides = array<i32>} : memref<128x128xf32, #tpu.memory_space<vmem>>, vector<128x128xf32>,
    return
  }
  func.func @transform_0(%arg0: i32) -> (i32, i32) {
    %c0_i32 = arith.constant 0 : i32
    %c0_i32_0 = arith.constant 0 : i32
    return %arg0, %c0_i32 : i32, i32
  }
  func.func @transform_1(%arg0: i32) -> (i32, i32) {
    %c0_i32 = arith.constant 0 : i32
    %c0_i32_0 = arith.constant 0 : i32
    %c0_i32_1 = arith.constant 0 : i32
    return %c0_i32, %c0_i32_0 : i32, i32
  }
  func.func @transform_2(%arg0: i32) -> (i32, i32) {
    %c0_i32 = arith.constant 0 : i32
    %c0_i32_0 = arith.constant 0 : i32
    %c0_i32_1 = arith.constant 0 : i32
    return %c0_i32, %c0_i32_0 : i32, i32
  }
  func.func @transform_3(%arg0: i32) -> (i32, i32) {
    %c0_i32 = arith.constant 0 : i32
    %c0_i32_0 = arith.constant 0 : i32
    %c0_i32_1 = arith.constant 0 : i32
    return %c0_i32, %c0_i32_0 : i32, i32
  }
  func.func @transform_4(%arg0: i32) -> (i32, i32, i32) {
    %c0_i32 = arith.constant 0 : i32
    %c0_i32_0 = arith.constant 0 : i32
    %c0_i32_1 = arith.constant 0 : i32
    %c0_i32_2 = arith.constant 0 : i32
    return %c0_i32, %c0_i32_0, %c0_i32_1 : i32, i32, i32
  }
  func.func @transform_5(%arg0: i32) -> (i32, i32) {
    %c0_i32 = arith.constant 0 : i32
    %c0_i32_0 = arith.constant 0 : i32
    %c0_i32_1 = arith.constant 0 : i32
    return %c0_i32, %c0_i32_0 : i32, i32
  }
  func.func @transform_6(%arg0: i32) -> (i32, i32) {
    %c0_i32 = arith.constant 0 : i32
    %c0_i32_0 = arith.constant 0 : i32
    %c0_i32_1 = arith.constant 0 : i32
    return %c0_i32, %c0_i32_0 : i32, i32
  }
  func.func @transform_7(%arg0: i32) -> (i32, i32) {
    %c0_i32 = arith.constant 0 : i32
    %c0_i32_0 = arith.constant 0 : i32
    %c0_i32_1 = arith.constant 0 : i32
    return %c0_i32, %c0_i32_0 : i32, i32
  }
  func.func @transform_8(%arg0: i32) -> (i32, i32) {
    %c0_i32 = arith.constant 0 : i32
    %c0_i32_0 = arith.constant 0 : i32
    %c0_i32_1 = arith.constant 0 : i32
    return %c0_i32, %c0_i32_0 : i32, i32
  }
  func.func @transform_9(%arg0: i32) -> (i32, i32) {
    %c0_i32 = arith.constant 0 : i32
    %c0_i32_0 = arith.constant 0 : i32
    return %arg0, %c0_i32 : i32, i32
  }
}

</mosaic_0001>

<bundles_post_ra>
// kernel: tpu_custom_call.1
= control target key start
LH: loop header
LB: loop body
LE: loop exit
PB: predicated region body
PF: predicated region fallthrough
CT: control target
= control target key end

     0   :  { %14 = vsyncpa [#allocation3], 0  ;;  %s6052_s0 = inlined_call_operand.vmem [shape: bf16[256,64], index: 0, kind: input, shape index: {}]   ;;  %s6053_s1 = inlined_call_operand.vmem [shape: f32[128,9], index: 1, kind: input, shape index: {}]   ;;  %s6054_s2 = inlined_call_operand.vmem [shape: bf16[64,128], index: 2, kind: input, shape index: {}]   ;;  %s6055_s3 = inlined_call_operand.vmem [shape: f32[1,128], index: 3, kind: input, shape index: {}]   ;;  %s6056_s4 = inlined_call_operand.hbm [shape: bf16[9,128,128], index: 4, kind: input, shape index: {}]   ;;  %s6057_s5 = inlined_call_operand.vmem [shape: f32[1,128], index: 5, kind: input, shape index: {}]   ;;  %s6058_s6 = inlined_call_operand.vmem [shape: bf16[128,128], index: 6, kind: input, shape index: {}]   ;;  %s6059_s7 = inlined_call_operand.vmem [shape: bf16[64,128], index: 7, kind: input, shape index: {}]   ;;  %s6060_s8 = inlined_call_operand.vmem [shape: f32[1,128], index: 8, kind: input, shape index: {}]   ;;  %s6061_s9 = inlined_call_operand.hbm [shape: f32[256,128], index: 9, kind: output, shape index: {}]  }
   0x1   :  { %15 = vsyncpa [#allocation4], 0 }
   0x2   :  { %17 = vsyncpa [#allocation4 + $0x1], 0  ;;  %s4344_s30 = smov 0   ;;  %s4346_s10 = smov 0  }
   0x3   :  { %s4348_s11 = smov 0   ;;  %s4350_s12 = smov 0  }
   0x4 LB: > { %s4365_s13 = sadd.s32 4294967295, %s4279_s12   ;;  %s3495_s14 = sadd.s32 4294967294, %s4279_s12   ;;  %s4279_s12 = sphi %s4350_s12, %s6121_s12   ;;  %s4275_s11 = sphi %s4348_s11, %s6120_s11   ;;  %s4271_s10 = sphi %s4346_s10, %s6119_s10   ;;  %s4267_s30 = sphi %s4344_s30, %s6118_s30  }
   0x5   : > { %s4369_s15 = sadd.s32 1, %s4279_s12   ;;  %s224_s16 = sadd.s32 1, %s4275_s11 }
   0x6   : > { %s221_s17 = ssub.s32 %s4279_s12, %s4369_s15  ;;  %p234_p0 = scmp.ne.s32.totalorder %s4275_s11, %s4271_s10 }
   0x7   : > { %p222_p1 = scmp.eq.s32.totalorder %s221_s17, 0  ;;  %p235_p2 = scmp.eq.s32.totalorder %s4365_s13, 1 }
   0x8   : > { %p240_p3 = scmp.ne.s32.totalorder %s4271_s10, %s4267_s30  ;;  %p241_p4 = scmp.eq.s32.totalorder %s3495_s14, 1 }
   0x9   : > { %s4380_s18 = scalar_select %p222_p1, %s4275_s11, %s224_s16  }
   0xa   : > { %p4382_p5 = por %p235_p2, %p234_p0  ;;  %p4386_p6 = por %p241_p4, %p240_p3 }
   0xb   : > { %p3496_p7 = scmp.ge.s32.totalorder %s4279_s12, 1  ;;  %p248_p8 = scmp.lt.s32.totalorder %s4279_s12, 3 }
   0xc   : > { %p4020_p9 = scmp.eq.s32.totalorder %s4365_s13, 0  ;;  %s268_s23 = sshll.u32 %s6056_s4, 4  ;;  %s269_s23 = int_to_ptr.hbm [resolvable:$true] %s268_s23 }
   0xd   : > { %p249_p10 = pnand %p3496_p7, %p248_p8  ;;  %s4281_s24 = smov [#allocation2]  }
   0xe   : > { %s270_s25 = sshll.u32 %s4281_s24, 4  ;;  %s4282_s26 = smov 64   ;;  %s271_s25 = int_to_ptr.vmem [resolvable:$true] %s270_s25 }
   0xf   : > { %p4012_p11 = pneg %p249_p10  ;;  %s4283_s27 = smov 4  }
  0x10   : > { %307 = sbr.rel (%p249_p10) target bundleno = 866 (0x362), region = 56 }
  0x11   : > { %p4013_p12 = pnand %p4020_p9, %p4012_p11 }
  0x13   : > { %4015 = dma.hbm_to_vmem [thread:$0]  (!%p4013_p12), %s269_s23, 9216, %s271_s25, [#allocation3], %s4282_s26, %s4282_s26, %s4283_s27  }
  0x15   : > { %4258 = dma.done.wait (%p4020_p9), [#allocation3], 9216  }
  0x16   : > { %4260 = vsyncadd (%p4020_p9), [#allocation3], 4294958080  ;;  %v4284_v0 = vmov 0   ;;  %s3502_s28 = sshll.u32 %s4365_s13, 4  ;;  %v4409_v1 = vld [vmem:[%s6053_s1 + $0x20] sm:$0xff]  ;;  %v4414_v2 = vld [vmem:[%s6053_s1 + $0x10] sm:$0xff] }
  0x17   : > { %4070 = vset.pattern.permute.xlu2 %v4284_v0  ;;  %4069 = vset.pattern.permute.xlu1 %v4284_v0  ;;  %v4419_v3 = vld [vmem:[%s6053_s1] sm:$0xff]  ;;  %p345_p13 = scmp.lt.s32.totalorder %s3502_s28, 31  ;;  %v3920_v4 = vld [vmem:[%s6054_s2 + $0x18] sm:$0xff]  ;;  %v3919_v5 = vld [vmem:[%s6054_s2 + $0x10] sm:$0xff]  ;;  %vm444_vm0 = vcmask 523264   ;;  %v4285_v19 = vmov 1  }
  0x18   : > { %4068 = vset.pattern.permute.xlu0 %v4284_v0  ;;  %568 = vperm.xlu2 %4070, %v4409_v1   ;;  %v4433_v6 = vld [vmem:[%s6053_s1 + $0x28] sm:$0xff]  ;;  %v4438_v7 = vld [vmem:[%s6053_s1 + $0x18] sm:$0xff]  ;;  %v3917_v10 = vld [vmem:[%s6054_s2] sm:$0xff]  ;;  %v4286_v27 = vmov 2   ;;  %v4287_v30 = vmov 3   ;;  %vm614_vm1 = vcmask 1046528  }
  0x19   : > { %560 = vperm.xlu1 %4069, %v4414_v2   ;;  %552 = vperm.xlu0 %4068, %v4419_v3   ;;  %s6123_s28 = smov (!%p345_p13, %s3502_s28), 31  ;;  %v4443_v8 = vld [vmem:[%s6053_s1 + $0x8] sm:$0xff]  ;;  %v4462_v11 = vld [vmem:[%s6053_s1 + $0x40] sm:$0xff]  ;;  %v4467_v12 = vld [vmem:[%s6053_s1 + $0x38] sm:$0xff]  ;;  %vm907_vm2 = vsmask.f32 4352 }
  0x1a   : > { %473 = vmatpush.bf16.msra.mxu0 %v3920_v4  ;;  %v3918_v9 = vld [vmem:[%s6054_s2 + $0x8] sm:$0xff]  ;;  %s3503_s24 = sshll.u32 %s6123_s28, 2  ;;  %v4473_v14 = vld [vmem:[%s6053_s1 + $0x30] sm:$0xff]  ;;  %v4482_v15 = vld [vmem:[%s6053_s1 + $0x58] sm:$0xff]  ;;  %vm1141_vm3 = vcmask 1040384   ;;  %s4005_s27 = sshll.u32 %s4365_s13, 7 }
  0x1b   : > { %s4457_s14 = scalar_lea.vmem %s6052_s0, %s3503_s24  ;;  %v4487_v16 = vld [vmem:[%s6053_s1 + $0x50] sm:$0xff]  ;;  %v4492_v17 = vld [vmem:[%s6053_s1 + $0x48] sm:$0xff]  ;;  %v4505_v20 = vld [vmem:[%s6053_s1 + $0x60] sm:$0xff]  ;;  %vm1233_vm4 = vsmask.f32 7424  ;;  %s3417_s17 = scalar_lea.hbm %s6061_s9, %s4005_s27 }
  0x1c   : > { %v3909_v13 = vld [vmem:[%s4457_s14] sm:$0xff]  ;;  %v3910_v18 = vld [vmem:[%s4457_s14 + $0x8] sm:$0xff]  ;;  %v3911_v21 = vld [vmem:[%s4457_s14 + $0x10] sm:$0xff]  ;;  %s3420_s21 = sshll.u32 %s3417_s17, 4  ;;  %s4233_s27 = scalar_lea.hbm %s6061_s9, 256  ;;  %s3421_s21 = int_to_ptr.hbm [resolvable:$true] %s3420_s21 }
  0x1d   : > { %v4515_v22 = vld [vmem:[%s6053_s1 + $0x68] sm:$0xff]  ;;  %v3912_v23 = vld [vmem:[%s4457_s14 + $0x18] sm:$0xff]  ;;  %v4528_v24 = vld [vmem:[%s6053_s1 + $0x70] sm:$0xff]  ;;  %s4227_s22 = sshra.s32 %s3421_s21, 4  ;;  %s4228_s22 = int_to_ptr.hbm [resolvable:$true] %s4227_s22 }
  0x1e   : > { %474 = vmatpush.bf16.msra.mxu0 %v3919_v5  ;;  %v4538_v25 = vld [vmem:[%s6053_s1 + $0x78] sm:$0xff]  ;;  %v3913_v26 = vld [vmem:[%s4457_s14 + $0x20] sm:$0xff]  ;;  %v3935_v31 = vld [vmem:[#allocation2 + $0x70] sm:$0xff]  ;;  %s4229_s23 = scalar_lea.hbm %s4228_s22, 128  ;;  %p4234_p3 = scmp.lt.s32.totalorder %s4228_s22, %s6061_s9 }
  0x1f   : > { %v3936_v28 = vld [vmem:[#allocation2 + $0x78] sm:$0xff]  ;;  %v3914_v32 = vld [vmem:[%s4457_s14 + $0x28] sm:$0xff]  ;;  %v3933_v35 = vld [vmem:[#allocation2 + $0x60] sm:$0xff]  ;;  %p4230_p0 = scmp.ne.s32.totalorder %s4228_s22, %s4229_s23  ;;  %p4235_p4 = scmp.lt.s32.totalorder %s4233_s27, %s4229_s23 }
  0x20   : > { %572 = vperm.xlu2 %4070, %v4433_v6   ;;  %858 = vmatpush.bf16.msra.mxu1 %v3936_v28  ;;  %v3934_v34 = vld [vmem:[#allocation2 + $0x68] sm:$0xff]  ;;  %v3928_v36 = vld [vmem:[#allocation2 + $0x38] sm:$0xff]  ;;  %v3927_v39 = vld [vmem:[#allocation2 + $0x30] sm:$0xff] }
  0x21   : > { %564 = vperm.xlu1 %4069, %v4438_v7   ;;  %556 = vperm.xlu0 %4068, %v4443_v8   ;;  %v3932_v38 = vld [vmem:[#allocation2 + $0x58] sm:$0xff]  ;;  %v3931_v40 = vld [vmem:[#allocation2 + $0x50] sm:$0xff]  ;;  %v3926_v42 = vld [vmem:[#allocation2 + $0x28] sm:$0xff]  ;;  %p4231_p1 = pnand %p4230_p0, %p4382_p5  ;;  %p4236_p7 = por %p4235_p4, %p4234_p3 }
  0x22   : > { %475 = vmatpush.bf16.msra.mxu0 %v3918_v9  ;;  %1044 = vmatpush.bf16.msra.mxu2 %v3928_v36  ;;  %v3915_v41 = vld [vmem:[%s4457_s14 + $0x30] sm:$0xff]  ;;  %v3930_v44 = vld [vmem:[#allocation2 + $0x48] sm:$0xff]  ;;  %v3925_v47 = vld [vmem:[#allocation2 + $0x20] sm:$0xff] }
  0x23   : > { %v3929_v48 = vld [vmem:[#allocation2 + $0x40] sm:$0xff]  ;;  %v3924_v49 = vld [vmem:[#allocation2 + $0x18] sm:$0xff]  ;;  %v3923_v53 = vld [vmem:[#allocation2 + $0x10] sm:$0xff]  ;;  %p4232_p2 = pneg %p4231_p1 }
  0x24   : > { %859 = vmatpush.bf16.msra.mxu1 %v3935_v31  ;;  %v3916_v54 = vld [vmem:[%s4457_s14 + $0x38] sm:$0xff]  ;;  %v3922_v55 = vld [vmem:[#allocation2 + $0x8] sm:$0xff]  ;;  %v3921_v58 = vld [vmem:[#allocation2] sm:$0xff] }
  0x25   : > { %v4613_v5 = vld [vmem:[%s6055_s3] ss:$0 sm:$0xff]  ;;  %p4237_p8 = pnand %p4236_p7, %p4232_p2 }
  0x26   : > { %476 = vmatpush.bf16.msra.mxu0 %v3917_v10  ;;  %1045 = vmatpush.bf16.msra.mxu2 %v3927_v39  ;;  %v3960_v39 = vld [vmem:[#allocation2 + $0x138] sm:$0xff] }
  0x28   : > { %584 = vperm.xlu2 %4070, %v4462_v11   ;;  %860 = vmatpush.bf16.msra.mxu1 %v3934_v34 }
  0x29   : > { %580 = vperm.xlu1 %4069, %v4467_v12   ;;  %576 = vperm.xlu0 %4068, %v4473_v14  }
  0x2a   : > { %3552 = vmatmul.msk.bf16.vlgmr.msra.gmra.mxu0 %vm444_vm0, %v3909_v13  ;;  %1046 = vmatpush.bf16.msra.mxu2 %v3926_v42 }
  0x2c   : > { %861 = vmatpush.bf16.msra.mxu1 %v3933_v35  ;;  %v3952_v35 = vld [vmem:[#allocation2 + $0xf8] sm:$0xff] }
  0x2d   : > { %1698 = vmatpush.bf16.msrb.mxu0 %v3952_v35 }
  0x2e   : > { %1047 = vmatpush.bf16.msra.mxu2 %v3925_v47 }
  0x30   : > { %596 = vperm.xlu2 %4070, %v4482_v15   ;;  %862 = vmatpush.bf16.msra.mxu1 %v3932_v38 }
  0x31   : > { %592 = vperm.xlu1 %4069, %v4487_v16   ;;  %588 = vperm.xlu0 %4068, %v4492_v17  }
  0x32   : > { %1048 = vmatpush.bf16.msra.mxu2 %v3924_v49  ;;  %v6063_v49 = vmov 5  }
  0x34   : > { %863 = vmatpush.bf16.msra.mxu1 %v3931_v40 }
  0x36   : > { %1049 = vmatpush.bf16.msra.mxu2 %v3923_v53 }
  0x38   : > { %4073 = vset.pattern.permute.xlu2 %v4285_v19  ;;  %864 = vmatpush.bf16.msra.mxu1 %v3930_v44 }
  0x39   : > { %4072 = vset.pattern.permute.xlu1 %v4285_v19  ;;  %4071 = vset.pattern.permute.xlu0 %v4285_v19 }
  0x3a   : > { %714 = vperm.xlu2 %4073, %v4414_v2   ;;  %710 = vperm.xlu1 %4072, %v4443_v8  }
  0x3b   : > { %706 = vperm.xlu0 %4071, %v4419_v3   ;;  %3553 = vmatmul.msk.bf16.gmra.mxu0 %vm444_vm0, %v3910_v18 }
  0x3c   : > { %865 = vmatpush.bf16.msra.mxu1 %v3929_v48  ;;  %1050 = vmatpush.bf16.msra.mxu2 %v3922_v55 }
  0x40   : > { %1051 = vmatpush.bf16.msra.mxu2 %v3921_v58  ;;  %1836 = vmatpush.bf16.msrb.mxu1 %v3960_v39 }
  0x42   : > { %4074 = vset.pattern.permute.xlu2 %v4284_v0  ;;  %718 = vperm.xlu1 %4072, %v4438_v7  }
  0x43   : > { %722 = vperm.xlu0 %4071, %v4409_v1   ;;  %600 = vperm.xlu2 %4074, %v4505_v20  }
  0x4a   : > { %726 = vperm.xlu1 %4072, %v4433_v6  }
  0x4b   : > { %730 = vperm.xlu0 %4071, %v4473_v14   ;;  %3554 = vmatmul.msk.bf16.gmra.mxu0 %vm444_vm0, %v3911_v21 }
  0x4c   : > { %604 = vperm.xlu2 %4074, %v4515_v22  }
  0x52   : > { %734 = vperm.xlu1 %4072, %v4467_v12  }
  0x53   : > { %742 = vperm.xlu0 %4071, %v4492_v17  }
  0x54   : > { %4075 = vset.pattern.permute.xlu2 %v4285_v19 }
  0x55   : > { %738 = vperm.xlu2 %4075, %v4462_v11  }
  0x5a   : > { %4076 = vset.pattern.permute.xlu1 %v4284_v0 }
  0x5b   : > { %750 = vperm.xlu0 %4071, %v4482_v15   ;;  %3555 = vmatmul.msk.bf16.gmra.mxu0 %vm444_vm0, %v3912_v23 }
  0x5c   : > { %608 = vperm.xlu1 %4076, %v4528_v24  }
  0x5d   : > { %746 = vperm.xlu2 %4075, %v4487_v16  }
  0x63   : > { %758 = vperm.xlu0 %4071, %v4515_v22  }
  0x64   : > { %612 = vperm.xlu1 %4076, %v4538_v25  }
  0x65   : > { %754 = vperm.xlu2 %4075, %v4505_v20  }
  0x6b   : > { %4079 = vset.pattern.permute.xlu0 %v4286_v27  ;;  %3556 = vmatmul.msk.bf16.gmra.mxu0 %vm444_vm0, %v3913_v26 }
  0x6c   : > { %4077 = vset.pattern.permute.xlu1 %v4286_v27  ;;  %1100 = vperm.xlu0 %4079, %v4414_v2  }
  0x6d   : > { %4078 = vset.pattern.permute.xlu2 %v4286_v27  ;;  %1094 = vperm.xlu1 %4077, %v4419_v3  }
  0x6e   : > { %1097 = vperm.xlu2 %4078, %v4443_v8  }
  0x72   : > { %v4551_v29 = vpop.permute.xlu2 %568 }
  0x74   : > { %4083 = vset.pattern.permute.xlu0 %v4287_v30 }
  0x75   : > { %1103 = vperm.xlu1 %4077, %v4438_v7   ;;  %1427 = vperm.xlu0 %4083, %v4443_v8  }
  0x76   : > { %4080 = vset.pattern.permute.xlu2 %v4285_v19 }
  0x77   : > { %762 = vperm.xlu2 %4080, %v4528_v24  }
  0x7a   : > { %v4558_v33 = vpop.permute.xlu2 %572 }
  0x7b   : > { %3557 = vmatmul.msk.bf16.gmra.mxu0 %vm444_vm0, %v3914_v32 }
  0x7d   : > { %4081 = vset.pattern.permute.xlu1 %v4285_v19  ;;  %1436 = vperm.xlu0 %4083, %v4409_v1  }
  0x7e   : > { %766 = vperm.xlu1 %4081, %v4538_v25  }
  0x7f   : > { %4082 = vset.pattern.permute.xlu2 %v4287_v30 }
  0x80   : > { %1424 = vperm.xlu2 %4082, %v4419_v3  }
  0x82   : > { %v4565_v37 = vpop.permute.xlu2 %584 }
  0x85   : > { %4088 = vset.pattern.permute.xlu0 %v4286_v27 }
  0x86   : > { %4084 = vset.pattern.permute.xlu1 %v4287_v30  ;;  %1115 = vperm.xlu0 %4088, %v4467_v12  }
  0x87   : > { %1430 = vperm.xlu1 %4084, %v4414_v2  }
  0x88   : > { %1433 = vperm.xlu2 %4082, %v4438_v7  }
  0x8a   : > { %v597_v45 = vpop.permute.xlu2 %596 }
  0x8b   : > { %v4573_v43 = vpop.permute.xlu1 %560  ;;  %3558 = vmatmul.msk.bf16.gmra.mxu0 %vm444_vm0, %v3915_v41  ;;  %v553_v46 = vpop.permute.xlu0 %552  ;;  %v636_v60 = vrot.slane %v597_v45, 1 }
  0x8c   : > { %v615_v9 = vrot.slane %v553_v46, 1  ;;  %v618_v48 = vrot.slane %v4573_v43, 1 }
  0x8e   : > { %4092 = vset.pattern.permute.xlu0 %v4287_v30  ;;  %v663_v31 = vmul.f32 0.0, %v615_v9 }
  0x8f   : > { %4085 = vset.pattern.permute.xlu1 %v4286_v27  ;;  %1448 = vperm.xlu0 %4092, %v4462_v11  }
  0x90   : > { %4086 = vset.pattern.permute.xlu2 %v4286_v27  ;;  %1106 = vperm.xlu1 %4085, %v4409_v1  }
  0x91   : > { %1109 = vperm.xlu2 %4086, %v4433_v6  }
  0x93   : > { %v4582_v50 = vpop.permute.xlu1 %564  ;;  %v4584_v51 = vpop.permute.xlu0 %556 }
  0x94   : > { %v4586_v52 = vpop.permute.xlu2 %714  ;;  %v616_v18 = vrot.slane %v4584_v51, 1  ;;  %v620_v42 = vrot.slane %v4582_v50, 1 }
  0x96   : > { %v617_v26 = vsel %vm614_vm1, %v615_v9, %v616_v18  ;;  %v621_v53 = vsel %vm614_vm1, %v618_v48, %v620_v42 }
  0x97   : > { %1457 = vperm.xlu0 %4092, %v4482_v15   ;;  %v664_v32 = vmul.f32 0.0, %v617_v26 }
  0x98   : > { %4087 = vset.pattern.permute.xlu1 %v4287_v30 }
  0x99   : > { %1112 = vperm.xlu2 %4086, %v4473_v14   ;;  %1439 = vperm.xlu1 %4087, %v4433_v6  }
  0x9b   : > { %v4593_v56 = vpop.permute.xlu1 %580  ;;  %3559 = vmatmul.msk.bf16.gmra.mxu0 %vm444_vm0, %v3916_v54  ;;  %v4596_v57 = vpop.permute.xlu0 %576  ;;  %v619_v54 = vsel %vm614_vm1, %v616_v18, %v618_v48 }
  0x9d   : > { %v601_v59 = vpop.permute.xlu2 %600 }
  0x9e   : > { %v638_v61 = vrot.slane %v601_v59, 1 }
  0x9f   : > { %1460 = vperm.xlu0 %4092, %v4505_v20  }
  0xa0   : > { %v4600_v62 = vsel %vm614_vm1, %v636_v60, %v638_v61 }
  0xa1   : > { %4089 = vset.pattern.permute.xlu2 %v4287_v30  ;;  %1442 = vperm.xlu1 %4087, %v4473_v14  }
  0xa2   : > { %1445 = vperm.xlu2 %4089, %v4467_v12  }
  0xa3   : > { %v4605_v63 = vpop.permute.xlu1 %592  ;;  %v4608_v4 = vpop.permute.xlu0 %588 }
  0xa4   : > { %v634_v0 = vrot.slane %v4605_v63, 1 }
  0xa6   : > { %v4618_v10 = vsel %vm614_vm1, %v634_v0, %v636_v60  ;;  %v4620_v13 = vpop.permute.xlu2 %604  ;;  %v3944_v60 = vld [vmem:[#allocation2 + $0xb8] sm:$0xff] }
  0xa7   : > { %v478_v19 = vpop.f32.mrf.mxu0  ;;  %v640_v21 = vrot.slane %v4620_v13, 1  ;;  %4098 = vset.pattern.permute.xlu0 %v4286_v27  ;;  %1358 = vmatpush.bf16.msra.mxu3 %v3944_v60  ;;  %v622_v60 = vrot.slane %v4551_v29, 1 }
  0xa8   : > { %v479_v23 = vadd.f32 %v4613_v5, %v478_v19  ;;  %1139 = vperm.xlu0 %4098, %v4538_v25  }
  0xa9   : > { %v4631_v28 = vsel %vm614_vm1, %v638_v61, %v640_v21  ;;  %4090 = vset.pattern.permute.xlu1 %v4286_v27  ;;  %v623_v29 = vsel %vm614_vm1, %v620_v42, %v622_v60 }
  0xaa   : > { %4091 = vset.pattern.permute.xlu2 %v4286_v27  ;;  %1118 = vperm.xlu1 %4090, %v4462_v11   ;;  %v4636_v34 = vmax.f32 %v479_v23, 0.0  ;;  %v680_v11 = vpack.c.bf16 %v664_v32, %v663_v31 }
  0xab   : > { %1121 = vperm.xlu2 %4091, %v4492_v17  }
  0xac   : > { %v711_v36 = vpop.permute.xlu1 %710  ;;  %v665_v43 = vmul.f32 %v619_v54, %v4636_v34  ;;  %v909_v58 = vshrl.u32 %v680_v11, 16  ;;  %v912_v59 = vshll.u32 %v680_v11, 16 }
  0xad   : > { %v707_v38 = vpop.permute.xlu0 %706  ;;  %v770_v40 = vmul.f32 %v711_v36, %v4636_v34 }
  0xae   : > { %v769_v41 = vmul.f32 0.0, %v707_v38  ;;  %v911_v18 = vrot.slane %v909_v58, 3  ;;  %v914_v26 = vrot.slane %v912_v59, 4 }
  0xaf   : > { %v480_v44 = vpop.f32.mrf.mxu0  ;;  %v4641_v45 = vpop.permute.xlu2 %738 }
  0xb0   : > { %v481_v46 = vadd.f32 %v4613_v5, %v480_v44  ;;  %v785_v47 = vpack.c.bf16 %v770_v40, %v769_v41  ;;  %4102 = vset.pattern.permute.xlu0 %v6063_v49  ;;  %v915_v41 = vor.u32 %v914_v26, %v911_v18  ;;  %v3941_v26 = vld [vmem:[#allocation2 + $0xa0] sm:$0xff] }
  0xb1   : > { %1908 = vperm.xlu0 %4102, %v4414_v2  }
  0xb2   : > { %v4646_v51 = vmax.f32 %v481_v46, 0.0  ;;  %866 = vmatmul.bf16.vlgmr.msra.gmra.mxu1 %v785_v47  ;;  %4093 = vset.pattern.permute.xlu1 %v4287_v30  ;;  %v3942_v47 = vld [vmem:[#allocation2 + $0xa8] sm:$0xff] }
  0xb3   : > { %1124 = vperm.xlu2 %4091, %v4487_v16   ;;  %1451 = vperm.xlu1 %4093, %v4492_v17   ;;  %v3943_v17 = vld [vmem:[#allocation2 + $0xb0] sm:$0xff] }
  0xb4   : > { %v666_v55 = vmul.f32 %v621_v53, %v4646_v51  ;;  %v719_v61 = vpop.permute.xlu1 %718  ;;  %1359 = vmatpush.bf16.msra.mxu3 %v3943_v17  ;;  %v771_v53 = vmul.f32 %v4586_v52, %v4646_v51  ;;  %v6070_v52 = vmov 6  }
  0xb5   : > { %v4658_v9 = vpop.permute.xlu0 %722 }
  0xb6   : > { %v681_v19 = vpack.c.bf16 %v666_v55, %v665_v43  ;;  %v3951_v43 = vld [vmem:[#allocation2 + $0xf0] sm:$0xff] }
  0xb7   : > { %v4660_v23 = vpop.permute.xlu2 %746  ;;  %v3959_v55 = vld [vmem:[#allocation2 + $0x130] sm:$0xff]  ;;  %1699 = vmatpush.bf16.msrb.mxu0 %v3951_v43 }
  0xb8   : > { %v917_v31 = vshrl.u32 %v681_v19, 16  ;;  %v920_v32 = vshll.u32 %v681_v19, 16  ;;  %v483_v35 = vpop.f32.mrf.mxu0  ;;  %1360 = vmatpush.bf16.msra.mxu3 %v3942_v47  ;;  %1837 = vmatpush.bf16.msrb.mxu1 %v3959_v55  ;;  %v624_v19 = vrot.slane %v4558_v33, 1  ;;  %v3939_v47 = vld [vmem:[#allocation2 + $0x90] sm:$0xff] }
  0xb9   : > { %v484_v36 = vadd.f32 %v4613_v5, %v483_v35  ;;  %1914 = vperm.xlu0 %4102, %v4409_v1  }
  0xba   : > { %v919_v38 = vrot.slane %v917_v31, 3  ;;  %v922_v39 = vrot.slane %v920_v32, 4  ;;  %v625_v32 = vsel %vm614_vm1, %v622_v60, %v624_v19 }
  0xbb   : > { %v4664_v40 = vmax.f32 %v484_v36, 0.0  ;;  %4095 = vset.pattern.permute.xlu2 %v4287_v30  ;;  %4094 = vset.pattern.permute.xlu1 %v4286_v27  ;;  %v3940_v36 = vld [vmem:[#allocation2 + $0x98] sm:$0xff] }
  0xbc   : > { %v4668_v44 = vor.u32 %v922_v39, %v919_v38  ;;  %1454 = vperm.xlu2 %4095, %v4487_v16   ;;  %1127 = vperm.xlu1 %4094, %v4482_v15   ;;  %v727_v11 = vpop.permute.xlu1 %726 }
  0xbd   : > { %v4672_v46 = vpop.permute.xlu0 %730  ;;  %v772_v54 = vmul.f32 %v719_v61, %v4664_v40  ;;  %1361 = vmatpush.bf16.msra.mxu3 %v3941_v26  ;;  %v667_v38 = vmul.f32 %v623_v29, %v4664_v40 }
  0xbe   : > { %v924_v48 = vsel %vm907_vm2, %v915_v41, %v4668_v44 }
  0xbf   : > { %1052 = vmatmul.bf16.vlgmr.msra.gmra.mxu2 %v924_v48  ;;  %v4679_v58 = vpop.permute.xlu2 %754  ;;  %v786_v59 = vpack.c.bf16 %v772_v54, %v771_v53 }
  0xc0   : > { %v485_v18 = vpop.f32.mrf.mxu0 }
  0xc1   : > { %v486_v31 = vadd.f32 %v4613_v5, %v485_v18  ;;  %4107 = vset.pattern.permute.xlu0 %v6070_v52  ;;  %1362 = vmatpush.bf16.msra.mxu3 %v3940_v36 }
  0xc2   : > { %871 = vmatmul.bf16.gmra.mxu1 %v786_v59  ;;  %2239 = vperm.xlu0 %4107, %v4438_v7   ;;  %v3938_v59 = vld [vmem:[#allocation2 + $0x88] sm:$0xff] }
  0xc3   : > { %v4686_v61 = vmax.f32 %v486_v31, 0.0  ;;  %v3950_v31 = vld [vmem:[#allocation2 + $0xe8] sm:$0xff] }
  0xc4   : > { %4096 = vset.pattern.permute.xlu2 %v4286_v27  ;;  %1130 = vperm.xlu1 %4094, %v4505_v20   ;;  %v4696_v35 = vpop.permute.xlu1 %734 }
  0xc5   : > { %v4698_v17 = vpop.permute.xlu0 %742  ;;  %1133 = vperm.xlu2 %4096, %v4515_v22   ;;  %v668_v39 = vmul.f32 %v625_v32, %v4686_v61  ;;  %1363 = vmatpush.bf16.msra.mxu3 %v3939_v47  ;;  %v3958_v32 = vld [vmem:[#allocation2 + $0x128] sm:$0xff]  ;;  %v3937_v47 = vld [vmem:[#allocation2 + $0x80] sm:$0xff] }
  0xc6   : > { %1700 = vmatpush.bf16.msrb.mxu0 %v3950_v31  ;;  %1838 = vmatpush.bf16.msrb.mxu1 %v3958_v32  ;;  %v3948_v31 = vld [vmem:[#allocation2 + $0xd8] sm:$0xff] }
  0xc7   : > { %v682_v50 = vpack.c.bf16 %v668_v39, %v667_v38  ;;  %v628_v39 = vrot.slane %v4593_v56, 1 }
  0xc8   : > { %v4703_v41 = vpop.permute.xlu2 %1097  ;;  %v488_v42 = vpop.f32.mrf.mxu0 }
  0xc9   : > { %v489_v27 = vadd.f32 %v4613_v5, %v488_v42  ;;  %v926_v20 = vshrl.u32 %v682_v50, 16  ;;  %v929_v48 = vshll.u32 %v682_v50, 16  ;;  %1364 = vmatpush.bf16.msra.mxu3 %v3938_v59  ;;  %v626_v50 = vrot.slane %v4596_v57, 1 }
  0xca   : > { %2248 = vperm.xlu0 %4107, %v4473_v14   ;;  %v773_v14 = vmul.f32 %v4658_v9, %v4686_v61 }
  0xcb   : > { %v4707_v53 = vmax.f32 %v489_v27, 0.0  ;;  %v928_v54 = vrot.slane %v926_v20, 3  ;;  %v931_v43 = vrot.slane %v929_v48, 4  ;;  %v6067_v27 = vmov 7  }
  0xcc   : > { %4097 = vset.pattern.permute.xlu1 %v4287_v30  ;;  %v627_v57 = vsel %vm614_vm1, %v624_v19, %v626_v50  ;;  %v629_v13 = vsel %vm614_vm1, %v626_v50, %v628_v39 }
  0xcd   : > { %v4710_v55 = vpop.permute.xlu0 %750  ;;  %1136 = vperm.xlu2 %4096, %v4528_v24   ;;  %1463 = vperm.xlu1 %4097, %v4515_v22   ;;  %v932_v18 = vor.u32 %v931_v43, %v928_v54  ;;  %v774_v26 = vmul.f32 %v727_v11, %v4707_v53  ;;  %v669_v48 = vmul.f32 %v627_v57, %v4707_v53  ;;  %v3949_v43 = vld [vmem:[#allocation2 + $0xe0] sm:$0xff]  ;;  %v1143_v57 = vrot.slane %v4703_v41, 7 }
  0xce   : > { %v4714_v60 = vpop.permute.xlu1 %608  ;;  %1365 = vmatpush.bf16.msra.mxu3 %v3937_v47  ;;  %1701 = vmatpush.bf16.msrb.mxu0 %v3949_v43  ;;  %v3947_v47 = vld [vmem:[#allocation2 + $0xd0] sm:$0xff] }
  0xcf   : > { %v642_v29 = vrot.slane %v4714_v60, 1  ;;  %v933_v36 = vsel %vm907_vm2, %v4668_v44, %v932_v18  ;;  %v787_v38 = vpack.c.bf16 %v774_v26, %v773_v14 }
  0xd0   : > { %v490_v11 = vpop.f32.mrf.mxu0  ;;  %1057 = vmatmul.bf16.gmra.mxu2 %v933_v36 }
  0xd1   : > { %v4729_v9 = vsel %vm614_vm1, %v640_v21, %v642_v29  ;;  %v491_v42 = vadd.f32 %v4613_v5, %v490_v11  ;;  %v4732_v44 = vpop.permute.xlu2 %762 }
  0xd2   : > { %876 = vmatmul.bf16.gmra.mxu1 %v787_v38  ;;  %4116 = vset.pattern.permute.xlu0 %v6067_v27 }
  0xd3   : > { %v4735_v20 = vmax.f32 %v491_v42, 0.0  ;;  %2574 = vperm.xlu0 %4116, %v4443_v8   ;;  %1702 = vmatpush.bf16.msrb.mxu0 %v3948_v31 }
  0xd5   : > { %4099 = vset.pattern.permute.xlu2 %v4287_v30  ;;  %1466 = vperm.xlu1 %4097, %v4528_v24   ;;  %v670_v54 = vmul.f32 %v629_v13, %v4735_v20  ;;  %v4750_v59 = vpop.permute.xlu0 %758  ;;  %v775_v11 = vmul.f32 %v4672_v46, %v4735_v20  ;;  %v632_v46 = vrot.slane %v4608_v4, 1 }
  0xd6   : > { %v4746_v21 = vpop.permute.xlu1 %612  ;;  %1469 = vperm.xlu2 %4099, %v4538_v25  }
  0xd7   : > { %v683_v33 = vpack.c.bf16 %v670_v54, %v669_v48  ;;  %v3957_v54 = vld [vmem:[#allocation2 + $0x120] sm:$0xff]  ;;  %1703 = vmatpush.bf16.msrb.mxu0 %v3947_v47 }
  0xd8   : > { %v493_v19 = vpop.f32.mrf.mxu0  ;;  %1839 = vmatpush.bf16.msrb.mxu1 %v3957_v54 }
  0xd9   : > { %v494_v14 = vadd.f32 %v4613_v5, %v493_v19  ;;  %v935_v26 = vshrl.u32 %v683_v33, 16  ;;  %v938_v30 = vshll.u32 %v683_v33, 16  ;;  %v3946_v19 = vld [vmem:[#allocation2 + $0xc8] sm:$0xff] }
  0xda   : > { %v4754_v32 = vpop.permute.xlu2 %1424 }
  0xdb   : > { %v4756_v36 = vmax.f32 %v494_v14, 0.0  ;;  %2586 = vperm.xlu0 %4116, %v4409_v1   ;;  %v937_v38 = vrot.slane %v935_v26, 3  ;;  %v940_v50 = vrot.slane %v938_v30, 4  ;;  %v630_v14 = vrot.slane %v4565_v37, 1  ;;  %1704 = vmatpush.bf16.msrb.mxu0 %v3946_v19 }
  0xdd   : > { %4100 = vset.pattern.permute.xlu1 %v6063_v49  ;;  %v4760_v25 = vor.u32 %v940_v50, %v937_v38  ;;  %v776_v42 = vmul.f32 %v4696_v35, %v4756_v36  ;;  %v631_v50 = vsel %vm614_vm1, %v628_v39, %v630_v14  ;;  %v633_v37 = vsel %vm614_vm1, %v630_v14, %v632_v46 }
  0xde   : > { %4101 = vset.pattern.permute.xlu2 %v6063_v49  ;;  %1902 = vperm.xlu1 %4100, %v4419_v3   ;;  %v1101_v35 = vpop.permute.xlu0 %1100  ;;  %v671_v47 = vmul.f32 %v631_v50, %v4756_v36 }
  0xdf   : > { %1905 = vperm.xlu2 %4101, %v4443_v8   ;;  %v1095_v1 = vpop.permute.xlu1 %1094  ;;  %v942_v13 = vsel %vm907_vm2, %v932_v18, %v4760_v25  ;;  %v788_v48 = vpack.c.bf16 %v776_v42, %v775_v11  ;;  %v1145_v11 = vrot.slane %v1101_v35, 7 }
  0xe0   : > { %v1142_v43 = vrot.slane %v1095_v1, 7  ;;  %v495_v33 = vpop.f32.mrf.mxu0  ;;  %1062 = vmatmul.bf16.gmra.mxu2 %v942_v13  ;;  %v3945_v13 = vld [vmem:[#allocation2 + $0xc0] sm:$0xff] }
  0xe1   : > { %v496_v41 = vadd.f32 %v4613_v5, %v495_v33  ;;  %1705 = vmatpush.bf16.msrb.mxu0 %v3945_v13 }
  0xe2   : > { %881 = vmatmul.bf16.gmra.mxu1 %v788_v48  ;;  %v1144_v26 = vsel %vm1141_vm3, %v1142_v43, %v1143_v57  ;;  %v1190_v30 = vmul.f32 0.0, %v1142_v43  ;;  %v4776_v31 = vpop.permute.xlu2 %1433  ;;  %v1146_v48 = vsel %vm1141_vm3, %v1143_v57, %v1145_v11 }
  0xe3   : > { %v1191_v18 = vmul.f32 %v1144_v26, %v4636_v34  ;;  %v4779_v38 = vmax.f32 %v496_v41, 0.0  ;;  %4129 = vset.pattern.permute.xlu0 %v6063_v49  ;;  %v1192_v26 = vmul.f32 %v1146_v48, %v4646_v51 }
  0xe4   : > { %1935 = vperm.xlu0 %4129, %v4482_v15  }
  0xe5   : > { %v1207_v42 = vpack.c.bf16 %v1191_v18, %v1190_v30  ;;  %v672_v1 = vmul.f32 %v633_v37, %v4779_v38  ;;  %v1471_v37 = vrot.slane %v4754_v32, 1 }
  0xe6   : > { %1911 = vperm.xlu1 %4100, %v4438_v7  }
  0xe7   : > { %4103 = vset.pattern.permute.xlu2 %v6070_v52  ;;  %v4793_v56 = vpop.permute.xlu1 %1103  ;;  %v684_v39 = vpack.c.bf16 %v672_v1, %v671_v47  ;;  %v1237_v35 = vshll.u32 %v1207_v42, 16  ;;  %v4802_v14 = vpop.permute.xlu0 %1427  ;;  %v6065_v47 = vmov 8  }
  0xe8   : > { %v1147_v54 = vrot.slane %v4793_v56, 7  ;;  %2230 = vperm.xlu2 %4103, %v4419_v3   ;;  %v498_v15 = vpop.f32.mrf.mxu0  ;;  %v1472_v13 = vrot.slane %v4802_v14, 1 }
  0xe9   : > { %v499_v43 = vadd.f32 %v4613_v5, %v498_v15  ;;  %v944_v33 = vshrl.u32 %v684_v39, 16  ;;  %v947_v41 = vshll.u32 %v684_v39, 16  ;;  %v1239_v15 = vrot.slane %v1237_v35, 1 }
  0xea   : > { %v1148_v19 = vsel %vm1141_vm3, %v1145_v11, %v1147_v54  ;;  %v777_v11 = vmul.f32 %v4641_v45, %v4779_v38  ;;  %v1473_v35 = vsel %vm614_vm1, %v1471_v37, %v1472_v13 }
  0xeb   : > { %v1193_v57 = vmul.f32 %v1148_v19, %v4664_v40  ;;  %v4806_v30 = vmax.f32 %v499_v43, 0.0  ;;  %v4808_v18 = vpop.permute.xlu2 %1109  ;;  %v946_v50 = vrot.slane %v944_v33, 3  ;;  %v949_v1 = vrot.slane %v947_v41, 4 }
  0xec   : > { %4130 = vset.pattern.permute.xlu0 %v6065_v47  ;;  %v1235_v43 = vshrl.u32 %v1207_v42, 16 }
  0xed   : > { %2809 = vperm.xlu0 %4130, %v4467_v12   ;;  %v778_v39 = vmul.f32 %v4698_v17, %v4806_v30  ;;  %v4818_v48 = vpack.c.bf16 %v1193_v57, %v1192_v26  ;;  %v950_v32 = vor.u32 %v949_v1, %v946_v50  ;;  %v3956_v26 = vld [vmem:[#allocation2 + $0x118] sm:$0xff]  ;;  %v1519_v1 = vmul.f32 0.0, %v1471_v37 }
  0xee   : > { %4104 = vset.pattern.permute.xlu1 %v6070_v52  ;;  %v1240_v42 = vor.u32 %v1239_v15, %v1235_v43  ;;  %1840 = vmatpush.bf16.msrb.mxu1 %v3956_v26 }
  0xef   : > { %2233 = vperm.xlu1 %4104, %v4443_v8   ;;  %v789_v33 = vpack.c.bf16 %v778_v39, %v777_v11  ;;  %v1242_v41 = vshll.u32 %v4818_v48, 16  ;;  %v951_v17 = vsel %vm907_vm2, %v4760_v25, %v950_v32  ;;  %v635_v25 = vsel %vm614_vm1, %v632_v46, %v634_v0 }
  0xf0   : > { %2236 = vperm.xlu2 %4103, %v4414_v2   ;;  %v4824_v45 = vpop.permute.xlu1 %766  ;;  %v500_v12 = vpop.f32.mrf.mxu0  ;;  %1067 = vmatmul.bf16.gmra.mxu2 %v951_v17  ;;  %v1520_v11 = vmul.f32 %v1473_v35, %v4636_v34  ;;  %v673_v15 = vmul.f32 %v635_v25, %v4806_v30 }
  0xf1   : > { %v501_v19 = vadd.f32 %v4613_v5, %v500_v12  ;;  %v4830_v14 = vrot.slane %v1242_v41, 1  ;;  %v1476_v41 = vrot.slane %v4776_v31, 1 }
  0xf2   : > { %886 = vmatmul.bf16.gmra.mxu1 %v789_v33  ;;  %v1536_v33 = vpack.c.bf16 %v1520_v11, %v1519_v1 }
  0xf3   : > { %v4832_v57 = vmax.f32 %v501_v19, 0.0  ;;  %v1245_v50 = vsel %vm1233_vm4, %v1240_v42, %v4830_v14  ;;  %v4842_v39 = vpop.permute.xlu2 %1112  ;;  %v4856_v19 = vpop.permute.xlu0 %1436 }
  0xf4   : > { %1366 = vmatmul.bf16.vlgmr.msra.gmra.mxu3 %v1245_v50  ;;  %v1566_v11 = vshll.u32 %v1536_v33, 16 }
  0xf5   : > { %2818 = vperm.xlu0 %4130, %v4487_v16   ;;  %v674_v43 = vmul.f32 %v4618_v10, %v4832_v57 }
  0xf7   : > { %4105 = vset.pattern.permute.xlu1 %v6065_v47  ;;  %v685_v63 = vpack.c.bf16 %v674_v43, %v673_v15 }
  0xf8   : > { %4106 = vset.pattern.permute.xlu2 %v6065_v47  ;;  %2788 = vperm.xlu1 %4105, %v4419_v3   ;;  %v503_v0 = vpop.f32.mrf.mxu0 }
  0xf9   : > { %v504_v4 = vadd.f32 %v4613_v5, %v503_v0  ;;  %2791 = vperm.xlu2 %4106, %v4443_v8   ;;  %v1431_v46 = vpop.permute.xlu1 %1430  ;;  %v953_v16 = vshrl.u32 %v685_v63, 16  ;;  %v956_v37 = vshll.u32 %v685_v63, 16  ;;  %v1563_v8 = vshrl.u32 %v1536_v33, 16 }
  0xfa   : > { %v1474_v12 = vrot.slane %v1431_v46, 1 }
  0xfb   : > { %v4854_v10 = vmax.f32 %v504_v4, 0.0  ;;  %v955_v17 = vrot.slane %v953_v16, 3  ;;  %v958_v35 = vrot.slane %v956_v37, 4  ;;  %v1565_v46 = vrot.slane %v1563_v8, 3  ;;  %v3955_v16 = vld [vmem:[#allocation2 + $0x110] sm:$0xff] }
  0xfc   : > { %v1475_v42 = vsel %vm614_vm1, %v1472_v13, %v1474_v12  ;;  %v1477_v3 = vsel %vm614_vm1, %v1474_v12, %v1476_v41  ;;  %v4862_v26 = vpop.permute.xlu2 %1445  ;;  %v779_v13 = vmul.f32 %v4660_v23, %v4832_v57  ;;  %1841 = vmatpush.bf16.msrb.mxu1 %v3955_v16 }
  0xfd   : > { %v1521_v50 = vmul.f32 %v1475_v42, %v4646_v51  ;;  %v1522_v25 = vmul.f32 %v1477_v3, %v4664_v40  ;;  %4139 = vset.pattern.permute.xlu0 %v6070_v52  ;;  %v4867_v1 = vor.u32 %v958_v35, %v955_v17  ;;  %v780_v15 = vmul.f32 %v4710_v55, %v4854_v10 }
  0xfe   : > { %2269 = vperm.xlu0 %4139, %v4515_v22   ;;  %v1568_v22 = vrot.slane %v1566_v11, 4  ;;  %v1151_v55 = vrot.slane %v4808_v18, 7  ;;  %v4890_v18 = vpop.permute.xlu0 %1115  ;;  %v675_v56 = vmul.f32 %v4600_v62, %v4854_v10 }
  0xff   : > { %v1537_v43 = vpack.c.bf16 %v1522_v25, %v1521_v50  ;;  %v960_v63 = vsel %vm907_vm2, %v950_v32, %v4867_v1  ;;  %v790_v4 = vpack.c.bf16 %v780_v15, %v779_v13  ;;  %v1478_v13 = vrot.slane %v4856_v19, 1 }
 0x100   : > { %2794 = vperm.xlu1 %4105, %v4414_v2   ;;  %v505_v0 = vpop.f32.mrf.mxu0  ;;  %1072 = vmatmul.bf16.gmra.mxu2 %v960_v63  ;;  %v1569_v8 = vor.u32 %v1568_v22, %v1565_v46  ;;  %v1153_v22 = vrot.slane %v4842_v39, 7 }
 0x101   : > { %v506_v33 = vadd.f32 %v4613_v5, %v505_v0  ;;  %2797 = vperm.xlu2 %4106, %v4438_v7   ;;  %v1571_v23 = vshrl.u32 %v1537_v43, 16  ;;  %v1574_v37 = vshll.u32 %v1537_v43, 16 }
 0x102   : > { %v1107_v12 = vpop.permute.xlu1 %1106  ;;  %891 = vmatmul.bf16.gmra.mxu1 %v790_v4  ;;  %v1155_v4 = vrot.slane %v4890_v18, 7 }
 0x103   : > { %v4880_v17 = vmax.f32 %v506_v33, 0.0  ;;  %v1149_v32 = vrot.slane %v1107_v12, 7  ;;  %v1573_v2 = vrot.slane %v1571_v23, 3  ;;  %v1576_v35 = vrot.slane %v1574_v37, 4  ;;  %v3954_v37 = vld [vmem:[#allocation2 + $0x108] sm:$0xff] }
 0x104   : > { %v1479_v33 = vsel %vm614_vm1, %v1476_v41, %v1478_v13  ;;  %1842 = vmatpush.bf16.msrb.mxu1 %v3954_v37 }
 0x105   : > { %v1150_v42 = vsel %vm1141_vm3, %v1147_v54, %v1149_v32  ;;  %v1152_v3 = vsel %vm1141_vm3, %v1149_v32, %v1151_v55  ;;  %v4886_v7 = vpop.permute.xlu2 %1121  ;;  %v4888_v50 = vor.u32 %v1576_v35, %v1573_v2  ;;  %v676_v54 = vmul.f32 %v4631_v28, %v4880_v17  ;;  %v4914_v28 = vld [vmem:[%s6053_s1 + $0x20] sm:$0xff] }
 0x106   : > { %v1194_v25 = vmul.f32 %v1150_v42, %v4686_v61  ;;  %v1195_v11 = vmul.f32 %v1152_v3, %v4707_v53  ;;  %4144 = vset.pattern.permute.xlu0 %v6063_v49  ;;  %v1156_v42 = vsel %vm1141_vm3, %v1153_v22, %v1155_v4  ;;  %v1523_v41 = vmul.f32 %v1479_v33, %v4686_v61 }
 0x107   : > { %1944 = vperm.xlu0 %4144, %v4528_v24   ;;  %v1578_v15 = vsel %vm907_vm2, %v1569_v8, %v4888_v50  ;;  %v686_v0 = vpack.c.bf16 %v676_v54, %v675_v56  ;;  %v1246_v24 = vshrl.u32 %v4818_v48, 16  ;;  %v644_v56 = vrot.slane %v4746_v21, 1 }
 0x108   : > { %4108 = vset.pattern.permute.xlu1 %v6063_v49  ;;  %v508_v43 = vpop.f32.mrf.mxu0  ;;  %1706 = vmatmul.bf16.vlgmr.msrb.gmra.mxu0 %v1578_v15  ;;  %v4904_v63 = vpack.c.bf16 %v1195_v11, %v1194_v25  ;;  %v1154_v25 = vsel %vm1141_vm3, %v1151_v55, %v1153_v22  ;;  %v1197_v54 = vmul.f32 %v1156_v42, %v4756_v36 }
 0x109   : > { %v509_v62 = vadd.f32 %v4613_v5, %v508_v43  ;;  %4109 = vset.pattern.permute.xlu2 %v6070_v52  ;;  %1917 = vperm.xlu1 %4108, %v4433_v6   ;;  %v962_v46 = vshrl.u32 %v686_v0, 16  ;;  %v965_v16 = vshll.u32 %v686_v0, 16  ;;  %v1248_v23 = vor.u32 %v1246_v24, %v4830_v14  ;;  %v3953_v43 = vld [vmem:[#allocation2 + $0x100] sm:$0xff] }
 0x10a   : > { %2242 = vperm.xlu2 %4109, %v4914_v28   ;;  %v1250_v19 = vshll.u32 %v4904_v63, 16  ;;  %v1196_v24 = vmul.f32 %v1154_v25, %v4735_v20  ;;  %1843 = vmatpush.bf16.msrb.mxu1 %v3953_v43 }
 0x10b   : > { %v4922_v6 = vmax.f32 %v509_v62, 0.0  ;;  %v1440_v48 = vpop.permute.xlu1 %1439  ;;  %v964_v2 = vrot.slane %v962_v46, 3  ;;  %v967_v35 = vrot.slane %v965_v16, 4  ;;  %v4161_v46 = vld [vmem:[%s6053_s1] sm:$0xff] }
 0x10c   : > { %v1480_v12 = vrot.slane %v1440_v48, 1  ;;  %v4925_v32 = vrot.slane %v1250_v19, 1  ;;  %v4963_v19 = vld [vmem:[%s6053_s1 + $0x28] sm:$0xff]  ;;  %v645_v48 = vsel %vm614_vm1, %v642_v29, %v644_v56 }
 0x10d   : > { %6084 = vst [vmem:[#allocation8_spill] sm:$0xff] %v4922_v6  ;;  %v4930_v31 = vpop.permute.xlu2 %1124  ;;  %v782_v39 = vmul.f32 %v4750_v59, %v4922_v6  ;;  %v4938_v8 = vor.u32 %v967_v35, %v964_v2  ;;  %v781_v59 = vmul.f32 %v4679_v58, %v4880_v17  ;;  %v4977_v2 = vpack.c.bf16 %v1197_v54, %v1196_v24 }
 0x10e   : > { %v1481_v14 = vsel %vm614_vm1, %v1478_v13, %v1480_v12  ;;  %v1253_v3 = vsel %vm1233_vm4, %v1248_v23, %v4925_v32  ;;  %v4950_v13 = vld [vmem:[%s6053_s1 + $0x58] sm:$0xff]  ;;  %v1484_v23 = vrot.slane %v4862_v26, 1  ;;  %v677_v60 = vmul.f32 %v4729_v9, %v4922_v6 }
 0x10f   : > { %v1524_v11 = vmul.f32 %v1481_v14, %v4707_v53  ;;  %4149 = vset.pattern.permute.xlu0 %v6067_v27  ;;  %1371 = vmatmul.bf16.gmra.mxu3 %v1253_v3  ;;  %v969_v15 = vsel %vm907_vm2, %v4867_v1, %v4938_v8  ;;  %v791_v62 = vpack.c.bf16 %v782_v39, %v781_v59  ;;  %v4995_v59 = vld [vmem:[%s6053_s1 + $0x70] sm:$0xff]  ;;  %v1254_v54 = vshrl.u32 %v4904_v63, 16 }
 0x110   : > { %2614 = vperm.xlu0 %4149, %v4950_v13   ;;  %v510_v55 = vpop.f32.mrf.mxu0  ;;  %1077 = vmatmul.bf16.gmra.mxu2 %v969_v15  ;;  %v1159_v63 = vrot.slane %v4886_v7, 7  ;;  %v1763_v7 = vpack.c.bf16 %v4646_v51, %v4636_v34 }
 0x111   : > { %v1538_v0 = vpack.c.bf16 %v1524_v11, %v1523_v41  ;;  %v511_v58 = vadd.f32 %v4613_v5, %v510_v55  ;;  %4110 = vset.pattern.permute.xlu1 %v6070_v52  ;;  %v1258_v55 = vshll.u32 %v4977_v2, 16 }
 0x112   : > { %4111 = vset.pattern.permute.xlu2 %v6067_v27  ;;  %2245 = vperm.xlu1 %4110, %v4963_v19  }
 0x113   : > { %v4966_v1 = vmax.f32 %v511_v58, 0.0  ;;  %896 = vmatmul.bf16.gmra.mxu1 %v791_v62  ;;  %2570 = vperm.xlu2 %4111, %v4161_v46   ;;  %v1443_v16 = vpop.permute.xlu1 %1442  ;;  %v1580_v33 = vshrl.u32 %v1538_v0, 16  ;;  %v1583_v22 = vshll.u32 %v1538_v0, 16  ;;  %v1256_v58 = vor.u32 %v1254_v54, %v4925_v32 }
 0x114   : > { %v1482_v37 = vrot.slane %v1443_v16, 1  ;;  %v1260_v16 = vrot.slane %v1258_v55, 1 }
 0x115   : > { %6085 = vst [vmem:[#allocation9_spill] sm:$0xff] %v4966_v1  ;;  %v1582_v35 = vrot.slane %v1580_v33, 3  ;;  %v1585_v42 = vrot.slane %v1583_v22, 4  ;;  %v678_v39 = vmul.f32 %v645_v48, %v4966_v1 }
 0x116   : > { %v1483_v41 = vsel %vm614_vm1, %v1480_v12, %v1482_v37  ;;  %v1485_v14 = vsel %vm614_vm1, %v1482_v37, %v1484_v23  ;;  %v4984_v3 = vpop.permute.xlu2 %1454 }
 0x117   : > { %v1525_v29 = vmul.f32 %v1483_v41, %v4735_v20  ;;  %v1526_v25 = vmul.f32 %v1485_v14, %v4756_v36  ;;  %v4990_v11 = vor.u32 %v1585_v42, %v1582_v35  ;;  %v687_v15 = vpack.c.bf16 %v678_v39, %v677_v60  ;;  %v1449_v39 = vpop.permute.xlu0 %1448 }
 0x118   : > { %2626 = vperm.xlu0 %4149, %v4995_v59   ;;  %v513_v12 = vpop.f32.mrf.mxu0  ;;  %v1261_v35 = vsel %vm1233_vm4, %v1256_v58, %v1260_v16  ;;  %v783_v60 = vmul.f32 %v4732_v44, %v4966_v1  ;;  %v1486_v54 = vrot.slane %v1449_v39, 1  ;;  %v5043_v44 = vld [vmem:[%s6053_s1 + $0x30] sm:$0xff]  ;;  %v3968_v58 = vld [vmem:[#allocation2 + $0x178] sm:$0xff]  ;;  %v1161_v39 = vrot.slane %v4930_v31, 7 }
 0x119   : > { %v1539_v9 = vpack.c.bf16 %v1526_v25, %v1525_v29  ;;  %v514_v43 = vadd.f32 %v4613_v5, %v513_v12  ;;  %v1587_v0 = vsel %vm907_vm2, %v4888_v50, %v4990_v11  ;;  %v971_v62 = vshrl.u32 %v687_v15, 16  ;;  %2164 = vmatpush.bf16.msrb.mxu2 %v3968_v58 }
 0x11a   : > { %4112 = vset.pattern.permute.xlu1 %v6065_v47  ;;  %1711 = vmatmul.bf16.gmra.mxu0 %v1587_v0  ;;  %v974_v24 = vshll.u32 %v687_v15, 16 }
 0x11b   : > { %v5006_v46 = vmax.f32 %v514_v43, 0.0  ;;  %4113 = vset.pattern.permute.xlu2 %v6065_v47  ;;  %2800 = vperm.xlu1 %4112, %v4914_v28   ;;  %v973_v50 = vrot.slane %v971_v62, 3  ;;  %v1589_v48 = vshrl.u32 %v1539_v9, 16  ;;  %v1592_v37 = vshll.u32 %v1539_v9, 16  ;;  %v5049_v9 = vld [vmem:[%s6053_s1 + $0x38] sm:$0xff] }
 0x11c   : > { %2803 = vperm.xlu2 %4113, %v4963_v19   ;;  %v1119_v5 = vpop.permute.xlu1 %1118  ;;  %v976_v33 = vrot.slane %v974_v24, 4  ;;  %v3976_v62 = vld [vmem:[#allocation2 + $0x1b8] sm:$0xff]  ;;  %v1487_v24 = vsel %vm614_vm1, %v1484_v23, %v1486_v54  ;;  %v1262_v23 = vshrl.u32 %v4977_v2, 16  ;;  %v4165_v2 = vld [vmem:[%s6053_s1 + $0x10] sm:$0xff] }
 0x11d   : > { %v1157_v22 = vrot.slane %v1119_v5, 7  ;;  %v784_v32 = vmul.f32 %v4824_v45, %v5006_v46  ;;  %v679_v28 = vmul.f32 %v644_v56, %v5006_v46  ;;  %v1591_v56 = vrot.slane %v1589_v48, 3  ;;  %2504 = vmatpush.bf16.msrb.mxu3 %v3976_v62 }
 0x11e   : > { %v5015_v42 = vor.u32 %v976_v33, %v973_v50  ;;  %v1594_v25 = vrot.slane %v1592_v37, 4  ;;  %v1527_v37 = vmul.f32 %v1487_v24, %v4779_v38 }
 0x11f   : > { %v1158_v41 = vsel %vm1141_vm3, %v1155_v4, %v1157_v22  ;;  %v1160_v14 = vsel %vm1141_vm3, %v1157_v22, %v1159_v63  ;;  %v5026_v45 = vpop.permute.xlu2 %1133  ;;  %1376 = vmatmul.bf16.gmra.mxu3 %v1261_v35  ;;  %v792_v4 = vpack.c.bf16 %v784_v32, %v783_v60  ;;  %v688_v12 = vpack.c.bf16 %v679_v28, %v679_v28 }
 0x120   : > { %v1198_v29 = vmul.f32 %v1158_v41, %v4779_v38  ;;  %v1199_v21 = vmul.f32 %v1160_v14, %v4806_v30  ;;  %v978_v18 = vsel %vm907_vm2, %v4938_v8, %v5015_v42  ;;  %4154 = vset.pattern.permute.xlu0 %v6065_v47  ;;  %v5052_v0 = vor.u32 %v1594_v25, %v1591_v56  ;;  %v3967_v14 = vld [vmem:[#allocation2 + $0x170] sm:$0xff]  ;;  %v3992_v56 = vld [vmem:[#allocation2 + $0x238] sm:$0xff]  ;;  %v3966_v25 = vld [vmem:[#allocation2 + $0x168] sm:$0xff] }
 0x121   : > { %1082 = vmatmul.bf16.gmra.mxu2 %v978_v18  ;;  %v980_v8 = vshrl.u32 %v688_v12, 16  ;;  %v983_v15 = vshll.u32 %v688_v12, 16  ;;  %v1264_v60 = vor.u32 %v1262_v23, %v1260_v16  ;;  %v3984_v16 = vld [vmem:[#allocation2 + $0x1f8] sm:$0xff]  ;;  %v1162_v12 = vsel %vm1141_vm3, %v1159_v63, %v1161_v39  ;;  %3050 = vmatpush.bf16.msra.mxu1 %v3992_v56 }
 0x122   : > { %v5036_v55 = vpack.c.bf16 %v1199_v21, %v1198_v29  ;;  %v1596_v26 = vsel %vm907_vm2, %v4990_v11, %v5052_v0  ;;  %2165 = vmatpush.bf16.msrb.mxu2 %v3967_v14  ;;  %2722 = vmatpush.bf16.msra.mxu0 %v3984_v16 }
 0x123   : > { %901 = vmatmul.bf16.gmra.mxu1 %v792_v4  ;;  %4114 = vset.pattern.permute.xlu1 %v6063_v49  ;;  %v982_v32 = vrot.slane %v980_v8, 3  ;;  %v985_v48 = vrot.slane %v983_v15, 4 }
 0x124   : > { %4115 = vset.pattern.permute.xlu2 %v6063_v49  ;;  %1920 = vperm.xlu1 %4114, %v5043_v44   ;;  %v1266_v50 = vshll.u32 %v5036_v55, 16  ;;  %v1270_v16 = vshrl.u32 %v5036_v55, 16  ;;  %v3983_v55 = vld [vmem:[#allocation2 + $0x1f0] sm:$0xff] }
 0x125   : > { %1923 = vperm.xlu2 %4115, %v5049_v9   ;;  %v1452_v43 = vpop.permute.xlu1 %1451  ;;  %v986_v29 = vor.u32 %v985_v48, %v982_v32 }
 0x126   : > { %v1488_v5 = vrot.slane %v1452_v43, 1  ;;  %v5067_v28 = vrot.slane %v1266_v50, 1  ;;  %v1490_v43 = vrot.slane %v4984_v3, 1  ;;  %2166 = vmatpush.bf16.msrb.mxu2 %v3966_v25  ;;  %2723 = vmatpush.bf16.msra.mxu0 %v3983_v55 }
 0x127   : > { %v5059_v22 = vpop.permute.xlu2 %1136  ;;  %v987_v58 = vsel %vm907_vm2, %v5015_v42, %v986_v29  ;;  %v3965_v42 = vld [vmem:[#allocation2 + $0x160] sm:$0xff] }
 0x128   : > { %v1489_v33 = vsel %vm614_vm1, %v1486_v54, %v1488_v5  ;;  %v1269_v31 = vsel %vm1233_vm4, %v1264_v60, %v5067_v28  ;;  %v5083_v54 = vpop.permute.xlu0 %1457  ;;  %v1491_v32 = vsel %vm614_vm1, %v1488_v5, %v1490_v43  ;;  %v4166_v5 = vld [vmem:[%s6053_s1 + $0x18] sm:$0xff] }
 0x129   : > { %v1528_v35 = vmul.f32 %v1489_v33, %v4806_v30  ;;  %v1492_v15 = vrot.slane %v5083_v54, 1  ;;  %v1200_v33 = vmul.f32 %v1162_v12, %v4832_v57  ;;  %v3964_v60 = vld [vmem:[#allocation2 + $0x158] sm:$0xff] }
 0x12a   : > { %1716 = vmatmul.bf16.gmra.mxu0 %v1596_v26  ;;  %2167 = vmatpush.bf16.msrb.mxu2 %v3965_v42 }
 0x12b   : > { %v1540_v41 = vpack.c.bf16 %v1528_v35, %v1527_v37  ;;  %v1493_v48 = vsel %vm614_vm1, %v1490_v43, %v1492_v15  ;;  %v1529_v35 = vmul.f32 %v1491_v32, %v4832_v57  ;;  %v5138_v32 = vld [vmem:[%s6053_s1 + $0x40] sm:$0xff] }
 0x12c   : > { %4117 = vset.pattern.permute.xlu1 %v6070_v52 }
 0x12d   : > { %4118 = vset.pattern.permute.xlu2 %v6067_v27  ;;  %2251 = vperm.xlu1 %4117, %v5049_v9   ;;  %v1598_v21 = vshrl.u32 %v1540_v41, 16  ;;  %v1601_v18 = vshll.u32 %v1540_v41, 16  ;;  %v1530_v41 = vmul.f32 %v1493_v48, %v4854_v10  ;;  %v5149_v48 = vld [vmem:[%s6053_s1 + $0x48] sm:$0xff] }
 0x12e   : > { %2578 = vperm.xlu2 %4118, %v4165_v2   ;;  %v1128_v11 = vpop.permute.xlu1 %1127  ;;  %2168 = vmatpush.bf16.msrb.mxu2 %v3964_v60  ;;  %v3962_v60 = vld [vmem:[#allocation2 + $0x148] sm:$0xff] }
 0x12f   : > { %v5076_v4 = vpop.f32.mrf.mxu1  ;;  %v1163_v8 = vrot.slane %v1128_v11, 7  ;;  %1381 = vmatmul.bf16.gmra.mxu3 %v1269_v31  ;;  %v1600_v63 = vrot.slane %v1598_v21, 3  ;;  %v1603_v50 = vrot.slane %v1601_v18, 4  ;;  %v1541_v21 = vpack.c.bf16 %v1530_v41, %v1529_v35  ;;  %v3975_v31 = vld [vmem:[#allocation2 + $0x1b0] sm:$0xff] }
 0x130   : > { %v5089_v62 = vpop.permute.xlu2 %1469  ;;  %v1167_v11 = vrot.slane %v5026_v45, 7  ;;  %v1461_v25 = vpop.permute.xlu0 %1460  ;;  %2505 = vmatpush.bf16.msrb.mxu3 %v3975_v31 }
 0x131   : > { %v1164_v24 = vsel %vm1141_vm3, %v1161_v39, %v1163_v8  ;;  %1087 = vmatmul.bf16.gmra.mxu2 %v987_v58  ;;  %v5104_v26 = vor.u32 %v1603_v50, %v1600_v63  ;;  %v1272_v58 = vor.u32 %v1270_v16, %v5067_v28  ;;  %v3991_v50 = vld [vmem:[#allocation2 + $0x230] sm:$0xff]  ;;  %v1494_v35 = vrot.slane %v1461_v25, 1 }
 0x132   : > { %v1201_v3 = vmul.f32 %v1164_v24, %v4854_v10  ;;  %v1610_v24 = vshll.u32 %v1541_v21, 16  ;;  %3051 = vmatpush.bf16.msra.mxu1 %v3991_v50 }
 0x133   : > { %1844 = vmatmul.bf16.vlgmr.msrb.gmra.mxu1 %v1763_v7  ;;  %v1605_v2 = vsel %vm907_vm2, %v5052_v0, %v5104_v26  ;;  %v1607_v0 = vshrl.u32 %v1541_v21, 16  ;;  %v3963_v7 = vld [vmem:[#allocation2 + $0x150] sm:$0xff]  ;;  %v1495_v16 = vsel %vm614_vm1, %v1492_v15, %v1494_v35  ;;  %v1169_v15 = vrot.slane %v5059_v22, 7 }
 0x134   : > { %v5100_v37 = vpack.c.bf16 %v1201_v3, %v1200_v33  ;;  %2169 = vmatpush.bf16.msrb.mxu2 %v3963_v7  ;;  %v3974_v7 = vld [vmem:[#allocation2 + $0x1a8] sm:$0xff]  ;;  %v1531_v54 = vmul.f32 %v1495_v16, %v4880_v17 }
 0x135   : > { %4119 = vset.pattern.permute.xlu1 %v6067_v27  ;;  %v1609_v41 = vrot.slane %v1607_v0, 3  ;;  %2506 = vmatpush.bf16.msrb.mxu3 %v3974_v7  ;;  %v1170_v22 = vsel %vm1141_vm3, %v1167_v11, %v1169_v15 }
 0x136   : > { %4120 = vset.pattern.permute.xlu2 %v6065_v47  ;;  %2582 = vperm.xlu1 %4119, %v4166_v5   ;;  %v1131_v23 = vpop.permute.xlu1 %1130  ;;  %v1274_v14 = vshll.u32 %v5100_v37, 16  ;;  %v1764_v5 = vpack.c.bf16 %v4686_v61, %v4664_v40  ;;  %v1204_v45 = vmul.f32 %v1170_v22, %v4966_v1 }
 0x137   : > { %v5110_v39 = vpop.f32.mrf.mxu1  ;;  %2806 = vperm.xlu2 %4120, %v5043_v44   ;;  %v1165_v29 = vrot.slane %v1131_v23, 7 }
 0x138   : > { %v5122_v56 = vrot.slane %v1274_v14, 1  ;;  %v1612_v14 = vrot.slane %v1610_v24, 4  ;;  %2170 = vmatpush.bf16.msrb.mxu2 %v3962_v60 }
 0x139   : > { %v5115_v18 = vpop.permute.xlu2 %1905  ;;  %v1166_v12 = vsel %vm1141_vm3, %v1163_v8, %v1165_v29  ;;  %v1168_v43 = vsel %vm1141_vm3, %v1165_v29, %v1167_v11 }
 0x13a   : > { %1721 = vmatmul.bf16.gmra.mxu0 %v1605_v2  ;;  %v1202_v33 = vmul.f32 %v1166_v12, %v4880_v17  ;;  %v1203_v8 = vmul.f32 %v1168_v43, %v4922_v6  ;;  %v1277_v3 = vsel %vm1233_vm4, %v1272_v58, %v5122_v56  ;;  %v5167_v25 = vor.u32 %v1612_v14, %v1609_v41  ;;  %v3961_v12 = vld [vmem:[#allocation2 + $0x140] sm:$0xff]  ;;  %v5169_v43 = vpop.permute.xlu0 %1139 }
 0x13c   : > { %v5162_v31 = vpack.c.bf16 %v1203_v8, %v1202_v33  ;;  %v1614_v55 = vsel %vm907_vm2, %v5104_v26, %v5167_v25  ;;  %2171 = vmatpush.bf16.msrb.mxu2 %v3961_v12  ;;  %v1171_v33 = vrot.slane %v5169_v43, 7 }
 0x13e   : > { %4121 = vset.pattern.permute.xlu1 %v6063_v49  ;;  %v1282_v24 = vshll.u32 %v5162_v31, 16  ;;  %v1172_v41 = vsel %vm1141_vm3, %v1169_v15, %v1171_v33 }
 0x13f   : > { %v5130_v63 = vpop.f32.mrf.mxu1  ;;  %4122 = vset.pattern.permute.xlu2 %v6063_v49  ;;  %1926 = vperm.xlu1 %4121, %v5138_v32   ;;  %v5141_v28 = vpop.permute.xlu1 %1463 }
 0x140   : > { %v1496_v42 = vrot.slane %v5141_v28, 1  ;;  %1386 = vmatmul.bf16.gmra.mxu3 %v1277_v3  ;;  %1929 = vperm.xlu2 %4122, %v5149_v48   ;;  %v515_v28 = vpop.f32.mrf.mxu0 }
 0x142   : > { %v1053_v23 = vpop.f32.mrf.mxu2  ;;  %v5154_v29 = vpop.permute.xlu2 %2230  ;;  %v1497_v2 = vsel %vm614_vm1, %v1494_v35, %v1496_v42  ;;  %v1278_v35 = vshrl.u32 %v5100_v37, 16 }
 0x143   : > { %v5157_v21 = vadd.f32 %v1053_v23, %v5076_v4  ;;  %1849 = vmatmul.bf16.gmra.mxu1 %v1764_v5  ;;  %v1532_v4 = vmul.f32 %v1497_v2, %v4922_v6  ;;  %v5190_v5 = vrot.slane %v1282_v24, 1  ;;  %v3973_v23 = vld [vmem:[#allocation2 + $0x1a0] sm:$0xff]  ;;  %v1909_v12 = vpop.permute.xlu0 %1908  ;;  %v1950_v24 = vrot.slane %v5115_v18, 7 }
 0x144   : > { %v1280_v26 = vor.u32 %v1278_v35, %v5122_v56  ;;  %2507 = vmatpush.bf16.msrb.mxu3 %v3973_v23  ;;  %v1765_v56 = vpack.c.bf16 %v4735_v20, %v4707_v53 }
 0x145   : > { %v1542_v8 = vpack.c.bf16 %v1532_v4, %v1531_v54  ;;  %v1205_v4 = vmul.f32 %v1172_v41, %v5006_v46  ;;  %v3972_v54 = vld [vmem:[#allocation2 + $0x198] sm:$0xff]  ;;  %v3982_v41 = vld [vmem:[#allocation2 + $0x1e8] sm:$0xff] }
 0x146   : > { %v1285_v37 = vsel %vm1233_vm4, %v1280_v26, %v5190_v5  ;;  %2724 = vmatpush.bf16.msra.mxu0 %v3982_v41 }
 0x147   : > { %v5172_v58 = vpop.f32.mrf.mxu1  ;;  %4123 = vset.pattern.permute.xlu1 %v6070_v52  ;;  %v1467_v0 = vpop.permute.xlu1 %1466  ;;  %v1616_v2 = vshrl.u32 %v1542_v8, 16  ;;  %v1619_v16 = vshll.u32 %v1542_v8, 16 }
 0x148   : > { %6086 = vst [vmem:[#allocation10_spill] sm:$0xff] %v5172_v58  ;;  %4124 = vset.pattern.permute.xlu2 %v6070_v52  ;;  %2254 = vperm.xlu1 %4123, %v5138_v32   ;;  %v1498_v14 = vrot.slane %v1467_v0, 1  ;;  %v6069_v0 = vrot.slane %v5089_v62, 1 }
 0x149   : > { %2257 = vperm.xlu2 %4124, %v5149_v48   ;;  %v1621_v8 = vrot.slane %v1619_v16, 4  ;;  %2508 = vmatpush.bf16.msrb.mxu3 %v3972_v54  ;;  %v5227_v16 = vpack.c.bf16 %v1205_v4, %v1204_v45  ;;  %v3990_v54 = vld [vmem:[#allocation2 + $0x228] sm:$0xff]  ;;  %v3981_v45 = vld [vmem:[#allocation2 + $0x1e0] sm:$0xff] }
 0x14a   : > { %v5184_v50 = vpop.f32.mrf.mxu2  ;;  %1726 = vmatmul.bf16.gmra.mxu0 %v1614_v55  ;;  %v5187_v3 = vpop.permute.xlu2 %2236  ;;  %v1499_v15 = vsel %vm614_vm1, %v1496_v42, %v1498_v14  ;;  %v1618_v55 = vrot.slane %v1616_v2, 3  ;;  %v1501_v35 = vsel %vm614_vm1, %v1498_v14, %v6069_v0  ;;  %v1952_v2 = vrot.slane %v1909_v12, 7  ;;  %v3971_v14 = vld [vmem:[#allocation2 + $0x190] sm:$0xff]  ;;  %3052 = vmatpush.bf16.msra.mxu1 %v3990_v54 }
 0x14b   : > { %v5245_v41 = vpop.permute.xlu0 %1914  ;;  %2725 = vmatpush.bf16.msra.mxu0 %v3981_v45 }
 0x14c   : > { %v1953_v4 = vsel %vm1141_vm3, %v1950_v24, %v1952_v2 }
 0x14d   : > { %2509 = vmatpush.bf16.msrb.mxu3 %v3971_v14  ;;  %v5260_v14 = vld [vmem:[%s6053_s1 + $0x50] sm:$0xff]  ;;  %v1999_v54 = vmul.f32 %v1953_v4, %v4664_v40  ;;  %v3989_v4 = vld [vmem:[#allocation2 + $0x220] sm:$0xff] }
 0x14e   : > { %3053 = vmatpush.bf16.msra.mxu1 %v3989_v4  ;;  %v2280_v4 = vrot.slane %v5187_v3, 1 }
 0x14f   : > { %v5199_v60 = vpop.f32.mrf.mxu1 }
 0x150   : > { %1391 = vmatmul.bf16.gmra.mxu3 %v1285_v37  ;;  %4125 = vset.pattern.permute.xlu1 %v6067_v27  ;;  %v1903_v11 = vpop.permute.xlu1 %1902  ;;  %v1533_v37 = vmul.f32 %v1499_v15, %v4966_v1 }
 0x151   : > { %v1949_v7 = vrot.slane %v1903_v11, 7  ;;  %4126 = vset.pattern.permute.xlu2 %v6065_v47  ;;  %2590 = vperm.xlu1 %4125, %v4963_v19   ;;  %v1534_v11 = vmul.f32 %v1501_v35, %v5006_v46  ;;  %v3970_v35 = vld [vmem:[#allocation2 + $0x188] sm:$0xff] }
 0x152   : > { %2812 = vperm.xlu2 %4126, %v5138_v32   ;;  %2510 = vmatpush.bf16.msrb.mxu3 %v3970_v35  ;;  %v1766_v35 = vpack.c.bf16 %v4779_v38, %v4756_v36 }
 0x153   : > { %v1951_v18 = vsel %vm1141_vm3, %v1949_v7, %v1950_v24  ;;  %v1997_v22 = vmul.f32 %v1949_v7, %v4636_v34  ;;  %1854 = vmatmul.bf16.gmra.mxu1 %v1765_v56  ;;  %v1058_v26 = vpop.f32.mrf.mxu2  ;;  %v5221_v19 = vpop.permute.xlu2 %2791  ;;  %v5233_v7 = vor.u32 %v1621_v8, %v1618_v55  ;;  %v1286_v55 = vshrl.u32 %v5162_v31, 16 }
 0x154   : > { %v1998_v42 = vmul.f32 %v1951_v18, %v4646_v51  ;;  %v5225_v23 = vadd.f32 %v1058_v26, %v5130_v63  ;;  %v4169_v63 = vld [vmem:[%s6055_s3] ss:$0 sm:$0xff]  ;;  %v1290_v8 = vshll.u32 %v5227_v16, 16 }
 0x155   : > { %v516_v18 = vadd.f32 %v4169_v63, %v515_v28  ;;  %v1543_v28 = vpack.c.bf16 %v1534_v11, %v1533_v37  ;;  %v1623_v24 = vsel %vm907_vm2, %v5167_v25, %v5233_v7  ;;  %v1288_v25 = vor.u32 %v1286_v55, %v5190_v5 }
 0x156   : > { %v2014_v26 = vpack.c.bf16 %v1998_v42, %v1997_v22 }
 0x157   : > { %v5231_v56 = vpop.f32.mrf.mxu1  ;;  %v5252_v22 = vmax.f32 %v516_v18, 0.0  ;;  %v1292_v18 = vrot.slane %v1290_v8, 1  ;;  %v1628_v27 = vshll.u32 %v1543_v28, 16 }
 0x158   : > { %6087 = vst [vmem:[#allocation11_spill] sm:$0xff] %v5231_v56  ;;  %v5238_v12 = vpop.permute.xlu1 %1911  ;;  %v2043_v42 = vshll.u32 %v2014_v26, 16  ;;  %v2041_v55 = vshrl.u32 %v2014_v26, 16 }
 0x159   : > { %v6062_v15 = vrot.slane %v5238_v12, 7  ;;  %4127 = vset.pattern.permute.xlu1 %v6065_v47  ;;  %v1625_v47 = vshrl.u32 %v1543_v28, 16  ;;  %v1293_v52 = vsel %vm1233_vm4, %v1288_v25, %v1292_v18  ;;  %v1206_v5 = vmul.f32 %v1171_v33, %v5252_v22  ;;  %v3979_v28 = vld [vmem:[#allocation2 + $0x1d0] sm:$0xff] }
 0x15a   : > { %4128 = vset.pattern.permute.xlu2 %v6063_v49  ;;  %2815 = vperm.xlu1 %4127, %v5149_v48   ;;  %v2045_v0 = vrot.slane %v2043_v42, 1  ;;  %v6089_v42 = vmov 6   ;;  %v1630_v43 = vrot.slane %v1628_v27, 4 }
 0x15b   : > { %v1955_v31 = vsel %vm1141_vm3, %v1952_v2, %v6062_v15  ;;  %1731 = vmatmul.bf16.gmra.mxu0 %v1623_v24  ;;  %1932 = vperm.xlu2 %4128, %v5260_v14   ;;  %v5263_v37 = vpop.f32.mrf.mxu2  ;;  %v5265_v11 = vpop.permute.xlu2 %2797  ;;  %v3980_v2 = vld [vmem:[#allocation2 + $0x1d8] sm:$0xff]  ;;  %v3969_v24 = vld [vmem:[#allocation2 + $0x180] sm:$0xff]  ;;  %v1627_v25 = vrot.slane %v1625_v47, 3  ;;  %v3978_v47 = vld [vmem:[#allocation2 + $0x1c8] sm:$0xff] }
 0x15c   : > { %6088 = vst [vmem:[#allocation12_spill] sm:$0xff] %v5263_v37  ;;  %v2000_v63 = vmul.f32 %v1955_v31, %v4686_v61  ;;  %2726 = vmatpush.bf16.msra.mxu0 %v3980_v2  ;;  %2511 = vmatpush.bf16.msrb.mxu3 %v3969_v24  ;;  %v2046_v33 = vor.u32 %v2045_v0, %v2041_v55  ;;  %v5292_v24 = vpop.permute.xlu0 %2239 }
 0x15d   : > { %v6072_v0 = vrot.slane %v5292_v24, 1 }
 0x15e   : > { %v5270_v15 = vpack.c.bf16 %v2000_v63, %v1999_v54  ;;  %v1215_v54 = vpack.c.bf16 %v1206_v5, %v1206_v5  ;;  %v2277_v5 = vrot.slane %v5154_v29, 1 }
 0x15f   : > { %v5272_v49 = vpop.f32.mrf.mxu1  ;;  %v2283_v29 = vsel %vm614_vm1, %v2280_v4, %v6072_v0 }
 0x160   : > { %1396 = vmatmul.bf16.gmra.mxu3 %v1293_v52  ;;  %v2048_v45 = vshll.u32 %v5270_v15, 16  ;;  %2727 = vmatpush.bf16.msra.mxu0 %v3979_v28  ;;  %v1298_v55 = vshll.u32 %v1215_v54, 16  ;;  %v2328_v0 = vmul.f32 %v2283_v29, %v4686_v61 }
 0x161   : > { %v2234_v8 = vpop.permute.xlu1 %2233 }
 0x162   : > { %4131 = vset.pattern.permute.xlu1 %v6089_v42  ;;  %v5282_v31 = vrot.slane %v2048_v45, 1  ;;  %v2278_v26 = vrot.slane %v2234_v8, 1  ;;  %v5301_v45 = vor.u32 %v1630_v43, %v1627_v25  ;;  %v6091_v8 = vrot.slane %v5089_v62, 1  ;;  %v3977_v43 = vld [vmem:[#allocation2 + $0x1c0] sm:$0xff] }
 0x163   : > { %1859 = vmatmul.bf16.gmra.mxu1 %v1766_v35  ;;  %4132 = vset.pattern.permute.xlu2 %v6089_v42  ;;  %v1063_v52 = vpop.f32.mrf.mxu2 }
 0x164   : > { %2260 = vperm.xlu1 %4131, %v5260_v14   ;;  %v5287_v63 = vadd.f32 %v1063_v52, %v5199_v60  ;;  %2263 = vperm.xlu2 %4132, %v4950_v13   ;;  %v5290_v2 = vpop.permute.xlu2 %2242  ;;  %v2051_v27 = vsel %vm1233_vm4, %v2046_v33, %v5282_v31  ;;  %v1535_v35 = vmul.f32 %v6091_v8, %v5252_v22  ;;  %v1294_v33 = vshrl.u32 %v5227_v16, 16 }
 0x165   : > { %2172 = vmatmul.bf16.vlgmr.msrb.gmra.mxu2 %v2051_v27  ;;  %v2279_v52 = vsel %vm614_vm1, %v2277_v5, %v2278_v26  ;;  %v2281_v28 = vsel %vm614_vm1, %v2278_v26, %v2280_v4  ;;  %2728 = vmatpush.bf16.msra.mxu0 %v3978_v47  ;;  %v1632_v25 = vsel %vm907_vm2, %v5233_v7, %v5301_v45  ;;  %v1300_v27 = vrot.slane %v1298_v55, 1 }
 0x166   : > { %v2326_v62 = vmul.f32 %v2279_v52, %v4646_v51  ;;  %v2327_v54 = vmul.f32 %v2281_v28, %v4664_v40  ;;  %v1296_v16 = vor.u32 %v1294_v33, %v1292_v18  ;;  %v1544_v47 = vpack.c.bf16 %v1535_v35, %v1535_v35 }
 0x167   : > { %v5299_v60 = vpop.f32.mrf.mxu1  ;;  %v6093_v8 = vmov 7   ;;  %v2325_v4 = vmul.f32 %v2277_v5, %v4636_v34  ;;  %v1767_v34 = vpack.c.bf16 %v4832_v57, %v4806_v30 }
 0x168   : > { %6090 = vst [vmem:[#allocation13_spill] sm:$0xff] %v5299_v60  ;;  %v2343_v55 = vpack.c.bf16 %v2328_v0, %v2327_v54  ;;  %v1301_v35 = vsel %vm1233_vm4, %v1296_v16, %v1300_v27  ;;  %v1634_v28 = vshrl.u32 %v1544_v47, 16  ;;  %v1637_v33 = vshll.u32 %v1544_v47, 16  ;;  %v3988_v60 = vld [vmem:[#allocation2 + $0x218] sm:$0xff]  ;;  %v5345_v27 = vld [vmem:[%s6053_s1 + $0x60] sm:$0xff] }
 0x169   : > { %2729 = vmatpush.bf16.msra.mxu0 %v3977_v43  ;;  %v2342_v18 = vpack.c.bf16 %v2326_v62, %v2325_v4  ;;  %v6094_v54 = vmov 8   ;;  %v6095_v16 = vmov 5   ;;  %3054 = vmatpush.bf16.msra.mxu1 %v3988_v60 }
 0x16a   : > { %v5312_v3 = vpop.permute.xlu1 %2788  ;;  %v2377_v29 = vshrl.u32 %v2343_v55, 16  ;;  %v1639_v43 = vrot.slane %v1637_v33, 4  ;;  %v1956_v33 = vrot.slane %v5245_v41, 7 }
 0x16b   : > { %1736 = vmatmul.bf16.gmra.mxu0 %v1632_v25  ;;  %v5319_v26 = vpop.f32.mrf.mxu2  ;;  %v2380_v25 = vshll.u32 %v2343_v55, 16 }
 0x16c   : > { %6092 = vst [vmem:[#allocation14_spill] sm:$0xff] %v5319_v26  ;;  %4133 = vset.pattern.permute.xlu1 %v6093_v8  ;;  %4134 = vset.pattern.permute.xlu2 %v6093_v8  ;;  %v1636_v26 = vrot.slane %v1634_v28, 3 }
 0x16d   : > { %2594 = vperm.xlu1 %4133, %v5043_v44   ;;  %2598 = vperm.xlu2 %4134, %v5049_v9   ;;  %v5327_v7 = vpop.permute.xlu2 %2570  ;;  %v2369_v44 = vshrl.u32 %v2342_v18, 16  ;;  %v2372_v9 = vshll.u32 %v2342_v18, 16  ;;  %v2382_v28 = vrot.slane %v2380_v25, 4 }
 0x16f   : > { %v5329_v52 = vpop.f32.mrf.mxu1  ;;  %v2374_v55 = vrot.slane %v2372_v9, 4 }
 0x170   : > { %1401 = vmatmul.bf16.gmra.mxu3 %v1301_v35  ;;  %v2379_v35 = vrot.slane %v2377_v29, 3 }
 0x172   : > { %v5334_v5 = vpop.permute.xlu1 %2794 }
 0x173   : > { %1864 = vmatmul.bf16.gmra.mxu1 %v1767_v34  ;;  %v1068_v62 = vpop.f32.mrf.mxu2  ;;  %v1640_v34 = vor.u32 %v1639_v43, %v1636_v26  ;;  %v2284_v43 = vrot.slane %v5290_v2, 1 }
 0x174   : > { %v5337_v0 = vadd.f32 %v1068_v62, %v5272_v49  ;;  %v2371_v49 = vrot.slane %v2369_v44, 3  ;;  %v5354_v62 = vpop.permute.xlu0 %2248  ;;  %v6097_v44 = vrot.slane %v5238_v12, 7  ;;  %v5378_v12 = vld [vmem:[%s6053_s1 + $0x68] sm:$0xff] }
 0x175   : > { %4135 = vset.pattern.permute.xlu1 %v6094_v54  ;;  %4136 = vset.pattern.permute.xlu2 %v6095_v16  ;;  %v1641_v56 = vsel %vm907_vm2, %v5301_v45, %v1640_v34  ;;  %v6099_v34 = vrot.slane %v5292_v24, 1 }
 0x176   : > { %2821 = vperm.xlu1 %4135, %v4950_v13   ;;  %1938 = vperm.xlu2 %4136, %v5345_v27   ;;  %v5350_v4 = vpop.permute.xlu2 %2803  ;;  %v2375_v58 = vor.u32 %v2374_v55, %v2371_v49  ;;  %v1957_v60 = vsel %vm1141_vm3, %v6097_v44, %v1956_v33  ;;  %v1768_v49 = vpack.c.bf16 %v4880_v17, %v4854_v10 }
 0x177   : > { %v5348_v47 = vpop.f32.mrf.mxu1  ;;  %v1367_v18 = vpop.f32.mrf.mxu3 }
 0x178   : > { %6096 = vst [vmem:[#allocation15_spill] sm:$0xff] %v5348_v47  ;;  %v1407_v13 = vadd.f32 %v1367_v18, %v5157_v21  ;;  %v5360_v47 = vor.u32 %v2382_v28, %v2379_v35  ;;  %v3987_v21 = vld [vmem:[#allocation2 + $0x210] sm:$0xff]  ;;  %v2052_v35 = vshrl.u32 %v5270_v15, 16 }
 0x179   : > { %3055 = vmatpush.bf16.msra.mxu1 %v3987_v21  ;;  %v2633_v21 = vmul.f32 %v5327_v7, %v4646_v51 }
 0x17a   : > { %v2384_v25 = vsel %vm907_vm2, %v2375_v58, %v5360_v47  ;;  %v2285_v58 = vsel %vm614_vm1, %v6099_v34, %v2284_v43 }
 0x17b   : > { %1741 = vmatmul.bf16.gmra.mxu0 %v1641_v56  ;;  %v5358_v37 = vpop.permute.xlu1 %1917  ;;  %v5366_v9 = vpop.f32.mrf.mxu2  ;;  %v2001_v56 = vmul.f32 %v1957_v60, %v4707_v53  ;;  %v2054_v60 = vor.u32 %v2052_v35, %v5282_v31 }
 0x17c   : > { %v6074_v41 = vrot.slane %v5358_v37, 7  ;;  %6098 = vst [vmem:[#allocation16_spill] sm:$0xff] %v5366_v9  ;;  %v2575_v28 = vpop.permute.xlu0 %2574  ;;  %v2836_v9 = vrot.slane %v5221_v19, 7  ;;  %v2838_v19 = vrot.slane %v5334_v5, 7 }
 0x17d   : > { %v2634_v24 = vmul.f32 %v2575_v28, %v4664_v40 }
 0x17e   : > { %v1959_v26 = vsel %vm1141_vm3, %v1956_v33, %v6074_v41  ;;  %4137 = vset.pattern.permute.xlu1 %v6095_v16  ;;  %4138 = vset.pattern.permute.xlu2 %v6089_v42 }
 0x17f   : > { %v2002_v45 = vmul.f32 %v1959_v26, %v4735_v20  ;;  %1941 = vperm.xlu1 %4137, %v5378_v12   ;;  %2266 = vperm.xlu2 %4138, %v5345_v27   ;;  %v5382_v29 = vpop.f32.mrf.mxu1  ;;  %v5387_v18 = vpop.permute.xlu2 %1923 }
 0x180   : > { %2512 = vmatmul.bf16.vlgmr.msrb.gmra.mxu3 %v2384_v25  ;;  %v5427_v28 = vpop.f32.mrf.mxu3 }
 0x181   : > { %v5391_v55 = vpack.c.bf16 %v2002_v45, %v2001_v56 }
 0x183   : > { %1869 = vmatmul.bf16.gmra.mxu1 %v1768_v49  ;;  %v2056_v33 = vshll.u32 %v5391_v55, 16  ;;  %v1073_v2 = vpop.f32.mrf.mxu2 }
 0x184   : > { %v5398_v44 = vpop.permute.xlu1 %2245  ;;  %v5404_v26 = vadd.f32 %v1073_v2, %v5329_v52  ;;  %v2329_v52 = vmul.f32 %v2285_v58, %v4707_v53 }
 0x185   : > { %v6073_v15 = vrot.slane %v5398_v44, 1  ;;  %v1707_v56 = vpop.f32.mrf.mxu0  ;;  %v5407_v45 = vrot.slane %v2056_v33, 1 }
 0x186   : > { %v5409_v25 = vadd.f32 %v1707_v56, %v1407_v13  ;;  %v3986_v56 = vld [vmem:[#allocation2 + $0x208] sm:$0xff] }
 0x187   : > { %v2287_v49 = vsel %vm614_vm1, %v2284_v43, %v6073_v15  ;;  %4140 = vset.pattern.permute.xlu1 %v6093_v8  ;;  %4141 = vset.pattern.permute.xlu2 %v6093_v8  ;;  %v5417_v31 = vpop.f32.mrf.mxu1  ;;  %v2059_v7 = vsel %vm1233_vm4, %v2054_v60, %v5407_v45  ;;  %v2649_v43 = vpack.c.bf16 %v2634_v24, %v2633_v21  ;;  %v3985_v24 = vld [vmem:[#allocation2 + $0x200] sm:$0xff] }
 0x188   : > { %v2330_v13 = vmul.f32 %v2287_v49, %v4735_v20  ;;  %2602 = vperm.xlu1 %4140, %v5138_v32   ;;  %2606 = vperm.xlu2 %4141, %v5149_v48   ;;  %v5425_v35 = vpop.permute.xlu2 %2578 }
 0x189   : > { %2177 = vmatmul.bf16.gmra.mxu2 %v2059_v7  ;;  %3056 = vmatpush.bf16.msra.mxu1 %v3986_v56  ;;  %v1769_v7 = vpack.c.bf16 %v4966_v1, %v4922_v6  ;;  %v2835_v1 = vrot.slane %v5312_v3, 7 }
 0x18a   : > { %v2344_v33 = vpack.c.bf16 %v2330_v13, %v2329_v52 }
 0x18b   : > { %2730 = vmatmul.bf16.vlgmr.msra.gmra.mxu0 %v2649_v43  ;;  %v5429_v34 = vpop.f32.mrf.mxu2  ;;  %v2837_v5 = vsel %vm1141_vm3, %v2835_v1, %v2836_v9 }
 0x18c   : > { %v2386_v2 = vshrl.u32 %v2344_v33, 16  ;;  %v2389_v60 = vshll.u32 %v2344_v33, 16 }
 0x18d   : > { %v5431_v58 = vpop.permute.xlu1 %2800  ;;  %v5433_v32 = vpop.f32.mrf.mxu0  ;;  %3057 = vmatpush.bf16.msra.mxu1 %v3985_v24 }
 0x18e   : > { %v2388_v49 = vrot.slane %v2386_v2, 3  ;;  %v2391_v15 = vrot.slane %v2389_v60, 4  ;;  %v6079_v2 = vrot.slane %v5387_v18, 7 }
 0x190   : > { %4142 = vset.pattern.permute.xlu1 %v6094_v54  ;;  %v5436_v48 = vpop.f32.mrf.mxu1  ;;  %4143 = vset.pattern.permute.xlu2 %v6094_v54  ;;  %v5439_v21 = vor.u32 %v2391_v15, %v2388_v49 }
 0x191   : > { %2824 = vperm.xlu1 %4142, %v5345_v27   ;;  %2827 = vperm.xlu2 %4143, %v5378_v12   ;;  %v5445_v52 = vpop.permute.xlu2 %2806 }
 0x192   : > { %v1372_v13 = vpop.f32.mrf.mxu3  ;;  %v2393_v43 = vsel %vm907_vm2, %v5360_v47, %v5439_v21 }
 0x193   : > { %v1409_v33 = vadd.f32 %v1372_v13, %v5225_v23  ;;  %1874 = vmatmul.bf16.gmra.mxu1 %v1769_v7  ;;  %2517 = vmatmul.bf16.gmra.mxu3 %v2393_v43  ;;  %v1078_v15 = vpop.f32.mrf.mxu2  ;;  %v6100_v23 = vrot.slane %v5358_v37, 7  ;;  %v5475_v37 = vld [vmem:[%s6053_s1 + $0x78] sm:$0xff]  ;;  %v2288_v13 = vrot.slane %v5354_v62, 1 }
 0x194   : > { %v5453_v60 = vadd.f32 %v1078_v15, %v5382_v29  ;;  %v6081_v15 = vrot.slane %v5265_v11, 7 }
 0x196   : > { %v1921_v56 = vpop.permute.xlu1 %1920  ;;  %v2841_v62 = vsel %vm1141_vm3, %v2838_v19, %v6081_v15 }
 0x197   : > { %v1960_v49 = vrot.slane %v1921_v56, 7  ;;  %v1712_v41 = vpop.f32.mrf.mxu0  ;;  %v2839_v56 = vsel %vm1141_vm3, %v2836_v9, %v2838_v19  ;;  %v1770_v19 = vpack.c.bf16 %v5252_v22, %v5006_v46 }
 0x198   : > { %v5457_v6 = vpop.f32.mrf.mxu1  ;;  %v5459_v47 = vadd.f32 %v1712_v41, %v1409_v33 }
 0x199   : > { %v1961_v24 = vsel %vm1141_vm3, %v6100_v23, %v1960_v49  ;;  %v1963_v29 = vsel %vm1141_vm3, %v1960_v49, %v6079_v2  ;;  %4145 = vset.pattern.permute.xlu1 %v6095_v16  ;;  %4146 = vset.pattern.permute.xlu2 %v6089_v42  ;;  %v2060_v49 = vshrl.u32 %v5391_v55, 16  ;;  %v2883_v23 = vmul.f32 %v2835_v1, %v4646_v51 }
 0x19a   : > { %v2003_v3 = vmul.f32 %v1961_v24, %v4756_v36  ;;  %v2004_v7 = vmul.f32 %v1963_v29, %v4779_v38  ;;  %1947 = vperm.xlu1 %4145, %v5475_v37   ;;  %2272 = vperm.xlu2 %4146, %v4995_v59   ;;  %v5479_v41 = vpop.f32.mrf.mxu3  ;;  %v5481_v16 = vpop.permute.xlu2 %1929  ;;  %v2884_v24 = vmul.f32 %v2837_v5, %v4664_v40 }
 0x19b   : > { %6101 = vst [vmem:[#allocation17_spill] sm:$0xff] %v5479_v41  ;;  %v5485_v43 = vpop.f32.mrf.mxu2  ;;  %v2062_v51 = vor.u32 %v2060_v49, %v5407_v45  ;;  %v2885_v40 = vmul.f32 %v2839_v56, %v4686_v61  ;;  %v2886_v5 = vmul.f32 %v2841_v62, %v4707_v53 }
 0x19c   : > { %v5487_v33 = vpack.c.bf16 %v2004_v7, %v2003_v3  ;;  %v6103_v7 = vrot.slane %v5398_v44, 1 }
 0x19e   : > { %v2064_v59 = vshll.u32 %v5487_v33, 16  ;;  %v2289_v9 = vsel %vm614_vm1, %v6103_v7, %v2288_v13 }
 0x19f   : > { %v5498_v29 = vpop.permute.xlu1 %2251  ;;  %v5500_v3 = vpop.f32.mrf.mxu0  ;;  %v2331_v49 = vmul.f32 %v2289_v9, %v4756_v36 }
 0x1a0   : > { %6102 = vst [vmem:[#allocation18_spill] sm:$0xff] %v5500_v3  ;;  %v6080_v55 = vrot.slane %v5498_v29, 1  ;;  %v5506_v2 = vpop.f32.mrf.mxu1  ;;  %v5509_v1 = vrot.slane %v2064_v59, 1  ;;  %v5534_v9 = vpop.permute.xlu0 %2586 }
 0x1a2   : > { %v2291_v44 = vsel %vm614_vm1, %v2288_v13, %v6080_v55  ;;  %4147 = vset.pattern.permute.xlu1 %v6089_v42  ;;  %4148 = vset.pattern.permute.xlu2 %v6093_v8  ;;  %v1377_v7 = vpop.f32.mrf.mxu3  ;;  %v2067_v45 = vsel %vm1233_vm4, %v2062_v51, %v5509_v1  ;;  %v2900_v13 = vpack.c.bf16 %v2884_v24, %v2883_v23 }
 0x1a3   : > { %v2332_v56 = vmul.f32 %v2291_v44, %v4779_v38  ;;  %2275 = vperm.xlu1 %4147, %v5475_v37   ;;  %v1411_v59 = vadd.f32 %v1377_v7, %v5287_v63  ;;  %1879 = vmatmul.bf16.gmra.mxu1 %v1770_v19  ;;  %v5526_v62 = vpop.permute.xlu2 %2257  ;;  %v5532_v51 = vpack.c.bf16 %v2886_v5, %v2885_v40 }
 0x1a4   : > { %2610 = vperm.xlu2 %4148, %v5260_v14   ;;  %v1083_v42 = vpop.f32.mrf.mxu2  ;;  %2182 = vmatmul.bf16.gmra.mxu2 %v2067_v45  ;;  %v2929_v63 = vshll.u32 %v2900_v13, 16  ;;  %v2635_v14 = vmul.f32 %v5425_v35, %v4686_v61  ;;  %v4174_v61 = vld [vmem:[%s6053_s1 + $0x70] sm:$0xff] }
 0x1a5   : > { %v2345_v55 = vpack.c.bf16 %v2332_v56, %v2331_v49  ;;  %v5530_v15 = vadd.f32 %v1083_v42, %v5436_v48  ;;  %v2934_v40 = vshll.u32 %v5532_v51, 16  ;;  %v2844_v49 = vrot.slane %v5350_v4, 7  ;;  %v3996_v4 = vld [vmem:[%s6059_s7 + $0x18] sm:$0xff] }
 0x1a6   : > { %v2931_v42 = vrot.slane %v2929_v63, 1  ;;  %3187 = vmatpush.bf16.msra.mxu2 %v3996_v4 }
 0x1a7   : > { %v1717_v44 = vpop.f32.mrf.mxu0  ;;  %v2395_v3 = vshrl.u32 %v2345_v55, 16  ;;  %v2398_v41 = vshll.u32 %v2345_v55, 16  ;;  %v2842_v55 = vrot.slane %v5431_v58, 7 }
 0x1a8   : > { %v5536_v19 = vpop.f32.mrf.mxu1  ;;  %v5538_v7 = vadd.f32 %v1717_v44, %v1411_v59  ;;  %v2583_v23 = vpop.permute.xlu1 %2582  ;;  %v6104_v44 = vrot.slane %v5265_v11, 7 }
 0x1a9   : > { %v2636_v24 = vmul.f32 %v2583_v23, %v4707_v53  ;;  %v2397_v48 = vrot.slane %v2395_v3, 3  ;;  %v2400_v45 = vrot.slane %v2398_v41, 4  ;;  %v2927_v41 = vshrl.u32 %v2900_v13, 16 }
 0x1aa   : > { %v5544_v5 = vpop.f32.mrf.mxu3  ;;  %v5563_v3 = vrot.slane %v2934_v40, 1  ;;  %v2843_v63 = vsel %vm1141_vm3, %v6104_v44, %v2842_v55  ;;  %v2845_v23 = vsel %vm1141_vm3, %v2842_v55, %v2844_v49  ;;  %v1056_v13 = vadd.f32 %v5184_v50, %v5110_v39 }
 0x1ab   : > { %v2650_v56 = vpack.c.bf16 %v2636_v24, %v2635_v14  ;;  %4150 = vset.pattern.permute.xlu1 %v6094_v54  ;;  %v5549_v59 = vor.u32 %v2400_v45, %v2397_v48  ;;  %v2932_v24 = vor.u32 %v2931_v42, %v2927_v41  ;;  %v1966_v48 = vrot.slane %v5481_v16, 7 }
 0x1ac   : > { %4151 = vset.pattern.permute.xlu2 %v6094_v54  ;;  %2830 = vperm.xlu1 %4150, %v4174_v61   ;;  %v5555_v53 = vpop.f32.mrf.mxu2  ;;  %v5557_v35 = vpop.permute.xlu2 %2812  ;;  %v2887_v11 = vmul.f32 %v2843_v63, %v4735_v20  ;;  %v1408_v16 = vadd.f32 %v5427_v28, %v1056_v13  ;;  %v6105_v39 = vrot.slane %v5387_v18, 7 }
 0x1ad   : > { %2833 = vperm.xlu2 %4151, %v5475_v37   ;;  %2735 = vmatmul.bf16.gmra.mxu0 %v2650_v56  ;;  %v2402_v58 = vsel %vm907_vm2, %v5439_v21, %v5549_v59  ;;  %v5565_v54 = vpop.permute.xlu0 %1935  ;;  %v2888_v56 = vmul.f32 %v2845_v23, %v4756_v36  ;;  %v2937_v55 = vsel %vm1233_vm4, %v2932_v24, %v5563_v3 }
 0x1ae   : > { %2522 = vmatmul.bf16.gmra.mxu3 %v2402_v58  ;;  %v1970_v18 = vrot.slane %v5565_v54, 7 }
 0x1af   : > { %v5573_v14 = vpop.f32.mrf.mxu0  ;;  %v5600_v28 = vpack.c.bf16 %v2888_v56, %v2887_v11 }
 0x1b0   : > { %v1845_v21 = vpop.f32.mrf.mxu1 }
 0x1b1   : > { %v5579_v45 = vadd.f32 %v1845_v21, %v5409_v25  ;;  %v1927_v40 = vpop.permute.xlu1 %1926  ;;  %v1748_v21 = vadd.f32 %v5433_v32, %v1408_v16  ;;  %v2846_v32 = vrot.slane %v5445_v52, 7 }
 0x1b2   : > { %v1964_v61 = vrot.slane %v1927_v40, 7  ;;  %v1382_v58 = vpop.f32.mrf.mxu3 }
 0x1b3   : > { %v1413_v42 = vadd.f32 %v1382_v58, %v5337_v0  ;;  %3058 = vmatmul.bf16.vlgmr.msra.gmra.mxu1 %v2937_v55 }
 0x1b4   : > { %v1965_v50 = vsel %vm1141_vm3, %v6105_v39, %v1964_v61  ;;  %v1967_v25 = vsel %vm1141_vm3, %v1964_v61, %v1966_v48  ;;  %4152 = vset.pattern.permute.xlu1 %v6093_v8  ;;  %v1088_v41 = vpop.f32.mrf.mxu2 }
 0x1b5   : > { %v2005_v44 = vmul.f32 %v1965_v50, %v4806_v30  ;;  %v2006_v63 = vmul.f32 %v1967_v25, %v4832_v57  ;;  %v5595_v23 = vadd.f32 %v1088_v41, %v5506_v2  ;;  %4153 = vset.pattern.permute.xlu2 %v6093_v8  ;;  %2618 = vperm.xlu1 %4152, %v5345_v27   ;;  %v1933_v0 = vpop.permute.xlu2 %1932  ;;  %v2068_v8 = vshrl.u32 %v5487_v33, 16  ;;  %v5609_v58 = vpop.permute.xlu0 %2809 }
 0x1b6   : > { %2622 = vperm.xlu2 %4153, %v5378_v12   ;;  %v1968_v24 = vrot.slane %v1933_v0, 7  ;;  %v2294_v27 = vrot.slane %v5526_v62, 1  ;;  %v2942_v33 = vshll.u32 %v5600_v28, 16  ;;  %v2848_v39 = vrot.slane %v5609_v58, 7 }
 0x1b7   : > { %v1722_v13 = vpop.f32.mrf.mxu0  ;;  %v5604_v40 = vpack.c.bf16 %v2006_v63, %v2005_v44  ;;  %v2938_v44 = vshrl.u32 %v5532_v51, 16  ;;  %v6106_v63 = vrot.slane %v5498_v29, 1 }
 0x1b8   : > { %v5606_v61 = vadd.f32 %v1722_v13, %v1413_v42  ;;  %v1847_v2 = vpop.f32.mrf.mxu1  ;;  %v1969_v11 = vsel %vm1141_vm3, %v1966_v48, %v1968_v24  ;;  %v1971_v55 = vsel %vm1141_vm3, %v1968_v24, %v1970_v18  ;;  %v2070_v48 = vor.u32 %v2068_v8, %v5509_v1 }
 0x1b9   : > { %v5613_v56 = vadd.f32 %v1847_v2, %v1748_v21  ;;  %v2072_v12 = vshll.u32 %v5604_v40, 16  ;;  %v2007_v41 = vmul.f32 %v1969_v11, %v4854_v10  ;;  %v2008_v52 = vmul.f32 %v1971_v55, %v4880_v17 }
 0x1ba   : > { %v2255_v42 = vpop.permute.xlu1 %2254  ;;  %v5620_v16 = vpop.f32.mrf.mxu3  ;;  %v2847_v1 = vsel %vm1141_vm3, %v2844_v49, %v2846_v32  ;;  %v2944_v2 = vrot.slane %v2942_v33, 1  ;;  %v2849_v8 = vsel %vm1141_vm3, %v2846_v32, %v2848_v39  ;;  %v2940_v55 = vor.u32 %v2938_v44, %v5563_v3 }
 0x1bb   : > { %v2292_v50 = vrot.slane %v2255_v42, 1  ;;  %v2074_v25 = vrot.slane %v2072_v12, 1  ;;  %v2889_v42 = vmul.f32 %v2847_v1, %v4779_v38  ;;  %v5656_v33 = vpack.c.bf16 %v2008_v52, %v2007_v41 }
 0x1bd   : > { %v2293_v0 = vsel %vm614_vm1, %v6106_v63, %v2292_v50  ;;  %v2295_v24 = vsel %vm614_vm1, %v2292_v50, %v2294_v27  ;;  %2630 = vperm.xlu1 %4152, %v5475_v37   ;;  %v2075_v21 = vsel %vm1233_vm4, %v2070_v48, %v2074_v25  ;;  %v4004_v37 = vld [vmem:[%s6058_s6 + $0x38] sm:$0xff]  ;;  %v2890_v50 = vmul.f32 %v2849_v8, %v4806_v30 }
 0x1be   : > { %v2333_v51 = vmul.f32 %v2293_v0, %v4806_v30  ;;  %v2334_v13 = vmul.f32 %v2295_v24, %v4832_v57  ;;  %2187 = vmatmul.bf16.gmra.mxu2 %v2075_v21  ;;  %v5641_v29 = vpop.permute.xlu2 %2263  ;;  %3304 = vmatpush.bf16.msra.mxu3 %v4004_v37  ;;  %v2945_v48 = vsel %vm1233_vm4, %v2940_v55, %v2944_v2  ;;  %v2080_v1 = vshll.u32 %v5656_v33, 16 }
 0x1bf   : > { %v5646_v11 = vpop.f32.mrf.mxu0  ;;  %v2637_v24 = vmul.f32 %v5534_v9, %v4735_v20 }
 0x1c0   : > { %v2346_v49 = vpack.c.bf16 %v2334_v13, %v2333_v51  ;;  %v1850_v12 = vpop.f32.mrf.mxu1  ;;  %v5668_v51 = vpack.c.bf16 %v2890_v50, %v2889_v42  ;;  %v6107_v50 = vld [vmem:[#allocation15_spill] sm:$0xff] }
 0x1c1   : > { %v5659_v32 = vadd.f32 %v1850_v12, %v5459_v47 }
 0x1c2   : > { %v2404_v63 = vshrl.u32 %v2346_v49, 16  ;;  %v2407_v0 = vshll.u32 %v2346_v49, 16  ;;  %v5682_v49 = vrot.slane %v2080_v1, 1  ;;  %v2950_v12 = vshll.u32 %v5668_v51, 16 }
 0x1c3   : > { %v1387_v21 = vpop.f32.mrf.mxu3  ;;  %3063 = vmatmul.bf16.gmra.mxu1 %v2945_v48  ;;  %v2591_v3 = vpop.permute.xlu1 %2590  ;;  %v1076_v48 = vadd.f32 %v5429_v34, %v6107_v50  ;;  %v4003_v34 = vld [vmem:[%s6058_s6 + $0x30] sm:$0xff]  ;;  %v2954_v62 = vshrl.u32 %v5668_v51, 16 }
 0x1c4   : > { %v1415_v41 = vadd.f32 %v1387_v21, %v5404_v26  ;;  %v2638_v44 = vmul.f32 %v2591_v3, %v4756_v36  ;;  %v2406_v47 = vrot.slane %v2404_v63, 3  ;;  %v2409_v52 = vrot.slane %v2407_v0, 4  ;;  %v5689_v0 = vpop.permute.xlu0 %2818  ;;  %3305 = vmatpush.bf16.msra.mxu3 %v4003_v34 }
 0x1c5   : > { %v2076_v26 = vshrl.u32 %v5604_v40, 16  ;;  %v2946_v3 = vshrl.u32 %v5600_v28, 16 }
 0x1c6   : > { %v2651_v13 = vpack.c.bf16 %v2638_v44, %v2637_v24  ;;  %v5670_v8 = vor.u32 %v2409_v52, %v2406_v47  ;;  %v2850_v24 = vrot.slane %v5557_v35, 7 }
 0x1c7   : > { %v5672_v4 = vpop.permute.xlu2 %2598  ;;  %v1727_v37 = vpop.f32.mrf.mxu0  ;;  %v2078_v42 = vor.u32 %v2076_v26, %v2074_v25  ;;  %v2948_v1 = vor.u32 %v2946_v3, %v2944_v2  ;;  %v2298_v2 = vrot.slane %v5641_v29, 1 }
 0x1c8   : > { %v5674_v20 = vadd.f32 %v1727_v37, %v1415_v41  ;;  %v5676_v9 = vpop.f32.mrf.mxu1  ;;  %2740 = vmatmul.bf16.gmra.mxu0 %v2651_v13  ;;  %v2411_v36 = vsel %vm907_vm2, %v5549_v59, %v5670_v8  ;;  %v2952_v41 = vrot.slane %v2950_v12, 1  ;;  %v2851_v28 = vsel %vm1141_vm3, %v2848_v39, %v2850_v24 }
 0x1c9   : > { %2527 = vmatmul.bf16.gmra.mxu3 %v2411_v36  ;;  %v2083_v40 = vsel %vm1233_vm4, %v2078_v42, %v5682_v49  ;;  %v2891_v12 = vmul.f32 %v2851_v28, %v4832_v57  ;;  %v2640_v51 = vmul.f32 %v5672_v4, %v4806_v30 }
 0x1ca   : > { %v2953_v36 = vsel %vm1233_vm4, %v2948_v1, %v2952_v41 }
 0x1cb   : > { %v1389_v55 = vpop.f32.mrf.mxu3 }
 0x1cc   : > { %v5687_v63 = vpop.permute.xlu1 %2815  ;;  %v1416_v21 = vadd.f32 %v1389_v55, %v1076_v48  ;;  %v5719_v50 = vpop.permute.xlu0 %2269 }
 0x1cd   : > { %v2852_v59 = vrot.slane %v5687_v63, 7 }
 0x1ce   : > { %2192 = vmatmul.bf16.gmra.mxu2 %v2083_v40 }
 0x1cf   : > { %v2853_v25 = vsel %vm1141_vm3, %v2850_v24, %v2852_v59  ;;  %v1729_v44 = vpop.f32.mrf.mxu0  ;;  %v2302_v24 = vrot.slane %v5719_v50, 1 }
 0x1d0   : > { %v5702_v35 = vadd.f32 %v1729_v44, %v1416_v21  ;;  %v1855_v47 = vpop.f32.mrf.mxu1  ;;  %v5704_v52 = vpop.permute.xlu2 %1938  ;;  %v2892_v37 = vmul.f32 %v2853_v25, %v4854_v10 }
 0x1d1   : > { %v5710_v13 = vadd.f32 %v1855_v47, %v5538_v7 }
 0x1d2   : > { %v5717_v42 = vpack.c.bf16 %v2892_v37, %v2891_v12  ;;  %v2956_v12 = vor.u32 %v2954_v62, %v2952_v41 }
 0x1d3   : > { %v1392_v26 = vpop.f32.mrf.mxu3  ;;  %3068 = vmatmul.bf16.gmra.mxu1 %v2953_v36  ;;  %v3995_v36 = vld [vmem:[%s6059_s7 + $0x10] sm:$0xff] }
 0x1d4   : > { %v1417_v55 = vadd.f32 %v1392_v26, %v5453_v60  ;;  %v2958_v44 = vshll.u32 %v5717_v42, 16  ;;  %v4002_v26 = vld [vmem:[%s6058_s6 + $0x28] sm:$0xff]  ;;  %3188 = vmatpush.bf16.msra.mxu2 %v3995_v36 }
 0x1d5   : > { %3306 = vmatpush.bf16.msra.mxu3 %v4002_v26 }
 0x1d6   : > { %v2261_v58 = vpop.permute.xlu1 %2260 }
 0x1d7   : > { %v2296_v39 = vrot.slane %v2261_v58, 1 }
 0x1d8   : > { %v1732_v7 = vpop.f32.mrf.mxu0  ;;  %v5721_v48 = vpop.f32.mrf.mxu1 }
 0x1d9   : > { %v2297_v40 = vsel %vm614_vm1, %v2294_v27, %v2296_v39  ;;  %v2299_v21 = vsel %vm614_vm1, %v2296_v39, %v2298_v2  ;;  %v5728_v60 = vadd.f32 %v1732_v7, %v1417_v55  ;;  %v2267_v29 = vpop.permute.xlu2 %2266  ;;  %v1081_v27 = vadd.f32 %v5485_v43, %v5417_v31  ;;  %v6108_v31 = vld [vmem:[#allocation8_spill] sm:$0xff] }
 0x1da   : > { %v2335_v3 = vmul.f32 %v2297_v40, %v4854_v10  ;;  %v2336_v34 = vmul.f32 %v2299_v21, %v4880_v17  ;;  %v2300_v25 = vrot.slane %v2267_v29, 1  ;;  %v2960_v55 = vrot.slane %v2958_v44, 1  ;;  %v6109_v40 = vld [vmem:[#allocation9_spill] sm:$0xff] }
 0x1db   : > { %v1394_v47 = vpop.f32.mrf.mxu3 }
 0x1dc   : > { %v2347_v1 = vpack.c.bf16 %v2336_v34, %v2335_v3  ;;  %v2301_v28 = vsel %vm614_vm1, %v2298_v2, %v2300_v25  ;;  %v2303_v37 = vsel %vm614_vm1, %v2300_v25, %v2302_v24  ;;  %v1418_v39 = vadd.f32 %v1394_v47, %v1081_v27 }
 0x1dd   : > { %v2337_v43 = vmul.f32 %v2301_v28, %v6108_v31  ;;  %v2338_v21 = vmul.f32 %v2303_v37, %v6109_v40  ;;  %v2961_v4 = vsel %vm1233_vm4, %v2956_v12, %v2960_v55  ;;  %v2854_v37 = vrot.slane %v5689_v0, 7 }
 0x1de   : > { %v2413_v2 = vshrl.u32 %v2347_v1, 16  ;;  %v2416_v58 = vshll.u32 %v2347_v1, 16 }
 0x1df   : > { %v2595_v7 = vpop.permute.xlu1 %2594  ;;  %v2348_v62 = vpack.c.bf16 %v2338_v21, %v2337_v43  ;;  %v2855_v12 = vsel %vm1141_vm3, %v2852_v59, %v2854_v37  ;;  %v1086_v59 = vadd.f32 %v5555_v53, %v5457_v6 }
 0x1e0   : > { %v2639_v29 = vmul.f32 %v2595_v7, %v4779_v38  ;;  %v1734_v3 = vpop.f32.mrf.mxu0  ;;  %v1860_v34 = vpop.f32.mrf.mxu1  ;;  %v2415_v25 = vrot.slane %v2413_v2, 3  ;;  %v2418_v41 = vrot.slane %v2416_v58, 4 }
 0x1e1   : > { %v5751_v44 = vadd.f32 %v1734_v3, %v1418_v39  ;;  %v5754_v1 = vadd.f32 %v1860_v34, %v5606_v61  ;;  %v2422_v26 = vshrl.u32 %v2348_v62, 16  ;;  %v2425_v2 = vshll.u32 %v2348_v62, 16 }
 0x1e2   : > { %v2652_v30 = vpack.c.bf16 %v2640_v51, %v2639_v29  ;;  %v2419_v47 = vor.u32 %v2418_v41, %v2415_v25  ;;  %v2607_v43 = vpop.permute.xlu2 %2606  ;;  %v2893_v39 = vmul.f32 %v2855_v12, %v4880_v17  ;;  %v1972_v29 = vrot.slane %v5704_v52, 7 }
 0x1e3   : > { %v1397_v28 = vpop.f32.mrf.mxu3  ;;  %3073 = vmatmul.bf16.gmra.mxu1 %v2961_v4  ;;  %v2424_v21 = vrot.slane %v2422_v26, 3  ;;  %v2427_v63 = vrot.slane %v2425_v2, 4 }
 0x1e4   : > { %v1419_v27 = vadd.f32 %v1397_v28, %v5530_v15  ;;  %2745 = vmatmul.bf16.gmra.mxu0 %v2652_v30  ;;  %v2420_v38 = vsel %vm907_vm2, %v5670_v8, %v2419_v47  ;;  %v2962_v30 = vshrl.u32 %v5717_v42, 16  ;;  %v1973_v28 = vsel %vm1141_vm3, %v1970_v18, %v1972_v29 }
 0x1e5   : > { %2532 = vmatmul.bf16.gmra.mxu3 %v2420_v38  ;;  %v5781_v41 = vor.u32 %v2427_v63, %v2424_v21  ;;  %v2009_v12 = vmul.f32 %v1973_v28, %v6108_v31  ;;  %v1090_v21 = vpop.f32.mrf.mxu2 }
 0x1e7   : > { %v2429_v26 = vsel %vm907_vm2, %v2419_v47, %v5781_v41 }
 0x1e8   : > { %v5761_v36 = vpop.permute.xlu1 %2821  ;;  %v1737_v61 = vpop.f32.mrf.mxu0 }
 0x1e9   : > { %v2856_v58 = vrot.slane %v5761_v36, 7  ;;  %v5767_v51 = vadd.f32 %v1737_v61, %v1419_v27  ;;  %v5769_v15 = vpop.f32.mrf.mxu1 }
 0x1eb   : > { %v2857_v8 = vsel %vm1141_vm3, %v2854_v37, %v2856_v58  ;;  %v1399_v0 = vpop.f32.mrf.mxu3  ;;  %v5792_v53 = vpop.permute.xlu2 %2827  ;;  %v2964_v37 = vor.u32 %v2962_v30, %v2960_v55  ;;  %v4001_v55 = vld [vmem:[%s6058_s6 + $0x20] sm:$0xff] }
 0x1ec   : > { %v2894_v7 = vmul.f32 %v2857_v8, %v6108_v31  ;;  %v1420_v34 = vadd.f32 %v1399_v0, %v1086_v59  ;;  %3307 = vmatpush.bf16.msra.mxu3 %v4001_v55 }
 0x1ee   : > { %v5779_v3 = vpack.c.bf16 %v2894_v7, %v2893_v39  ;;  %v2084_v39 = vshrl.u32 %v5656_v33, 16 }
 0x1f0   : > { %v1739_v25 = vpop.f32.mrf.mxu0  ;;  %v2966_v4 = vshll.u32 %v5779_v3, 16 }
 0x1f1   : > { %v5788_v62 = vadd.f32 %v1739_v25, %v1420_v34  ;;  %v1865_v27 = vpop.f32.mrf.mxu1  ;;  %v5790_v6 = vpop.permute.xlu1 %1941  ;;  %v2086_v25 = vor.u32 %v2084_v39, %v5682_v49 }
 0x1f2   : > { %v5795_v52 = vadd.f32 %v1865_v27, %v5674_v20  ;;  %v1974_v38 = vrot.slane %v5790_v6, 7  ;;  %v5798_v42 = vrot.slane %v2966_v4, 1  ;;  %v1091_v27 = vadd.f32 %v1090_v21, %v5536_v19 }
 0x1f3   : > { %v1402_v61 = vpop.f32.mrf.mxu3 }
 0x1f4   : > { %v1975_v54 = vsel %vm1141_vm3, %v1972_v29, %v1974_v38  ;;  %v1421_v18 = vadd.f32 %v1402_v61, %v5595_v23  ;;  %v2969_v2 = vsel %vm1233_vm4, %v2964_v37, %v5798_v42  ;;  %v2642_v29 = vmul.f32 %v2607_v43, %v4854_v10  ;;  %v2273_v4 = vpop.permute.xlu2 %2272  ;;  %v1945_v37 = vpop.permute.xlu0 %1944 }
 0x1f5   : > { %v2010_v20 = vmul.f32 %v1975_v54, %v6109_v40  ;;  %2537 = vmatmul.bf16.gmra.mxu3 %v2429_v26  ;;  %3078 = vmatmul.bf16.gmra.mxu1 %v2969_v2  ;;  %v2860_v61 = vrot.slane %v5792_v53, 7 }
 0x1f7   : > { %v5811_v8 = vpack.c.bf16 %v2010_v20, %v2009_v12 }
 0x1f8   : > { %v1742_v23 = vpop.f32.mrf.mxu0 }
 0x1f9   : > { %v5813_v0 = vadd.f32 %v1742_v23, %v1421_v18  ;;  %v1867_v47 = vpop.f32.mrf.mxu1  ;;  %v2088_v7 = vshll.u32 %v5811_v8, 16 }
 0x1fa   : > { %v5818_v63 = vadd.f32 %v1867_v47, %v5702_v35  ;;  %v2603_v59 = vpop.permute.xlu1 %2602  ;;  %v3994_v35 = vld [vmem:[%s6059_s7 + $0x8] sm:$0xff]  ;;  %v1976_v47 = vrot.slane %v1945_v37, 7 }
 0x1fb   : > { %v2641_v34 = vmul.f32 %v2603_v59, %v4832_v57  ;;  %v2090_v30 = vrot.slane %v2088_v7, 1  ;;  %v1404_v28 = vpop.f32.mrf.mxu3  ;;  %v4000_v57 = vld [vmem:[%s6058_s6 + $0x18] sm:$0xff]  ;;  %3189 = vmatpush.bf16.msra.mxu2 %v3994_v35  ;;  %v2304_v35 = vrot.slane %v2273_v4, 1 }
 0x1fc   : > { %v1422_v10 = vadd.f32 %v1404_v28, %v1091_v27  ;;  %3308 = vmatpush.bf16.msra.mxu3 %v4000_v57  ;;  %v2615_v39 = vpop.permute.xlu0 %2614  ;;  %v3999_v28 = vld [vmem:[%s6058_s6 + $0x10] sm:$0xff] }
 0x1fd   : > { %v2653_v6 = vpack.c.bf16 %v2642_v29, %v2641_v34  ;;  %v2091_v33 = vsel %vm1233_vm4, %v2086_v25, %v2090_v30  ;;  %v2644_v36 = vmul.f32 %v2615_v39, %v6108_v31  ;;  %v1977_v34 = vsel %vm1141_vm3, %v1974_v38, %v1976_v47 }
 0x1fe   : > { %2197 = vmatmul.bf16.gmra.mxu2 %v2091_v33  ;;  %v2611_v2 = vpop.permute.xlu2 %2610 }
 0x1ff   : > { %2750 = vmatmul.bf16.gmra.mxu0 %v2653_v6 }
 0x200   : > { %v1744_v49 = vpop.f32.mrf.mxu0  ;;  %3309 = vmatpush.bf16.msra.mxu3 %v3999_v28 }
 0x201   : > { %v5831_v43 = vadd.f32 %v1744_v49, %v1422_v10  ;;  %v1870_v19 = vpop.f32.mrf.mxu1 }
 0x202   : > { %v5835_v54 = vadd.f32 %v1870_v19, %v5728_v60  ;;  %v2643_v60 = vmul.f32 %v2611_v2, %v4880_v17 }
 0x203   : > { %v2825_v18 = vpop.permute.xlu1 %2824 }
 0x204   : > { %v2858_v26 = vrot.slane %v2825_v18, 7  ;;  %v2654_v17 = vpack.c.bf16 %v2644_v36, %v2643_v60  ;;  %v2305_v18 = vsel %vm614_vm1, %v2302_v24, %v2304_v35  ;;  %v3998_v36 = vld [vmem:[%s6058_s6 + $0x8] sm:$0xff] }
 0x205   : > { %v2339_v4 = vmul.f32 %v2305_v18, %v5006_v46  ;;  %3310 = vmatpush.bf16.msra.mxu3 %v3998_v36 }
 0x206   : > { %v2859_v12 = vsel %vm1141_vm3, %v2856_v58, %v2858_v26  ;;  %v2861_v20 = vsel %vm1141_vm3, %v2858_v26, %v2860_v61  ;;  %v2970_v58 = vshrl.u32 %v5779_v3, 16  ;;  %v2011_v3 = vmul.f32 %v1977_v34, %v5006_v46 }
 0x207   : > { %v2895_v55 = vmul.f32 %v2859_v12, %v6109_v40  ;;  %v2896_v23 = vmul.f32 %v2861_v20, %v5006_v46  ;;  %v2834_v50 = vpop.permute.xlu2 %2833 }
 0x208   : > { %v2972_v6 = vor.u32 %v2970_v58, %v5798_v42  ;;  %v2092_v42 = vshrl.u32 %v5811_v8, 16  ;;  %v2864_v24 = vrot.slane %v2834_v50, 7 }
 0x209   : > { %v5846_v7 = vpack.c.bf16 %v2896_v23, %v2895_v55  ;;  %v1872_v21 = vpop.f32.mrf.mxu1 }
 0x20a   : > { %v5849_v59 = vadd.f32 %v1872_v21, %v5751_v44  ;;  %v2094_v2 = vor.u32 %v2092_v42, %v2090_v30 }
 0x20b   : > { %v2974_v29 = vshll.u32 %v5846_v7, 16 }
 0x20c   : > { %v1948_v25 = vpop.permute.xlu1 %1947 }
 0x20d   : > { %v1978_v27 = vrot.slane %v1948_v25, 7  ;;  %v5859_v33 = vrot.slane %v2974_v29, 1 }
 0x20f   : > { %v1979_v31 = vsel %vm1141_vm3, %v1976_v47, %v1978_v27  ;;  %2755 = vmatmul.bf16.gmra.mxu0 %v2654_v17  ;;  %v2977_v44 = vsel %vm1233_vm4, %v2972_v6, %v5859_v33  ;;  %v2013_v23 = vmul.f32 0.0, %v1978_v27 }
 0x210   : > { %v2012_v38 = vmul.f32 %v1979_v31, %v5252_v22  ;;  %3083 = vmatmul.bf16.gmra.mxu1 %v2977_v44 }
 0x211   : > { %v1875_v37 = vpop.f32.mrf.mxu1  ;;  %v2022_v60 = vpack.c.bf16 %v2013_v23, %v2013_v23  ;;  %v2731_v23 = vpop.f32.mrf.mxu0 }
 0x212   : > { %v2021_v57 = vpack.c.bf16 %v2012_v38, %v2011_v3  ;;  %v5867_v10 = vadd.f32 %v1875_v37, %v5767_v51  ;;  %v3997_v3 = vld [vmem:[%s6058_s6] sm:$0xff] }
 0x213   : > { %v2104_v17 = vshll.u32 %v2022_v60, 16  ;;  %3311 = vmatpush.bf16.msra.mxu3 %v3997_v3 }
 0x214   : > { %v2096_v49 = vshll.u32 %v2021_v57, 16  ;;  %v2100_v42 = vshrl.u32 %v2021_v57, 16 }
 0x215   : > { %v2276_v19 = vpop.permute.xlu1 %2275 }
 0x216   : > { %v2306_v26 = vrot.slane %v2276_v19, 1  ;;  %v2098_v12 = vrot.slane %v2096_v49, 1  ;;  %v2173_v49 = vpop.f32.mrf.mxu2 }
 0x218   : > { %v2307_v20 = vsel %vm614_vm1, %v2304_v35, %v2306_v26  ;;  %v2099_v55 = vsel %vm1233_vm4, %v2094_v2, %v2098_v12  ;;  %v2341_v29 = vmul.f32 0.0, %v2306_v26  ;;  %v2102_v18 = vor.u32 %v2100_v42, %v2098_v12  ;;  %v2513_v26 = vpop.f32.mrf.mxu3  ;;  %v2623_v2 = vpop.permute.xlu2 %2622 }
 0x219   : > { %v2340_v51 = vmul.f32 %v2307_v20, %v5252_v22  ;;  %v1877_v47 = vpop.f32.mrf.mxu1  ;;  %2202 = vmatmul.bf16.gmra.mxu2 %v2099_v55  ;;  %v2978_v20 = vshrl.u32 %v5846_v7, 16  ;;  %v2106_v55 = vrot.slane %v2104_v17, 1  ;;  %v2646_v50 = vmul.f32 %v2623_v2, %v5006_v46 }
 0x21a   : > { %v5878_v8 = vadd.f32 %v1877_v47, %v5788_v62  ;;  %v3993_v62 = vld [vmem:[%s6059_s7] sm:$0xff]  ;;  %v2350_v53 = vpack.c.bf16 %v2341_v29, %v2341_v29  ;;  %v2899_v29 = vmul.f32 0.0, %v2864_v24 }
 0x21b   : > { %v2349_v39 = vpack.c.bf16 %v2340_v51, %v2339_v4  ;;  %3190 = vmatpush.bf16.msra.mxu2 %v3993_v62  ;;  %v2980_v47 = vor.u32 %v2978_v20, %v5859_v33 }
 0x21c   : > { %v2443_v51 = vshll.u32 %v2350_v53, 16 }
 0x21d   : > { %v2431_v30 = vshrl.u32 %v2349_v39, 16  ;;  %v2434_v21 = vshll.u32 %v2349_v39, 16  ;;  %v2107_v39 = vsel %vm1233_vm4, %v2102_v18, %v2106_v55  ;;  %v4175_v55 = vld [vmem:[%s4457_s14] sm:$0xff] }
 0x21e   : > { %v2831_v58 = vpop.permute.xlu1 %2830  ;;  %v2175_v33 = vpop.f32.mrf.mxu2 }
 0x21f   : > { %v2862_v34 = vrot.slane %v2831_v58, 7  ;;  %v2433_v25 = vrot.slane %v2431_v30, 3  ;;  %v2436_v28 = vrot.slane %v2434_v21, 4  ;;  %v2445_v58 = vrot.slane %v2443_v51, 4  ;;  %v6110_v51 = vld [vmem:[#allocation10_spill] sm:$0xff] }
 0x220   : > { %v2515_v46 = vpop.f32.mrf.mxu3 }
 0x221   : > { %v2863_v27 = vsel %vm1141_vm3, %v2860_v61, %v2862_v34  ;;  %v2865_v6 = vsel %vm1141_vm3, %v2862_v34, %v2864_v24  ;;  %v1880_v31 = vpop.f32.mrf.mxu1  ;;  %v2437_v44 = vor.u32 %v2436_v28, %v2433_v25  ;;  %v2908_v25 = vpack.c.bf16 %v2899_v29, %v2899_v29  ;;  %v2733_v28 = vpop.f32.mrf.mxu0 }
 0x222   : > { %v2897_v38 = vmul.f32 %v2863_v27, %v5252_v22  ;;  %v2898_v37 = vmul.f32 0.0, %v2865_v6  ;;  %v5895_v35 = vadd.f32 %v1880_v31, %v5813_v0  ;;  %v2440_v0 = vshrl.u32 %v2350_v53, 16 }
 0x223   : > { %v2438_v61 = vsel %vm907_vm2, %v5781_v41, %v2437_v44  ;;  %v2214_v6 = vadd.f32 %v2175_v33, %v5613_v56  ;;  %v2990_v31 = vshll.u32 %v2908_v25, 16 }
 0x224   : > { %v2907_v19 = vpack.c.bf16 %v2898_v37, %v2897_v38  ;;  %2542 = vmatmul.bf16.gmra.mxu3 %v2438_v61  ;;  %v2442_v36 = vrot.slane %v2440_v0, 3  ;;  %v2627_v38 = vpop.permute.xlu0 %2626 }
 0x225   : > { %v2554_v42 = vadd.f32 %v2515_v46, %v2214_v6  ;;  %v2992_v56 = vrot.slane %v2990_v31, 1 }
 0x226   : > { %v2982_v4 = vshll.u32 %v2907_v19, 16  ;;  %v2446_v34 = vor.u32 %v2445_v58, %v2442_v36  ;;  %v2986_v24 = vshrl.u32 %v2907_v19, 16  ;;  %v2178_v37 = vpop.f32.mrf.mxu2 }
 0x227   : > { %v2619_v57 = vpop.permute.xlu1 %2618  ;;  %v2215_v36 = vadd.f32 %v2178_v37, %v5659_v32  ;;  %v6114_v37 = vld [vmem:[#allocation11_spill] sm:$0xff] }
 0x228   : > { %v2645_v41 = vmul.f32 %v2619_v57, %v6109_v40  ;;  %v2984_v60 = vrot.slane %v2982_v4, 1  ;;  %v2213_v40 = vadd.f32 %v2173_v49, %v5579_v45  ;;  %v5914_v45 = vld [vmem:[%s6057_s5] ss:$0 sm:$0xff]  ;;  %v2518_v18 = vpop.f32.mrf.mxu3 }
 0x229   : > { %v1882_v12 = vpop.f32.mrf.mxu1  ;;  %2207 = vmatmul.bf16.gmra.mxu2 %v2107_v39  ;;  %v6111_v57 = vld [vmem:[#allocation12_spill] sm:$0xff] }
 0x22a   : > { %v2655_v30 = vpack.c.bf16 %v2646_v50, %v2645_v41  ;;  %v5905_v7 = vadd.f32 %v1882_v12, %v5831_v43  ;;  %v2985_v21 = vsel %vm1233_vm4, %v2980_v47, %v2984_v60  ;;  %v2553_v17 = vadd.f32 %v2513_v26, %v2213_v40  ;;  %v2736_v2 = vpop.f32.mrf.mxu0 }
 0x22b   : > { %3088 = vmatmul.bf16.gmra.mxu1 %v2985_v21  ;;  %v2447_v43 = vsel %vm907_vm2, %v2437_v44, %v2446_v34  ;;  %v2988_v49 = vor.u32 %v2986_v24, %v2984_v60  ;;  %v2647_v44 = vmul.f32 %v2627_v38, %v5252_v22  ;;  %v2772_v26 = vadd.f32 %v2733_v28, %v2554_v42  ;;  %v6112_v22 = vld [vmem:[#allocation17_spill] sm:$0xff] }
 0x22c   : > { %2760 = vmatmul.bf16.gmra.mxu0 %v2655_v30  ;;  %v2771_v3 = vadd.f32 %v2731_v23, %v2553_v17  ;;  %v1061_v47 = vadd.f32 %v6111_v57, %v6110_v51  ;;  %v6113_v30 = vld [vmem:[#allocation18_spill] sm:$0xff]  ;;  %v2555_v34 = vadd.f32 %v2518_v18, %v2215_v36 }
 0x22d   : > { %v2993_v0 = vsel %vm1233_vm4, %v2988_v49, %v2992_v56 }
 0x22e   : > { %v1410_v41 = vadd.f32 %v6112_v22, %v1061_v47  ;;  %v2180_v12 = vpop.f32.mrf.mxu2  ;;  %v2773_v28 = vadd.f32 %v2736_v2, %v2555_v34 }
 0x22f   : > { %v2631_v27 = vpop.permute.xlu1 %2630 }
 0x230   : > { %v2648_v53 = vmul.f32 0.0, %v2631_v27  ;;  %v1750_v21 = vadd.f32 %v6113_v30, %v1410_v41  ;;  %v2520_v29 = vpop.f32.mrf.mxu3 }
 0x231   : > { %v3059_v62 = vpop.f32.mrf.mxu1 }
 0x232   : > { %v3099_v61 = vadd.f32 %v3059_v62, %v2771_v3  ;;  %v2656_v19 = vpack.c.bf16 %v2648_v53, %v2647_v44  ;;  %v1888_v46 = vadd.f32 %v5676_v9, %v1750_v21  ;;  %v2738_v40 = vpop.f32.mrf.mxu0  ;;  %v4176_v3 = vld [vmem:[%s4457_s14 + $0x8] sm:$0xff]  ;;  %v6115_v9 = vld [vmem:[#allocation14_spill] sm:$0xff] }
 0x233   : > { %v1066_v42 = vadd.f32 %v6115_v9, %v6114_v37 }
 0x234   : > { %2547 = vmatmul.bf16.gmra.mxu3 %v2447_v43  ;;  %v3119_v4 = vadd.f32 %v5914_v45, %v3099_v61  ;;  %v2216_v25 = vadd.f32 %v2180_v12, %v1888_v46  ;;  %v6117_v12 = vld [vmem:[#allocation16_spill] sm:$0xff] }
 0x235   : > { %v1412_v61 = vadd.f32 %v5544_v5, %v1066_v42 }
 0x236   : > { %v3135_v39 = vmax.f32 %v3119_v4, 0.0  ;;  %v2556_v62 = vadd.f32 %v2520_v29, %v2216_v25  ;;  %v2183_v27 = vpop.f32.mrf.mxu2 }
 0x237   : > { %v1752_v44 = vadd.f32 %v5573_v14, %v1412_v61  ;;  %v2217_v56 = vadd.f32 %v2183_v27, %v5710_v13  ;;  %v4177_v14 = vld [vmem:[%s4457_s14 + $0x10] sm:$0xff]  ;;  %v4179_v61 = vld [vmem:[%s4457_s14 + $0x20] sm:$0xff] }
 0x238   : > { %v2774_v43 = vadd.f32 %v2738_v40, %v2556_v62  ;;  %v2523_v6 = vpop.f32.mrf.mxu3 }
 0x239   : > { %v3061_v20 = vpop.f32.mrf.mxu1  ;;  %3864 = vmatmul.msk.bf16.vlgmr.msra.gmra.mxu2 %vm444_vm0, %v4175_v55  ;;  %v1890_v55 = vadd.f32 %v5721_v48, %v1752_v44 }
 0x23a   : > { %v3100_v23 = vadd.f32 %v3061_v20, %v2772_v26 }
 0x23b   : > { %3093 = vmatmul.bf16.gmra.mxu1 %v2993_v0 }
 0x23c   : > { %v3120_v50 = vadd.f32 %v5914_v45, %v3100_v23  ;;  %2765 = vmatmul.bf16.gmra.mxu0 %v2656_v19  ;;  %v2557_v19 = vadd.f32 %v2523_v6, %v2217_v56 }
 0x23e   : > { %v3136_v60 = vmax.f32 %v3120_v50, 0.0  ;;  %v2185_v2 = vpop.f32.mrf.mxu2 }
 0x23f   : > { %v2218_v23 = vadd.f32 %v2185_v2, %v1890_v55 }
 0x240   : > { %v3232_v58 = vpack.c.bf16 %v3136_v60, %v3135_v39  ;;  %v2525_v4 = vpop.f32.mrf.mxu3  ;;  %v6116_v60 = vld [vmem:[#allocation13_spill] sm:$0xff] }
 0x241   : > { %v3064_v33 = vpop.f32.mrf.mxu1  ;;  %v2558_v57 = vadd.f32 %v2525_v4, %v2218_v23  ;;  %v1071_v30 = vadd.f32 %v6117_v12, %v6116_v60 }
 0x242   : > { %v3101_v17 = vadd.f32 %v3064_v33, %v2773_v28 }
 0x244   : > { %3312 = vmatmul.bf16.vlgmr.msra.gmra.mxu3 %v3232_v58  ;;  %v3121_v32 = vadd.f32 %v5914_v45, %v3101_v17  ;;  %v1414_v58 = vadd.f32 %v5620_v16, %v1071_v30 }
 0x245   : > { %v2741_v38 = vpop.f32.mrf.mxu0 }
 0x246   : > { %v3137_v49 = vmax.f32 %v3121_v32, 0.0  ;;  %v2775_v0 = vadd.f32 %v2741_v38, %v2557_v19  ;;  %v2188_v50 = vpop.f32.mrf.mxu2  ;;  %v1754_v40 = vadd.f32 %v5646_v11, %v1414_v58 }
 0x247   : > { %v2219_v29 = vadd.f32 %v2188_v50, %v5754_v1 }
 0x248   : > { %v1892_v62 = vadd.f32 %v5769_v15, %v1754_v40 }
 0x249   : > { %v3066_v31 = vpop.f32.mrf.mxu1  ;;  %3865 = vmatmul.msk.bf16.gmra.mxu2 %vm444_vm0, %v4176_v3  ;;  %v4178_v3 = vld [vmem:[%s4457_s14 + $0x18] sm:$0xff] }
 0x24a   : > { %v3102_v24 = vadd.f32 %v3066_v31, %v2774_v43 }
 0x24c   : > { %v3122_v53 = vadd.f32 %v5914_v45, %v3102_v24  ;;  %v2528_v39 = vpop.f32.mrf.mxu3 }
 0x24d   : > { %v2743_v51 = vpop.f32.mrf.mxu0  ;;  %v2559_v25 = vadd.f32 %v2528_v39, %v2219_v29 }
 0x24e   : > { %v3138_v18 = vmax.f32 %v3122_v53, 0.0  ;;  %v2776_v47 = vadd.f32 %v2743_v51, %v2558_v57  ;;  %v2190_v28 = vpop.f32.mrf.mxu2 }
 0x24f   : > { %v2220_v43 = vadd.f32 %v2190_v28, %v1892_v62  ;;  %v4181_v28 = vld [vmem:[%s4457_s14 + $0x30] sm:$0xff] }
 0x250   : > { %v3233_v26 = vpack.c.bf16 %v3138_v18, %v3137_v49 }
 0x251   : > { %v3069_v20 = vpop.f32.mrf.mxu1 }
 0x252   : > { %v3103_v5 = vadd.f32 %v3069_v20, %v2775_v0 }
 0x254   : > { %3317 = vmatmul.bf16.gmra.mxu3 %v3233_v26  ;;  %v3123_v13 = vadd.f32 %v5914_v45, %v3103_v5  ;;  %v2530_v27 = vpop.f32.mrf.mxu3 }
 0x255   : > { %v2560_v6 = vadd.f32 %v2530_v27, %v2220_v43 }
 0x256   : > { %v3139_v21 = vmax.f32 %v3123_v13, 0.0  ;;  %v2193_v37 = vpop.f32.mrf.mxu2 }
 0x257   : > { %v2221_v18 = vadd.f32 %v2193_v37, %v5795_v52 }
 0x259   : > { %v3071_v22 = vpop.f32.mrf.mxu1  ;;  %3866 = vmatmul.msk.bf16.gmra.mxu2 %vm444_vm0, %v4177_v14  ;;  %v4180_v14 = vld [vmem:[%s4457_s14 + $0x28] sm:$0xff] }
 0x25a   : > { %v3104_v41 = vadd.f32 %v3071_v22, %v2776_v47 }
 0x25c   : > { %v3124_v48 = vadd.f32 %v5914_v45, %v3104_v41 }
 0x25e   : > { %v3140_v36 = vmax.f32 %v3124_v48, 0.0  ;;  %v2195_v49 = vpop.f32.mrf.mxu2 }
 0x25f   : > { %v2222_v55 = vadd.f32 %v2195_v49, %v5818_v63 }
 0x260   : > { %v3234_v33 = vpack.c.bf16 %v3140_v36, %v3139_v21 }
 0x261   : > { %v3074_v46 = vpop.f32.mrf.mxu1  ;;  %v2746_v34 = vpop.f32.mrf.mxu0 }
 0x262   : > { %v2777_v17 = vadd.f32 %v2746_v34, %v2559_v25 }
 0x264   : > { %3322 = vmatmul.bf16.gmra.mxu3 %v3234_v33  ;;  %v3105_v31 = vadd.f32 %v3074_v46, %v2777_v17 }
 0x266   : > { %v3125_v24 = vadd.f32 %v5914_v45, %v3105_v31 }
 0x268   : > { %v3141_v15 = vmax.f32 %v3125_v24, 0.0  ;;  %v2533_v53 = vpop.f32.mrf.mxu3 }
 0x269   : > { %v2748_v16 = vpop.f32.mrf.mxu0  ;;  %3867 = vmatmul.msk.bf16.gmra.mxu2 %vm444_vm0, %v4178_v3  ;;  %v3076_v32 = vpop.f32.mrf.mxu1  ;;  %v2561_v26 = vadd.f32 %v2533_v53, %v2221_v18 }
 0x26a   : > { %v2778_v1 = vadd.f32 %v2748_v16, %v2560_v6 }
 0x26c   : > { %v3106_v11 = vadd.f32 %v3076_v32, %v2778_v1  ;;  %v4182_v32 = vld [vmem:[%s4457_s14 + $0x38] sm:$0xff]  ;;  %s341_s14 = sand.u32 1, %s4271_s10  }
 0x26d   : > { %s3501_s25 = sshll.u32 %s341_s14, 7  ;;  %s3406_s13 = scalar_lea.sflag [#allocation4], %s341_s14 }
 0x26e   : > { %v3126_v38 = vadd.f32 %v5914_v45, %v3106_v11  ;;  %s5985_s26 = scalar_lea.vmem [#allocation5], %s3501_s25 }
 0x26f   : > { %s3418_s28 = sshll.u32 %s5985_s26, 4  ;;  %s3419_s28 = int_to_ptr.vmem [resolvable:$true] %s3418_s28 }
 0x270   : > { %v3142_v9 = vmax.f32 %v3126_v38, 0.0  ;;  %v2535_v2 = vpop.f32.mrf.mxu3 }
 0x271   : > { %v2562_v4 = vadd.f32 %v2535_v2, %v2222_v55 }
 0x272   : > { %v3235_v42 = vpack.c.bf16 %v3142_v9, %v3141_v15  ;;  %v3079_v44 = vpop.f32.mrf.mxu1 }
 0x274   : > { %3327 = vmatmul.bf16.gmra.mxu3 %v3235_v42 }
 0x278   : > { %v2538_v50 = vpop.f32.mrf.mxu3 }
 0x279   : > { %3868 = vmatmul.msk.bf16.gmra.mxu2 %vm444_vm0, %v4179_v61 }
 0x27a   : > { %v3081_v51 = vpop.f32.mrf.mxu1 }
 0x27c   : > { %v2751_v56 = vpop.f32.mrf.mxu0 }
 0x27d   : > { %v2779_v20 = vadd.f32 %v2751_v56, %v2561_v26 }
 0x27f   : > { %v3107_v23 = vadd.f32 %v3079_v44, %v2779_v20 }
 0x280   : > { %v2540_v36 = vpop.f32.mrf.mxu3 }
 0x281   : > { %v2198_v19 = vpop.f32.mrf.mxu2  ;;  %v3127_v5 = vadd.f32 %v5914_v45, %v3107_v23 }
 0x282   : > { %v2223_v52 = vadd.f32 %v2198_v19, %v5835_v54 }
 0x283   : > { %v3143_v13 = vmax.f32 %v3127_v5, 0.0 }
 0x284   : > { %v2753_v0 = vpop.f32.mrf.mxu0  ;;  %v2563_v48 = vadd.f32 %v2538_v50, %v2223_v52 }
 0x285   : > { %v2780_v57 = vadd.f32 %v2753_v0, %v2562_v4 }
 0x287   : > { %v3108_v47 = vadd.f32 %v3081_v51, %v2780_v57 }
 0x289   : > { %v3128_v22 = vadd.f32 %v5914_v45, %v3108_v47  ;;  %3869 = vmatmul.msk.bf16.gmra.mxu2 %vm444_vm0, %v4180_v14  ;;  %v2200_v63 = vpop.f32.mrf.mxu2 }
 0x28a   : > { %v2224_v30 = vadd.f32 %v2200_v63, %v5849_v59  ;;  %v5980_v63 = vld [vmem:[%s6060_s8] ss:$0 sm:$0xff] }
 0x28b   : > { %v3144_v41 = vmax.f32 %v3128_v22, 0.0 }
 0x28c   : > { %v2756_v39 = vpop.f32.mrf.mxu0  ;;  %v2564_v54 = vadd.f32 %v2540_v36, %v2224_v30 }
 0x28d   : > { %v3084_v60 = vpop.f32.mrf.mxu1  ;;  %v3236_v12 = vpack.c.bf16 %v3144_v41, %v3143_v13  ;;  %v2781_v21 = vadd.f32 %v2756_v39, %v2563_v48 }
 0x28f   : > { %3332 = vmatmul.bf16.gmra.mxu3 %v3236_v12  ;;  %v3109_v58 = vadd.f32 %v3084_v60, %v2781_v21 }
 0x291   : > { %v3129_v34 = vadd.f32 %v5914_v45, %v3109_v58 }
 0x293   : > { %v3145_v62 = vmax.f32 %v3129_v34, 0.0 }
 0x294   : > { %v2758_v29 = vpop.f32.mrf.mxu0 }
 0x295   : > { %v2782_v33 = vadd.f32 %v2758_v29, %v2564_v54  ;;  %v3086_v46 = vpop.f32.mrf.mxu1 }
 0x297   : > { %v3110_v40 = vadd.f32 %v3086_v46, %v2782_v33 }
 0x299   : > { %v3130_v25 = vadd.f32 %v5914_v45, %v3110_v40  ;;  %3870 = vmatmul.msk.bf16.gmra.mxu2 %vm444_vm0, %v4181_v28 }
 0x29b   : > { %v3146_v17 = vmax.f32 %v3130_v25, 0.0 }
 0x29c   : > { %v2203_v59 = vpop.f32.mrf.mxu2 }
 0x29d   : > { %v3237_v27 = vpack.c.bf16 %v3146_v17, %v3145_v62  ;;  %v2225_v6 = vadd.f32 %v2203_v59, %v5867_v10 }
 0x29f   : > { %3337 = vmatmul.bf16.gmra.mxu3 %v3237_v27 }
 0x2a4   : > { %v2205_v43 = vpop.f32.mrf.mxu2 }
 0x2a5   : > { %v2226_v38 = vadd.f32 %v2205_v43, %v5878_v8 }
 0x2a7   : > { %v2543_v31 = vpop.f32.mrf.mxu3 }
 0x2a8   : > { %v2565_v16 = vadd.f32 %v2543_v31, %v2225_v6  ;;  %v3089_v3 = vpop.f32.mrf.mxu1 }
 0x2a9   : > { %v2761_v1 = vpop.f32.mrf.mxu0  ;;  %3871 = vmatmul.msk.bf16.gmra.mxu2 %vm444_vm0, %v4182_v32 }
 0x2aa   : > { %v2783_v24 = vadd.f32 %v2761_v1, %v2565_v16 }
 0x2ac   : > { %v2208_v11 = vpop.f32.mrf.mxu2  ;;  %v3111_v15 = vadd.f32 %v3089_v3, %v2783_v24 }
 0x2ad   : > { %v2227_v44 = vadd.f32 %v2208_v11, %v5895_v35 }
 0x2ae   : > { %v3131_v49 = vadd.f32 %v5914_v45, %v3111_v15 }
 0x2af   : > { %v2545_v37 = vpop.f32.mrf.mxu3 }
 0x2b0   : > { %v2566_v9 = vadd.f32 %v2545_v37, %v2226_v38  ;;  %v3091_v42 = vpop.f32.mrf.mxu1  ;;  %v3147_v2 = vmax.f32 %v3131_v49, 0.0 }
 0x2b1   : > { %v2763_v53 = vpop.f32.mrf.mxu0 }
 0x2b2   : > { %v2784_v61 = vadd.f32 %v2763_v53, %v2566_v9 }
 0x2b4   : > { %v3112_v10 = vadd.f32 %v3091_v42, %v2784_v61  ;;  %v2210_v18 = vpop.f32.mrf.mxu2 }
 0x2b5   : > { %v2228_v51 = vadd.f32 %v2210_v18, %v5905_v7 }
 0x2b6   : > { %v3132_v56 = vadd.f32 %v5914_v45, %v3112_v10 }
 0x2b7   : > { %v2548_v26 = vpop.f32.mrf.mxu3 }
 0x2b8   : > { %v3148_v20 = vmax.f32 %v3132_v56, 0.0  ;;  %v2567_v55 = vadd.f32 %v2548_v26, %v2227_v44  ;;  %v3094_v19 = vpop.f32.mrf.mxu1 }
 0x2b9   : > { %v2766_v8 = vpop.f32.mrf.mxu0 }
 0x2ba   : > { %v3238_v4 = vpack.c.bf16 %v3148_v20, %v3147_v2  ;;  %v2785_v23 = vadd.f32 %v2766_v8, %v2567_v55 }
 0x2bc   : > { %3342 = vmatmul.bf16.gmra.mxu3 %v3238_v4  ;;  %v3192_v0 = vpop.f32.mrf.mxu2  ;;  %v3113_v5 = vadd.f32 %v3094_v19, %v2785_v23 }
 0x2be   : > { %v3133_v22 = vadd.f32 %v5914_v45, %v3113_v5 }
 0x2bf   : > { %v2550_v57 = vpop.f32.mrf.mxu3 }
 0x2c0   : > { %v2568_v47 = vadd.f32 %v2550_v57, %v2228_v51  ;;  %v3096_v52 = vpop.f32.mrf.mxu1  ;;  %v3149_v39 = vmax.f32 %v3133_v22, 0.0 }
 0x2c1   : > { %v2768_v35 = vpop.f32.mrf.mxu0 }
 0x2c2   : > { %v2786_v50 = vadd.f32 %v2768_v35, %v2568_v47 }
 0x2c4   : > { %v3114_v14 = vadd.f32 %v3096_v52, %v2786_v50  ;;  %v3194_v13 = vpop.f32.mrf.mxu2 }
 0x2c6   : > { %v3134_v41 = vadd.f32 %v5914_v45, %v3114_v14 }
 0x2c7   : > { %v3313_v7 = vpop.f32.mrf.mxu3 }
 0x2c8   : > { %v3150_v48 = vmax.f32 %v3134_v41, 0.0  ;;  %v3314_v60 = vadd.f32 %v3313_v7, %v3192_v0 }
 0x2ca   : > { %v3357_v12 = vadd.f32 %v5980_v63, %v3314_v60  ;;  %v3239_v30 = vpack.c.bf16 %v3150_v48, %v3149_v39 }
 0x2cc   : > { %v3373_v21 = vmax.f32 %v3357_v12, 0.0  ;;  %3347 = vmatmul.bf16.gmra.mxu3 %v3239_v30  ;;  %v3197_v36 = vpop.f32.mrf.mxu2 }
 0x2ce   : > { %3389 = vst [vmem:[%s5985_s26] sm:$0xff] %v3373_v21 }
 0x2cf   : > { %v3315_v45 = vpop.f32.mrf.mxu3 }
 0x2d0   : > { %v3316_v58 = vadd.f32 %v3315_v45, %v3194_v13 }
 0x2d2   : > { %v3358_v54 = vadd.f32 %v5980_v63, %v3316_v58 }
 0x2d4   : > { %v3374_v29 = vmax.f32 %v3358_v54, 0.0  ;;  %v3199_v33 = vpop.f32.mrf.mxu2 }
 0x2d6   : > { %3390 = vst [vmem:[%s5985_s26 + $0x8] sm:$0xff] %v3374_v29 }
 0x2d7   : > { %v3318_v46 = vpop.f32.mrf.mxu3 }
 0x2d8   : > { %v3319_v34 = vadd.f32 %v3318_v46, %v3197_v36 }
 0x2da   : > { %v3359_v40 = vadd.f32 %v5980_v63, %v3319_v34 }
 0x2dc   : > { %v3375_v25 = vmax.f32 %v3359_v40, 0.0  ;;  %v3202_v62 = vpop.f32.mrf.mxu2 }
 0x2de   : > { %3391 = vst [vmem:[%s5985_s26 + $0x10] sm:$0xff] %v3375_v25 }
 0x2df   : > { %v3320_v28 = vpop.f32.mrf.mxu3 }
 0x2e0   : > { %v3321_v17 = vadd.f32 %v3320_v28, %v3199_v33 }
 0x2e2   : > { %v3360_v59 = vadd.f32 %v5980_v63, %v3321_v17 }
 0x2e4   : > { %v3376_v27 = vmax.f32 %v3360_v59, 0.0  ;;  %v3204_v31 = vpop.f32.mrf.mxu2 }
 0x2e6   : > { %3392 = vst [vmem:[%s5985_s26 + $0x18] sm:$0xff] %v3376_v27 }
 0x2e7   : > { %v3323_v43 = vpop.f32.mrf.mxu3 }
 0x2e8   : > { %v3324_v6 = vadd.f32 %v3323_v43, %v3202_v62 }
 0x2ea   : > { %v3361_v16 = vadd.f32 %v5980_v63, %v3324_v6 }
 0x2ec   : > { %v3377_v3 = vmax.f32 %v3361_v16, 0.0  ;;  %v3207_v11 = vpop.f32.mrf.mxu2 }
 0x2ee   : > { %3393 = vst [vmem:[%s5985_s26 + $0x20] sm:$0xff] %v3377_v3 }
 0x2ef   : > { %v3325_v1 = vpop.f32.mrf.mxu3 }
 0x2f0   : > { %v3326_v32 = vadd.f32 %v3325_v1, %v3204_v31 }
 0x2f2   : > { %v3362_v24 = vadd.f32 %v5980_v63, %v3326_v32 }
 0x2f4   : > { %v3378_v38 = vmax.f32 %v3362_v24, 0.0  ;;  %v3209_v53 = vpop.f32.mrf.mxu2 }
 0x2f6   : > { %3394 = vst [vmem:[%s5985_s26 + $0x28] sm:$0xff] %v3378_v38 }
 0x2f7   : > { %v3328_v37 = vpop.f32.mrf.mxu3 }
 0x2f8   : > { %v3329_v15 = vadd.f32 %v3328_v37, %v3207_v11 }
 0x2fa   : > { %v3363_v9 = vadd.f32 %v5980_v63, %v3329_v15 }
 0x2fc   : > { %v3379_v42 = vmax.f32 %v3363_v9, 0.0  ;;  %v3212_v44 = vpop.f32.mrf.mxu2 }
 0x2fe   : > { %3395 = vst [vmem:[%s5985_s26 + $0x30] sm:$0xff] %v3379_v42 }
 0x2ff   : > { %v3330_v61 = vpop.f32.mrf.mxu3 }
 0x300   : > { %v3331_v49 = vadd.f32 %v3330_v61, %v3209_v53 }
 0x302   : > { %v3364_v10 = vadd.f32 %v5980_v63, %v3331_v49 }
 0x304   : > { %v3380_v18 = vmax.f32 %v3364_v10, 0.0  ;;  %v3214_v2 = vpop.f32.mrf.mxu2 }
 0x306   : > { %3396 = vst [vmem:[%s5985_s26 + $0x38] sm:$0xff] %v3380_v18 }
 0x30c   : > { %v3217_v23 = vpop.f32.mrf.mxu2 }
 0x312   : > { %v3333_v56 = vpop.f32.mrf.mxu3 }
 0x313   : > { %v3334_v26 = vadd.f32 %v3333_v56, %v3212_v44 }
 0x314   : > { %v3219_v35 = vpop.f32.mrf.mxu2 }
 0x315   : > { %v3365_v20 = vadd.f32 %v5980_v63, %v3334_v26 }
 0x317   : > { %v3381_v55 = vmax.f32 %v3365_v20, 0.0 }
 0x319   : > { %3397 = vst [vmem:[%s5985_s26 + $0x40] sm:$0xff] %v3381_v55 }
 0x31a   : > { %v3335_v19 = vpop.f32.mrf.mxu3 }
 0x31b   : > { %v3336_v8 = vadd.f32 %v3335_v19, %v3214_v2 }
 0x31c   : > { %v3222_v13 = vpop.f32.mrf.mxu2 }
 0x31d   : > { %v3366_v4 = vadd.f32 %v5980_v63, %v3336_v8 }
 0x31f   : > { %v3382_v0 = vmax.f32 %v3366_v4, 0.0 }
 0x321   : > { %3398 = vst [vmem:[%s5985_s26 + $0x48] sm:$0xff] %v3382_v0 }
 0x322   : > { %v3338_v51 = vpop.f32.mrf.mxu3 }
 0x323   : > { %v3339_v57 = vadd.f32 %v3338_v51, %v3217_v23 }
 0x324   : > { %v3224_v48 = vpop.f32.mrf.mxu2 }
 0x325   : > { %v3367_v5 = vadd.f32 %v5980_v63, %v3339_v57 }
 0x327   : > { %v3383_v47 = vmax.f32 %v3367_v5, 0.0 }
 0x329   : > { %3399 = vst [vmem:[%s5985_s26 + $0x50] sm:$0xff] %v3383_v47 }
 0x32a   : > { %v3340_v50 = vpop.f32.mrf.mxu3 }
 0x32b   : > { %v3341_v52 = vadd.f32 %v3340_v50, %v3219_v35 }
 0x32c   : > { %v3227_v45 = vpop.f32.mrf.mxu2 }
 0x32d   : > { %v3368_v22 = vadd.f32 %v5980_v63, %v3341_v52 }
 0x32f   : > { %v3384_v14 = vmax.f32 %v3368_v22, 0.0 }
 0x331   : > { %3400 = vst [vmem:[%s5985_s26 + $0x58] sm:$0xff] %v3384_v14 }
 0x334   : > { %v3229_v46 = vpop.f32.mrf.mxu2 }
 0x33f   : > { %v3343_v41 = vpop.f32.mrf.mxu3 }
 0x340   : > { %v3344_v7 = vadd.f32 %v3343_v41, %v3222_v13 }
 0x342   : > { %v3369_v39 = vadd.f32 %v5980_v63, %v3344_v7 }
 0x344   : > { %v3385_v60 = vmax.f32 %v3369_v39, 0.0 }
 0x346   : > { %3401 = vst [vmem:[%s5985_s26 + $0x60] sm:$0xff] %v3385_v60 }
 0x347   : > { %v3345_v12 = vpop.f32.mrf.mxu3 }
 0x348   : > { %v3346_v30 = vadd.f32 %v3345_v12, %v3224_v48 }
 0x34a   : > { %v3370_v21 = vadd.f32 %v5980_v63, %v3346_v30 }
 0x34c   : > { %v3386_v36 = vmax.f32 %v3370_v21, 0.0 }
 0x34e   : > { %3402 = vst [vmem:[%s5985_s26 + $0x68] sm:$0xff] %v3386_v36 }
 0x34f   : > { %v3348_v58 = vpop.f32.mrf.mxu3 }
 0x350   : > { %v3349_v54 = vadd.f32 %v3348_v58, %v3227_v45 }
 0x352   : > { %v3371_v29 = vadd.f32 %v5980_v63, %v3349_v54 }
 0x354   : > { %v3387_v33 = vmax.f32 %v3371_v29, 0.0 }
 0x356   : > { %3403 = vst [vmem:[%s5985_s26 + $0x70] sm:$0xff] %v3387_v33 }
 0x357   : > { %v3350_v34 = vpop.f32.mrf.mxu3 }
 0x358   : > { %v3351_v40 = vadd.f32 %v3350_v34, %v3229_v46 }
 0x35a   : > { %v3372_v25 = vadd.f32 %v5980_v63, %v3351_v40 }
 0x35c   : > { %v3388_v28 = vmax.f32 %v3372_v25, 0.0 }
 0x35e   : > { %3404 = vst [vmem:[%s5985_s26 + $0x78] sm:$0xff] %v3388_v28 }
 0x35f   : > { %4240 = shalt.err (!%p4237_p8)
}
 0x360   : > { %s4292_s14 = smov 128   ;;  %s4293_s26 = smov 8  }
 0x361   : > { %4010 = dma.vmem_to_hbm [thread:$0]  (%p4382_p5), %s3419_s28, 2048, %s3421_s21, %s3406_s13, %s4292_s14, %s4292_s14, %s4293_s26  }
 0x362 PF: > { %p4022_p9 = scmp.ge.s32.totalorder %s4279_s12, 2  ;;  %s3435_s17 = sand.u32 1, %s4267_s30  }
 0x363   : > { %s3436_s24 = scalar_lea.sflag [#allocation4], %s3435_s17 }
 0x364   : > { %p4017_p10 = pnand %p4022_p9, %p4386_p6 }
 0x366   : > { %p4018_p11 = pneg %p4017_p10 }
 0x368   : > { %4262 = dma.done.wait (%p4018_p11), %s3436_s24, 2048  }
 0x369   : > { %4264 = vsyncadd (%p4018_p11), %s3436_s24, 4294965248  ;;  %p20_p12 = scmp.ge.s32.totalorder %s4369_s15, 4   ;;  %s6118_s30 = smov %s4271_s10 }
 0x36a   : > { %s6119_s10 = smov %s4275_s11  ;;  %s6120_s11 = smov %s4380_s18 }
 0x36b   : > { %s6121_s12 = smov %s4369_s15  ;;  %22 = sbr.rel (!%p20_p12) target bundleno = 4 (0x4), region = 104 }
 0x370   :  { %3442 = vsyncpa [#allocation3], 1 }
 0x371   :  { %3444 = vsyncpa [#allocation3 + $0x1], 1 }
 0x372   :  { %3445 = vsyncpa [#allocation4], 1 }
 0x373   :  { %3447 = vsyncpa [#allocation4 + $0x1], 1 }

</bundles_post_ra>
